<compile_context>
chip_gen: v7x
topology: tpu7x:2x2x1
jax: 0.10.0
libtpu: 0.0.40
codegen_flags: <defaults>
</compile_context>

<pallas_src>
import functools

import jax
import jax.numpy as jnp
from jax.experimental import pallas as pl
from jax.experimental.pallas import tpu as pltpu


def _round_up(x, m):
    return ((x + m - 1) // m) * m


def _vq_kernel(x_ref, emb_ref, esqh_ref, q_ref, idx_ref, sqerr_ref,
               min_sc, arg_sc, qacc_sc, *, n_valid):
    """Grid (i, k): row tile i, codebook block k (reduction, innermost)."""
    i = pl.program_id(0)
    k = pl.program_id(1)
    nk = pl.num_programs(1)

    x = x_ref[...]                         # (TN, D)  native dtype
    e = emb_ref[...]                       # (TK, D)  native dtype
    esq_half = esqh_ref[...]               # (1, TK)  f32: 0.5*||e||^2 (padded codes: huge)
    tile_n = x.shape[0]
    tile_k = e.shape[0]

    # argmin_k ||x - e_k||^2 == argmin_k (0.5*||e_k||^2 - x . e_k)
    # (per-row ||x||^2 dropped; 2.0 folded into the hoisted term).
    dots = jax.lax.dot_general(x, e, (((1,), (1,)), ((), ())),
                               preferred_element_type=jnp.float32)   # (TN, TK) MXU
    score = esq_half - dots                                          # (TN, TK)

    # Local argmin in this K block, first-match tie-break.
    col = jax.lax.broadcasted_iota(jnp.int32, score.shape, 1)        # (TN, TK)
    loc_min = jnp.min(score, axis=1, keepdims=True)                  # (TN, 1)
    loc_arg = jnp.min(jnp.where(score == loc_min, col, tile_k),
                      axis=1, keepdims=True)                         # (TN, 1)
    onehot = (col == loc_arg).astype(e.dtype)                        # (TN, TK), exact 0/1
    # Codebook gather for the local winner (MXU, exact).
    loc_q = jax.lax.dot_general(onehot, e, (((1,), (0,)), ((), ())),
                                preferred_element_type=jnp.float32)  # (TN, D)
    loc_arg_g = loc_arg + k * tile_k                                  # global code id

    @pl.when(k == 0)
    def _():
        min_sc[...] = loc_min
        arg_sc[...] = loc_arg_g
        qacc_sc[...] = loc_q

    @pl.when(k > 0)
    def _():
        # Strict '<' keeps the earlier block on ties -> first-occurrence argmin.
        better = loc_min < min_sc[...]                                # (TN, 1)
        min_sc[...] = jnp.where(better, loc_min, min_sc[...])
        arg_sc[...] = jnp.where(better, loc_arg_g, arg_sc[...])
        qacc_sc[...] = jnp.where(better, loc_q, qacc_sc[...])

    @pl.when(k == nk - 1)
    def _():
        q = qacc_sc[...]                                              # (TN, D) f32
        q_ref[...] = q.astype(q_ref.dtype)                            # input dtype writeback
        idx_ref[...] = arg_sc[...]                                    # (TN, 1) int32
        diff = q - x.astype(jnp.float32)
        if n_valid is not None:
            rows = i * tile_n + jax.lax.broadcasted_iota(jnp.int32, (tile_n, 1), 0)
            diff = jnp.where(rows < n_valid, diff, 0.0)               # mask padded rows
        sqerr_ref[...] = jnp.sum(diff * diff).reshape(1, 1, 1)


@functools.partial(jax.jit,
                   static_argnames=("commitment_cost", "tile_n", "tile_k"))
def vector_quantizer_forward(latents, embedding, commitment_cost=0.25,
                             tile_n=1024, tile_k=512):
    """Pallas implementation of VectorQuantizer.forward.

    latents:   (B, D, H, W) (NCHW, like the PyTorch module)
    embedding: (K, D) codebook
    returns (quantized_latents (B,D,H,W), vq_loss scalar, perplexity scalar)
    """
    B, D, H, W = latents.shape
    K, D2 = embedding.shape
    assert D == D2, "embedding_dim mismatch"
    N = B * H * W

    # glue: NCHW -> (N, D) rows.
    flat = jnp.transpose(latents, (0, 2, 3, 1)).reshape(N, D)

    # Row tiling (multiple of 256 for MXU-friendliness); padded rows are masked
    # out of sqerr in-kernel and sliced off q / idx in the wrapper.
    tile_n = min(_round_up(tile_n, 256), _round_up(N, 256))
    num_tiles = -(-N // tile_n)
    n_pad = num_tiles * tile_n
    if n_pad != N:
        flat = jnp.pad(flat, ((0, n_pad - N), (0, 0)))
        n_valid = N
    else:
        n_valid = None

    # Codebook tiling: K block is a multiple of 128 lanes; pad K to a multiple
    # of the block.  Padded codes get a huge 0.5*||e||^2 so they never win.
    tile_k = min(_round_up(tile_k, 128), _round_up(K, 128))
    num_kblocks = -(-K // tile_k)
    k_pad = num_kblocks * tile_k
    emb_pad = jnp.pad(embedding, ((0, k_pad - K), (0, 0))) if k_pad != K else embedding

    e32 = embedding.astype(jnp.float32)
    esq_half = 0.5 * jnp.sum(e32 * e32, axis=1)                       # (K,)
    huge = float(jnp.finfo(jnp.float32).max) * 0.5
    if k_pad != K:
        esq_half = jnp.pad(esq_half, (0, k_pad - K), constant_values=huge)
    esq_half = esq_half[None, :]                                      # (1, k_pad)

    kernel = functools.partial(_vq_kernel, n_valid=n_valid)

    q_flat, idx, sqerr_p = pl.pallas_call(
        kernel,
        out_shape=(
            jax.ShapeDtypeStruct((n_pad, D), latents.dtype),          # q, input dtype
            jax.ShapeDtypeStruct((n_pad, 1), jnp.int32),              # argmin code ids
            jax.ShapeDtypeStruct((num_tiles, 1, 1), jnp.float32),     # per-tile sq-err
        ),
        grid_spec=pltpu.PrefetchScalarGridSpec(
            num_scalar_prefetch=0,
            grid=(num_tiles, num_kblocks),          # reduction (K) axis innermost
            in_specs=[
                pl.BlockSpec((tile_n, D), lambda i, k: (i, 0)),       # latent rows (resident over k)
                pl.BlockSpec((tile_k, D), lambda i, k: (k, 0)),       # codebook block (streamed)
                pl.BlockSpec((1, tile_k), lambda i, k: (0, k)),       # 0.5*||e||^2 block
            ],
            out_specs=(
                pl.BlockSpec((tile_n, D), lambda i, k: (i, 0)),
                pl.BlockSpec((tile_n, 1), lambda i, k: (i, 0)),
                pl.BlockSpec((1, 1, 1), lambda i, k: (i, 0, 0)),
            ),
            scratch_shapes=[
                pltpu.VMEM((tile_n, 1), jnp.float32),                 # running min score
                pltpu.VMEM((tile_n, 1), jnp.int32),                   # running argmin
                pltpu.VMEM((tile_n, D), jnp.float32),                 # running gathered code
            ],
        ),
        compiler_params=pltpu.CompilerParams(
            dimension_semantics=("parallel", "arbitrary"),            # rows shard on v7x megacore
            vmem_limit_bytes=48 * 1024 * 1024,                        # sized for v7x's 64 MiB
        ),
    )(flat, emb_pad, esq_half)

    q_flat = q_flat[:N]
    idx = idx[:N, 0]

    # glue: (N, D) -> NCHW
    quantized = jnp.transpose(q_flat.reshape(B, H, W, D), (0, 3, 1, 2)).astype(latents.dtype)

    # Code usage counts from the per-row argmin indices (tiny scatter-add).
    counts = jnp.zeros((K,), jnp.float32).at[idx].add(1.0)
    sqerr = jnp.sum(sqerr_p)

    # VQ loss: both MSE terms share the same forward value.
    mse = sqerr / jnp.float32(N * D)
    vq_loss = mse + commitment_cost * mse

    # Perplexity from per-code usage counts.
    avg_probs = counts / jnp.float32(N)
    perplexity = jnp.exp(-jnp.sum(avg_probs * jnp.log(avg_probs + 1e-10)))

    # Straight-through estimator (forward value == quantized).
    quantized_st = latents + jax.lax.stop_gradient(quantized - latents)
    return quantized_st, vq_loss, perplexity


def _reference_forward(latents, embedding, commitment_cost=0.25):
    """Pure-JAX reference mirroring the PyTorch forward (for verification)."""
    B, D, H, W = latents.shape
    K = embedding.shape[0]
    flat = jnp.transpose(latents, (0, 2, 3, 1)).reshape(-1, D)
    dist = (
        jnp.sum(flat ** 2, axis=1, keepdims=True)
        + jnp.sum(embedding ** 2, axis=1)
        - 2.0 * flat @ embedding.T
    )
    idx = jnp.argmin(dist, axis=1)
    enc = jax.nn.one_hot(idx, K, dtype=jnp.float32)
    q = embedding[idx].reshape(B, H, W, D).transpose(0, 3, 1, 2)
    mse = jnp.mean((q - latents) ** 2)
    vq_loss = mse + commitment_cost * mse
    avg_probs = jnp.mean(enc, axis=0)
    perplexity = jnp.exp(-jnp.sum(avg_probs * jnp.log(avg_probs + 1e-10)))
    return q, vq_loss, perplexity


if __name__ == "__main__":
    # Module hyperparameters
    num_embeddings = 8
    embedding_dim = 4
    commitment_cost = 0.25

    # Deterministic parameter init: uniform(-1/K, 1/K), like the nn.Embedding init.
    key = jax.random.PRNGKey(0)
    k_emb, k_x = jax.random.split(key)
    embedding = jax.random.uniform(
        k_emb, (num_embeddings, embedding_dim),
        minval=-1.0 / num_embeddings, maxval=1.0 / num_embeddings,
        dtype=jnp.float32,
    )

    # Input latents, NCHW like the PyTorch module: (B, D, H, W)
    B, H, W = 2, 16, 16
    latents = jax.random.normal(k_x, (B, embedding_dim, H, W), dtype=jnp.float32)

    q, vq_loss, perplexity = vector_quantizer_forward(
        latents, embedding, commitment_cost=commitment_cost
    )
    jax.block_until_ready((q, vq_loss, perplexity))

    # Verify against a pure-JAX reference of the PyTorch semantics.
    q_ref, loss_ref, perp_ref = _reference_forward(
        latents, embedding, commitment_cost=commitment_cost
    )
    assert q.shape == latents.shape
    assert jnp.allclose(q, q_ref, atol=1e-5), "quantized mismatch"
    assert jnp.allclose(vq_loss, loss_ref, atol=1e-5), "vq_loss mismatch"
    assert jnp.allclose(perplexity, perp_ref, atol=1e-4), "perplexity mismatch"

    print("KERNEL_OK")
</pallas_src>

<mosaic_0001>
module attributes {stable_mosaic.version = 11 : i64} {
  func.func private @main(%arg0: i32) attributes {dimension_semantics = [#tpu.dimension_semantics<core_parallel>], iteration_bounds = array<i64: 2>, tpu.core_type = #tpu.core_type<sc_scalar_subcore>, window_params = []} {
    return
  }
}

module attributes {stable_mosaic.version = 11 : i64} {
  func.func private @main(%arg0: i32) attributes {dimension_semantics = [#tpu.dimension_semantics<core_parallel>], iteration_bounds = array<i64: 2>, tpu.core_type = #tpu.core_type<sc_scalar_subcore>, window_params = []} {
    return
  }
}

module attributes {stable_mosaic.version = 11 : i64} {
  func.func @_vq_kernel(%arg0: i32, %arg1: i32, %arg2: memref<512x4xf32, #tpu.memory_space<vmem>>, %arg3: memref<128x4xf32, #tpu.memory_space<vmem>>, %arg4: memref<1x128xf32, #tpu.memory_space<vmem>>, %arg5: memref<512x4xf32, #tpu.memory_space<vmem>>, %arg6: memref<512x1xi32, #tpu.memory_space<vmem>>, %arg7: memref<1x1x1xf32, #tpu.memory_space<vmem>>, %arg8: memref<512x1xf32, #tpu.memory_space<vmem>>, %arg9: memref<512x1xi32, #tpu.memory_space<vmem>>, %arg10: memref<512x4xf32, #tpu.memory_space<vmem>>) attributes {dimension_semantics = [#tpu.dimension_semantics<parallel>, #tpu.dimension_semantics<arbitrary>], iteration_bounds = array<i64: 1, 1>, scalar_prefetch = 0 : i64, scratch_operands = 3 : i64, tpu.core_type = #tpu.core_type<tc>, window_params = [{transform_indices = @transform_0, window_bounds = array<i64: 512, 4>}, {transform_indices = @transform_1, window_bounds = array<i64: 128, 4>}, {transform_indices = @transform_2, window_bounds = array<i64: 1, 128>}, {transform_indices = @transform_3, window_bounds = array<i64: 512, 4>}, {transform_indices = @transform_4, window_bounds = array<i64: 512, 1>}, {transform_indices = @transform_5, window_bounds = array<i64: 1, 1, 1>}]} {
    %c0 = arith.constant 0 : index
    %c0_0 = arith.constant 0 : index
    %0 = vector.load %arg2[%c0, %c0_0] : memref<512x4xf32, #tpu.memory_space<vmem>>, vector<512x4xf32>
    %c0_1 = arith.constant 0 : index
    %c0_2 = arith.constant 0 : index
    %1 = vector.load %arg3[%c0_1, %c0_2] : memref<128x4xf32, #tpu.memory_space<vmem>>, vector<128x4xf32>
    %c0_3 = arith.constant 0 : index
    %c0_4 = arith.constant 0 : index
    %2 = vector.load %arg4[%c0_3, %c0_4] : memref<1x128xf32, #tpu.memory_space<vmem>>, vector<1x128xf32>
    %cst = arith.constant dense<0.000000e+00> : vector<512x128xf32>
    %3 = tpu.matmul %0, %1, %cst {dimension_numbers = #tpu.dot_dimension_numbers<[1], [1], [0], [0], [0, 0, 1, 0], [], []>} : vector<512x4xf32>, vector<128x4xf32>, vector<512x128xf32> -> vector<512x128xf32>
    %4 = vector.broadcast %2 : vector<1x128xf32> to vector<512x128xf32>
    %5 = arith.subf %4, %3 : vector<512x128xf32>
    %6 = tpu.iota {dimensions = array<i32: 1>} : vector<512x128xi32>
    %cst_5 = arith.constant dense<0x7F800000> : vector<512xf32>
    %7 = vector.multi_reduction <minimumf>, %5, %cst_5 [1] : vector<512x128xf32> to vector<512xf32>
    %8 = vector.shape_cast %7 : vector<512xf32> to vector<512x1xf32>
    %9 = vector.broadcast %8 : vector<512x1xf32> to vector<512x128xf32>
    %10 = arith.cmpf oeq, %5, %9 : vector<512x128xf32>
    %c128_i32 = arith.constant 128 : i32
    %11 = vector.broadcast %c128_i32 : i32 to vector<512x128xi32>
    %12 = arith.select %10, %6, %11 : vector<512x128xi1>, vector<512x128xi32>
    %cst_6 = arith.constant dense<2147483647> : vector<512xi32>
    %13 = vector.multi_reduction <minsi>, %12, %cst_6 [1] : vector<512x128xi32> to vector<512xi32>
    %14 = vector.shape_cast %13 : vector<512xi32> to vector<512x1xi32>
    %15 = vector.broadcast %14 : vector<512x1xi32> to vector<512x128xi32>
    %16 = arith.cmpi eq, %6, %15 : vector<512x128xi32>
    %17 = arith.extui %16 : vector<512x128xi1> to vector<512x128xi32>
    %18 = arith.sitofp %17 : vector<512x128xi32> to vector<512x128xf32>
    %cst_7 = arith.constant dense<0.000000e+00> : vector<512x4xf32>
    %19 = tpu.matmul %18, %1, %cst_7 {dimension_numbers = #tpu.dot_dimension_numbers<[1], [0], [0], [1], [0, 0, 1, 1], [], []>} : vector<512x128xf32>, vector<128x4xf32>, vector<512x4xf32> -> vector<512x4xf32>
    %c128_i32_8 = arith.constant 128 : i32
    %20 = arith.muli %arg1, %c128_i32_8 : i32
    %21 = vector.broadcast %20 : i32 to vector<512x1xi32>
    %22 = arith.addi %14, %21 : vector<512x1xi32>
    %c0_i32 = arith.constant 0 : i32
    %23 = arith.cmpi eq, %arg1, %c0_i32 : i32
    %24 = arith.extui %23 : i1 to i32
    %c0_i32_9 = arith.constant 0 : i32
    %25 = arith.cmpi ne, %24, %c0_i32_9 : i32
    scf.if %25 {
      %c0_14 = arith.constant 0 : index
      %c0_15 = arith.constant 0 : index
      %32 = vector.load %arg8[%c0_14, %c0_15] : memref<512x1xf32, #tpu.memory_space<vmem>>, vector<512x1xf32>
      tpu.vector_store %arg8[%c0_14, %c0_15], %8 {strides = array<i32>} : memref<512x1xf32, #tpu.memory_space<vmem>>, vector<512x1xf32>,
      %c0_16 = arith.constant 0 : index
      %c0_17 = arith.constant 0 : index
      %33 = vector.load %arg9[%c0_16, %c0_17] : memref<512x1xi32, #tpu.memory_space<vmem>>, vector<512x1xi32>
      tpu.vector_store %arg9[%c0_16, %c0_17], %22 {strides = array<i32>} : memref<512x1xi32, #tpu.memory_space<vmem>>, vector<512x1xi32>,
      %c0_18 = arith.constant 0 : index
      %c0_19 = arith.constant 0 : index
      %34 = vector.load %arg10[%c0_18, %c0_19] : memref<512x4xf32, #tpu.memory_space<vmem>>, vector<512x4xf32>
      tpu.vector_store %arg10[%c0_18, %c0_19], %19 {strides = array<i32>} : memref<512x4xf32, #tpu.memory_space<vmem>>, vector<512x4xf32>,
    } else {
    }
    %c0_i32_10 = arith.constant 0 : i32
    %26 = arith.cmpi sgt, %arg1, %c0_i32_10 : i32
    %27 = arith.extui %26 : i1 to i32
    %c0_i32_11 = arith.constant 0 : i32
    %28 = arith.cmpi ne, %27, %c0_i32_11 : i32
    scf.if %28 {
      %c0_14 = arith.constant 0 : index
      %c0_15 = arith.constant 0 : index
      %32 = vector.load %arg8[%c0_14, %c0_15] : memref<512x1xf32, #tpu.memory_space<vmem>>, vector<512x1xf32>
      %33 = arith.cmpf olt, %8, %32 : vector<512x1xf32>
      %c0_16 = arith.constant 0 : index
      %c0_17 = arith.constant 0 : index
      %34 = vector.load %arg8[%c0_16, %c0_17] : memref<512x1xf32, #tpu.memory_space<vmem>>, vector<512x1xf32>
      %35 = arith.select %33, %8, %34 : vector<512x1xi1>, vector<512x1xf32>
      %c0_18 = arith.constant 0 : index
      %c0_19 = arith.constant 0 : index
      %36 = vector.load %arg8[%c0_18, %c0_19] : memref<512x1xf32, #tpu.memory_space<vmem>>, vector<512x1xf32>
      tpu.vector_store %arg8[%c0_18, %c0_19], %35 {strides = array<i32>} : memref<512x1xf32, #tpu.memory_space<vmem>>, vector<512x1xf32>,
      %c0_20 = arith.constant 0 : index
      %c0_21 = arith.constant 0 : index
      %37 = vector.load %arg9[%c0_20, %c0_21] : memref<512x1xi32, #tpu.memory_space<vmem>>, vector<512x1xi32>
      %38 = arith.select %33, %22, %37 : vector<512x1xi1>, vector<512x1xi32>
      %c0_22 = arith.constant 0 : index
      %c0_23 = arith.constant 0 : index
      %39 = vector.load %arg9[%c0_22, %c0_23] : memref<512x1xi32, #tpu.memory_space<vmem>>, vector<512x1xi32>
      tpu.vector_store %arg9[%c0_22, %c0_23], %38 {strides = array<i32>} : memref<512x1xi32, #tpu.memory_space<vmem>>, vector<512x1xi32>,
      %c0_24 = arith.constant 0 : index
      %c0_25 = arith.constant 0 : index
      %40 = vector.load %arg10[%c0_24, %c0_25] : memref<512x4xf32, #tpu.memory_space<vmem>>, vector<512x4xf32>
      %41 = vector.shape_cast %33 : vector<512x1xi1> to vector<512x1xi1>
      %42 = vector.broadcast %41 : vector<512x1xi1> to vector<512x4xi1>
      %43 = arith.select %42, %19, %40 : vector<512x4xi1>, vector<512x4xf32>
      %c0_26 = arith.constant 0 : index
      %c0_27 = arith.constant 0 : index
      %44 = vector.load %arg10[%c0_26, %c0_27] : memref<512x4xf32, #tpu.memory_space<vmem>>, vector<512x4xf32>
      tpu.vector_store %arg10[%c0_26, %c0_27], %43 {strides = array<i32>} : memref<512x4xf32, #tpu.memory_space<vmem>>, vector<512x4xf32>,
    } else {
    }
    %c0_i32_12 = arith.constant 0 : i32
    %29 = arith.cmpi eq, %arg1, %c0_i32_12 : i32
    %30 = arith.extui %29 : i1 to i32
    %c0_i32_13 = arith.constant 0 : i32
    %31 = arith.cmpi ne, %30, %c0_i32_13 : i32
    scf.if %31 {
      %c0_14 = arith.constant 0 : index
      %c0_15 = arith.constant 0 : index
      %32 = vector.load %arg10[%c0_14, %c0_15] : memref<512x4xf32, #tpu.memory_space<vmem>>, vector<512x4xf32>
      %c0_16 = arith.constant 0 : index
      %c0_17 = arith.constant 0 : index
      %33 = vector.load %arg5[%c0_16, %c0_17] : memref<512x4xf32, #tpu.memory_space<vmem>>, vector<512x4xf32>
      tpu.vector_store %arg5[%c0_16, %c0_17], %32 {strides = array<i32>} : memref<512x4xf32, #tpu.memory_space<vmem>>, vector<512x4xf32>,
      %c0_18 = arith.constant 0 : index
      %c0_19 = arith.constant 0 : index
      %34 = vector.load %arg9[%c0_18, %c0_19] : memref<512x1xi32, #tpu.memory_space<vmem>>, vector<512x1xi32>
      %c0_20 = arith.constant 0 : index
      %c0_21 = arith.constant 0 : index
      %35 = vector.load %arg6[%c0_20, %c0_21] : memref<512x1xi32, #tpu.memory_space<vmem>>, vector<512x1xi32>
      tpu.vector_store %arg6[%c0_20, %c0_21], %34 {strides = array<i32>} : memref<512x1xi32, #tpu.memory_space<vmem>>, vector<512x1xi32>,
      %36 = arith.subf %32, %0 : vector<512x4xf32>
      %37 = arith.mulf %36, %36 : vector<512x4xf32>
      %38 = vector.shape_cast %37 : vector<512x4xf32> to vector<1x512x4xf32>
      %cst_22 = arith.constant dense<0.000000e+00> : vector<1xf32>
      %39 = vector.multi_reduction <add>, %38, %cst_22 [1, 2] : vector<1x512x4xf32> to vector<1xf32>
      %40 = vector.shape_cast %39 : vector<1xf32> to vector<1x1x1xf32>
      %41 = vector.extract %40[0, 0, 0] : f32 from vector<1x1x1xf32>
      %42 = vector.broadcast %41 : f32 to vector<1x1x1xf32>
      %c0_23 = arith.constant 0 : index
      %c0_24 = arith.constant 0 : index
      %c0_25 = arith.constant 0 : index
      %43 = vector.load %arg7[%c0_23, %c0_24, %c0_25] : memref<1x1x1xf32, #tpu.memory_space<vmem>>, vector<1x1x1xf32>
      tpu.vector_store %arg7[%c0_23, %c0_24, %c0_25], %42 {strides = array<i32>} : memref<1x1x1xf32, #tpu.memory_space<vmem>>, vector<1x1x1xf32>,
    } else {
    }
    return
  }
  func.func @transform_0(%arg0: i32, %arg1: i32) -> (i32, i32) {
    %c0_i32 = arith.constant 0 : i32
    %c0_i32_0 = arith.constant 0 : i32
    return %arg0, %c0_i32 : i32, i32
  }
  func.func @transform_1(%arg0: i32, %arg1: i32) -> (i32, i32) {
    %c0_i32 = arith.constant 0 : i32
    %c0_i32_0 = arith.constant 0 : i32
    return %arg1, %c0_i32 : i32, i32
  }
  func.func @transform_2(%arg0: i32, %arg1: i32) -> (i32, i32) {
    %c0_i32 = arith.constant 0 : i32
    %c0_i32_0 = arith.constant 0 : i32
    return %c0_i32, %arg1 : i32, i32
  }
  func.func @transform_3(%arg0: i32, %arg1: i32) -> (i32, i32) {
    %c0_i32 = arith.constant 0 : i32
    %c0_i32_0 = arith.constant 0 : i32
    return %arg0, %c0_i32 : i32, i32
  }
  func.func @transform_4(%arg0: i32, %arg1: i32) -> (i32, i32) {
    %c0_i32 = arith.constant 0 : i32
    %c0_i32_0 = arith.constant 0 : i32
    return %arg0, %c0_i32 : i32, i32
  }
  func.func @transform_5(%arg0: i32, %arg1: i32) -> (i32, i32, i32) {
    %c0_i32 = arith.constant 0 : i32
    %c0_i32_0 = arith.constant 0 : i32
    %c0_i32_1 = arith.constant 0 : i32
    return %arg0, %c0_i32, %c0_i32_0 : i32, i32, i32
  }
}

</mosaic_0001>

<bundles_post_ra>
// kernel: vector_quantizer_forward.1
= control target key start
LH: loop header
LB: loop body
LE: loop exit
PB: predicated region body
PF: predicated region fallthrough
CT: control target
= control target key end

     0   :  { %vm99_vm0 = vcmask 31744   ;;  %s7669_s0 = inlined_call_operand.vmem [shape: f32[512,4], index: 0, kind: input, shape index: {}]   ;;  %s7670_s1 = inlined_call_operand.vmem [shape: f32[128,4], index: 1, kind: input, shape index: {}]   ;;  %s7671_s2 = inlined_call_operand.vmem [shape: f32[1,128], index: 2, kind: input, shape index: {}]   ;;  %s7672_s3 = inlined_call_operand.vmem [shape: f32[512,4], index: 3, kind: output, shape index: {0}]   ;;  %s7673_s4 = inlined_call_operand.vmem [shape: s32[512,1], index: 4, kind: output, shape index: {1}]   ;;  %s7674_s5 = inlined_call_operand.hbm [shape: f32[1,1,1], index: 5, kind: output, shape index: {2}]  }
   0x1   :  { %v82_v0 = vld [vmem:[%s7670_s1] sm:$0xff]  ;;  %v83_v1 = vld [vmem:[%s7670_s1 + $0x8] sm:$0xff]  ;;  %v84_v2 = vld [vmem:[%s7670_s1 + $0x10] sm:$0xff] }
   0x2   :  { %v4928_v3 = vpack.c.bf16 %v83_v1, %v82_v0  ;;  %vm5143_vm1 = vmpackc.low %vm99_vm0, %vm99_vm0  ;;  %v85_v5 = vld [vmem:[%s7670_s1 + $0x18] sm:$0xff]  ;;  %v86_v7 = vld [vmem:[%s7670_s1 + $0x20] sm:$0xff] }
   0x3   :  { %v4934_v6 = vpack.c.bf16 %v85_v5, %v84_v2  ;;  %v87_v8 = vld [vmem:[%s7670_s1 + $0x28] sm:$0xff]  ;;  %v18_v9 = vld [vmem:[%s7669_s0] sm:$0xff]  ;;  %v88_v11 = vld [vmem:[%s7670_s1 + $0x30] sm:$0xff] }
   0x4   :  { %4930 = vmatprep.subr.msk.bf16.mxu0 %vm5143_vm1, %v4928_v3  ;;  %4977 = vmatprep.subr.bf16.mxu1 %v4928_v3  ;;  %v4940_v10 = vpack.c.bf16 %v87_v8, %v86_v7  ;;  %v89_v12 = vld [vmem:[%s7670_s1 + $0x38] sm:$0xff]  ;;  %v90_v14 = vld [vmem:[%s7670_s1 + $0x40] sm:$0xff]  ;;  %v91_v15 = vld [vmem:[%s7670_s1 + $0x48] sm:$0xff] }
   0x5   :  { %4933 = vmatpush3.bf16.xpose.msk.msra.mxu0 %vm5143_vm1, %v4928_v3  ;;  %4979 = vmatpush3.bf16.msra.mxu1 %v4928_v3  ;;  %v4946_v13 = vpack.c.bf16 %v89_v12, %v88_v11  ;;  %v4952_v16 = vpack.c.bf16 %v91_v15, %v90_v14  ;;  %v92_v17 = vld [vmem:[%s7670_s1 + $0x50] sm:$0xff]  ;;  %v93_v18 = vld [vmem:[%s7670_s1 + $0x58] sm:$0xff]  ;;  %v94_v20 = vld [vmem:[%s7670_s1 + $0x60] sm:$0xff] }
   0x6   :  { %4936 = vmatprep.subr.msk.bf16.mxu0 %vm5143_vm1, %v4934_v6  ;;  %4981 = vmatprep.subr.bf16.mxu1 %v4934_v6  ;;  %v4958_v19 = vpack.c.bf16 %v93_v18, %v92_v17  ;;  %v95_v21 = vld [vmem:[%s7670_s1 + $0x68] sm:$0xff] }
   0x7   :  { %4704 = vmatprep.mubr.msk.f32.mxu0 %vm99_vm0, %v18_v9 }
   0x9   :  { %4983 = vmatpush3.bf16.msra.mxu1 %v4934_v6 }
   0xa   :  { %4985 = vmatprep.subr.bf16.mxu1 %v4940_v10 }
   0xd   :  { %4939 = vmatpush3.bf16.xpose.msk.msra.mxu0 %vm5143_vm1, %v4934_v6  ;;  %4987 = vmatpush3.bf16.msra.mxu1 %v4940_v10 }
   0xe   :  { %4942 = vmatprep.subr.msk.bf16.mxu0 %vm5143_vm1, %v4940_v10  ;;  %4989 = vmatprep.subr.bf16.mxu1 %v4946_v13 }
  0x11   :  { %4991 = vmatpush3.bf16.msra.mxu1 %v4946_v13 }
  0x12   :  { %4993 = vmatprep.subr.bf16.mxu1 %v4952_v16 }
  0x15   :  { %4945 = vmatpush3.bf16.xpose.msk.msra.mxu0 %vm5143_vm1, %v4940_v10  ;;  %4995 = vmatpush3.bf16.msra.mxu1 %v4952_v16 }
  0x16   :  { %11 = vsyncpa [#allocation6], 0  ;;  %4948 = vmatprep.subr.msk.bf16.mxu0 %vm5143_vm1, %v4946_v13  ;;  %4997 = vmatprep.subr.bf16.mxu1 %v4958_v19  ;;  %v4964_v22 = vpack.c.bf16 %v95_v21, %v94_v20  ;;  %v96_v23 = vld [vmem:[%s7670_s1 + $0x70] sm:$0xff]  ;;  %v97_v24 = vld [vmem:[%s7670_s1 + $0x78] sm:$0xff]  ;;  %vm2596_vm2 = vcmask 7168  }
  0x17   :  { %v4970_v25 = vpack.c.bf16 %v97_v24, %v96_v23  ;;  %v19_v26 = vld [vmem:[%s7669_s0 + $0x8] sm:$0xff]  ;;  %v20_v27 = vld [vmem:[%s7669_s0 + $0x10] sm:$0xff]  ;;  %v21_v28 = vld [vmem:[%s7669_s0 + $0x18] sm:$0xff] }
  0x18   :  { %v22_v29 = vld [vmem:[%s7669_s0 + $0x20] sm:$0xff]  ;;  %v23_v30 = vld [vmem:[%s7669_s0 + $0x28] sm:$0xff]  ;;  %v24_v31 = vld [vmem:[%s7669_s0 + $0x30] sm:$0xff] }
  0x19   :  { %4999 = vmatpush3.bf16.msra.mxu1 %v4958_v19  ;;  %v25_v32 = vld [vmem:[%s7669_s0 + $0x38] sm:$0xff]  ;;  %v26_v33 = vld [vmem:[%s7669_s0 + $0x40] sm:$0xff]  ;;  %v27_v34 = vld [vmem:[%s7669_s0 + $0x48] sm:$0xff] }
  0x1a   :  { %5001 = vmatprep.subr.bf16.mxu1 %v4964_v22  ;;  %v28_v35 = vld [vmem:[%s7669_s0 + $0x50] sm:$0xff]  ;;  %v29_v36 = vld [vmem:[%s7669_s0 + $0x58] sm:$0xff]  ;;  %v30_v37 = vld [vmem:[%s7669_s0 + $0x60] sm:$0xff] }
  0x1b   :  { %v31_v38 = vld [vmem:[%s7669_s0 + $0x68] sm:$0xff]  ;;  %v32_v39 = vld [vmem:[%s7669_s0 + $0x70] sm:$0xff]  ;;  %v33_v40 = vld [vmem:[%s7669_s0 + $0x78] sm:$0xff] }
  0x1c   :  { %v34_v41 = vld [vmem:[%s7669_s0 + $0x80] sm:$0xff]  ;;  %v35_v42 = vld [vmem:[%s7669_s0 + $0x88] sm:$0xff]  ;;  %v36_v43 = vld [vmem:[%s7669_s0 + $0x90] sm:$0xff] }
  0x1d   :  { %4951 = vmatpush3.bf16.xpose.msk.msra.mxu0 %vm5143_vm1, %v4946_v13  ;;  %5003 = vmatpush3.bf16.msra.mxu1 %v4964_v22  ;;  %v37_v44 = vld [vmem:[%s7669_s0 + $0x98] sm:$0xff]  ;;  %v38_v45 = vld [vmem:[%s7669_s0 + $0xa0] sm:$0xff]  ;;  %v39_v46 = vld [vmem:[%s7669_s0 + $0xa8] sm:$0xff] }
  0x1e   :  { %4954 = vmatprep.subr.msk.bf16.mxu0 %vm5143_vm1, %v4952_v16  ;;  %5005 = vmatprep.subr.bf16.mxu1 %v4970_v25  ;;  %v40_v47 = vld [vmem:[%s7669_s0 + $0xb0] sm:$0xff]  ;;  %v41_v48 = vld [vmem:[%s7669_s0 + $0xb8] sm:$0xff]  ;;  %v42_v49 = vld [vmem:[%s7669_s0 + $0xc0] sm:$0xff] }
  0x1f   :  { %v43_v50 = vld [vmem:[%s7669_s0 + $0xc8] sm:$0xff]  ;;  %v44_v51 = vld [vmem:[%s7669_s0 + $0xd0] sm:$0xff]  ;;  %v45_v52 = vld [vmem:[%s7669_s0 + $0xd8] sm:$0xff] }
  0x20   :  { %v46_v53 = vld [vmem:[%s7669_s0 + $0xe0] sm:$0xff]  ;;  %v47_v54 = vld [vmem:[%s7669_s0 + $0xe8] sm:$0xff]  ;;  %v48_v55 = vld [vmem:[%s7669_s0 + $0xf0] sm:$0xff] }
  0x21   :  { %5007 = vmatpush3.bf16.msra.mxu1 %v4970_v25  ;;  %v49_v56 = vld [vmem:[%s7669_s0 + $0xf8] sm:$0xff]  ;;  %v50_v57 = vld [vmem:[%s7669_s0 + $0x100] sm:$0xff]  ;;  %v51_v58 = vld [vmem:[%s7669_s0 + $0x108] sm:$0xff] }
  0x22   :  { %v52_v59 = vld [vmem:[%s7669_s0 + $0x110] sm:$0xff]  ;;  %v53_v60 = vld [vmem:[%s7669_s0 + $0x118] sm:$0xff]  ;;  %v54_v61 = vld [vmem:[%s7669_s0 + $0x120] sm:$0xff] }
  0x23   :  { %v55_v62 = vld [vmem:[%s7669_s0 + $0x128] sm:$0xff]  ;;  %v56_v63 = vld [vmem:[%s7669_s0 + $0x130] sm:$0xff]  ;;  %v57_v0 = vld [vmem:[%s7669_s0 + $0x138] sm:$0xff] }
  0x24   :  { %v58_v1 = vld [vmem:[%s7669_s0 + $0x140] sm:$0xff]  ;;  %v59_v2 = vld [vmem:[%s7669_s0 + $0x148] sm:$0xff]  ;;  %v60_v3 = vld [vmem:[%s7669_s0 + $0x150] sm:$0xff] }
  0x25   :  { %4957 = vmatpush3.bf16.xpose.msk.msra.mxu0 %vm5143_vm1, %v4952_v16  ;;  %v61_v4 = vld [vmem:[%s7669_s0 + $0x158] sm:$0xff]  ;;  %v62_v5 = vld [vmem:[%s7669_s0 + $0x160] sm:$0xff]  ;;  %v63_v6 = vld [vmem:[%s7669_s0 + $0x168] sm:$0xff] }
  0x26   :  { %4960 = vmatprep.subr.msk.bf16.mxu0 %vm5143_vm1, %v4958_v19  ;;  %v64_v7 = vld [vmem:[%s7669_s0 + $0x170] sm:$0xff]  ;;  %v65_v8 = vld [vmem:[%s7669_s0 + $0x178] sm:$0xff]  ;;  %v66_v9 = vld [vmem:[%s7669_s0 + $0x180] sm:$0xff] }
  0x27   :  { %v67_v10 = vld [vmem:[%s7669_s0 + $0x188] sm:$0xff]  ;;  %v68_v11 = vld [vmem:[%s7669_s0 + $0x190] sm:$0xff]  ;;  %v69_v12 = vld [vmem:[%s7669_s0 + $0x198] sm:$0xff] }
  0x28   :  { %v70_v13 = vld [vmem:[%s7669_s0 + $0x1a0] sm:$0xff]  ;;  %v71_v14 = vld [vmem:[%s7669_s0 + $0x1a8] sm:$0xff]  ;;  %v72_v15 = vld [vmem:[%s7669_s0 + $0x1b0] sm:$0xff] }
  0x29   :  { %v73_v16 = vld [vmem:[%s7669_s0 + $0x1b8] sm:$0xff]  ;;  %v74_v17 = vld [vmem:[%s7669_s0 + $0x1c0] sm:$0xff]  ;;  %v75_v18 = vld [vmem:[%s7669_s0 + $0x1c8] sm:$0xff] }
  0x2a   :  { %v77_v20 = vld [vmem:[%s7669_s0 + $0x1d8] sm:$0xff]  ;;  %v78_v21 = vld [vmem:[%s7669_s0 + $0x1e0] sm:$0xff]  ;;  %v80_v23 = vld [vmem:[%s7669_s0 + $0x1f0] sm:$0xff] }
  0x2b   :  { %v81_v24 = vld [vmem:[%s7669_s0 + $0x1f8] sm:$0xff] }
  0x2d   :  { %4963 = vmatpush3.bf16.xpose.msk.msra.mxu0 %vm5143_vm1, %v4958_v19  ;;  %v76_v19 = vld [vmem:[%s7669_s0 + $0x1d0] sm:$0xff] }
  0x2e   :  { %4966 = vmatprep.subr.msk.bf16.mxu0 %vm5143_vm1, %v4964_v22 }
  0x35   :  { %4969 = vmatpush3.bf16.xpose.msk.msra.mxu0 %vm5143_vm1, %v4964_v22  ;;  %v79_v22 = vld [vmem:[%s7669_s0 + $0x1e8] sm:$0xff] }
  0x36   :  { %4972 = vmatprep.subr.msk.bf16.mxu0 %vm5143_vm1, %v4970_v25 }
  0x3d   :  { %4975 = vmatpush3.bf16.xpose.msk.msra.mxu0 %vm5143_vm1, %v4970_v25  ;;  %v5477_v25 = vld [vmem:[%s7671_s2] ss:$0 sm:$0xff] }
  0x44   :  { %4705 = vmatmul.mubr.msk.f32.vlgmr.msra.gmra.mrb[0].mxu0 %vm99_vm0, %v19_v26 }
  0x45   :  { %4707 = vmatprep.mubr.msk.f32.mxu0 %vm99_vm0, %v20_v27 }
  0x48   :  { %4708 = vmatmul.mubr.msk.f32.gmra.mrb[2].mxu0 %vm99_vm0, %v21_v28 }
  0x49   :  { %4710 = vmatprep.mubr.msk.f32.mxu0 %vm99_vm0, %v22_v29 }
  0x4c   :  { %4711 = vmatmul.mubr.msk.f32.gmra.mrb[4].mxu0 %vm99_vm0, %v23_v30 }
  0x4d   :  { %4713 = vmatprep.mubr.msk.f32.mxu0 %vm99_vm0, %v24_v31 }
  0x50   :  { %4714 = vmatmul.mubr.msk.f32.gmra.mrb[6].mxu0 %vm99_vm0, %v25_v32 }
  0x51   :  { %4716 = vmatprep.mubr.msk.f32.mxu0 %vm99_vm0, %v26_v33 }
  0x54   :  { %4717 = vmatmul.mubr.msk.f32.gmra.mrb[8].mxu0 %vm99_vm0, %v27_v34 }
  0x55   :  { %4719 = vmatprep.mubr.msk.f32.mxu0 %vm99_vm0, %v28_v35 }
  0x58   :  { %4720 = vmatmul.mubr.msk.f32.gmra.mrb[10].mxu0 %vm99_vm0, %v29_v36 }
  0x59   :  { %4722 = vmatprep.mubr.msk.f32.mxu0 %vm99_vm0, %v30_v37 }
  0x5c   :  { %4723 = vmatmul.mubr.msk.f32.gmra.mrb[12].mxu0 %vm99_vm0, %v31_v38 }
  0x5d   :  { %4725 = vmatprep.mubr.msk.f32.mxu0 %vm99_vm0, %v32_v39 }
  0x60   :  { %4726 = vmatmul.mubr.msk.f32.gmra.mrb[14].mxu0 %vm99_vm0, %v33_v40 }
  0x61   :  { %4728 = vmatprep.mubr.msk.f32.mxu0 %vm99_vm0, %v34_v41 }
  0x64   :  { %4729 = vmatmul.mubr.msk.f32.gmra.mrb[16].mxu0 %vm99_vm0, %v35_v42 }
  0x65   :  { %4731 = vmatprep.mubr.msk.f32.mxu0 %vm99_vm0, %v36_v43 }
  0x68   :  { %4732 = vmatmul.mubr.msk.f32.gmra.mrb[18].mxu0 %vm99_vm0, %v37_v44 }
  0x69   :  { %4734 = vmatprep.mubr.msk.f32.mxu0 %vm99_vm0, %v38_v45 }
  0x6c   :  { %4735 = vmatmul.mubr.msk.f32.gmra.mrb[20].mxu0 %vm99_vm0, %v39_v46 }
  0x6d   :  { %4737 = vmatprep.mubr.msk.f32.mxu0 %vm99_vm0, %v40_v47 }
  0x70   :  { %4738 = vmatmul.mubr.msk.f32.gmra.mrb[22].mxu0 %vm99_vm0, %v41_v48 }
  0x71   :  { %4740 = vmatprep.mubr.msk.f32.mxu0 %vm99_vm0, %v42_v49 }
  0x74   :  { %4741 = vmatmul.mubr.msk.f32.gmra.mrb[24].mxu0 %vm99_vm0, %v43_v50 }
  0x75   :  { %4743 = vmatprep.mubr.msk.f32.mxu0 %vm99_vm0, %v44_v51 }
  0x78   :  { %4744 = vmatmul.mubr.msk.f32.gmra.mrb[26].mxu0 %vm99_vm0, %v45_v52 }
  0x79   :  { %4746 = vmatprep.mubr.msk.f32.mxu0 %vm99_vm0, %v46_v53 }
  0x7c   :  { %4747 = vmatmul.mubr.msk.f32.gmra.mrb[28].mxu0 %vm99_vm0, %v47_v54 }
  0x7d   :  { %4749 = vmatprep.mubr.msk.f32.mxu0 %vm99_vm0, %v48_v55 }
  0x80   :  { %4750 = vmatmul.mubr.msk.f32.gmra.mrb[30].mxu0 %vm99_vm0, %v49_v56 }
  0x81   :  { %4752 = vmatprep.mubr.msk.f32.mxu0 %vm99_vm0, %v50_v57 }
  0x84   :  { %4753 = vmatmul.mubr.msk.f32.gmra.mrb[32].mxu0 %vm99_vm0, %v51_v58 }
  0x85   :  { %4755 = vmatprep.mubr.msk.f32.mxu0 %vm99_vm0, %v52_v59 }
  0x88   :  { %4756 = vmatmul.mubr.msk.f32.gmra.mrb[34].mxu0 %vm99_vm0, %v53_v60 }
  0x89   :  { %4758 = vmatprep.mubr.msk.f32.mxu0 %vm99_vm0, %v54_v61 }
  0x8c   :  { %4759 = vmatmul.mubr.msk.f32.gmra.mrb[36].mxu0 %vm99_vm0, %v55_v62 }
  0x8d   :  { %4761 = vmatprep.mubr.msk.f32.mxu0 %vm99_vm0, %v56_v63 }
  0x90   :  { %4762 = vmatmul.mubr.msk.f32.gmra.mrb[38].mxu0 %vm99_vm0, %v57_v0 }
  0x91   :  { %4764 = vmatprep.mubr.msk.f32.mxu0 %vm99_vm0, %v58_v1 }
  0x94   :  { %4765 = vmatmul.mubr.msk.f32.gmra.mrb[40].mxu0 %vm99_vm0, %v59_v2 }
  0x95   :  { %4767 = vmatprep.mubr.msk.f32.mxu0 %vm99_vm0, %v60_v3 }
  0x98   :  { %4768 = vmatmul.mubr.msk.f32.gmra.mrb[42].mxu0 %vm99_vm0, %v61_v4 }
  0x99   :  { %4770 = vmatprep.mubr.msk.f32.mxu0 %vm99_vm0, %v62_v5 }
  0x9c   :  { %4771 = vmatmul.mubr.msk.f32.gmra.mrb[44].mxu0 %vm99_vm0, %v63_v6 }
  0x9d   :  { %4773 = vmatprep.mubr.msk.f32.mxu0 %vm99_vm0, %v64_v7 }
  0xa0   :  { %4774 = vmatmul.mubr.msk.f32.gmra.mrb[46].mxu0 %vm99_vm0, %v65_v8 }
  0xa1   :  { %4776 = vmatprep.mubr.msk.f32.mxu0 %vm99_vm0, %v66_v9 }
  0xa4   :  { %4777 = vmatmul.mubr.msk.f32.gmra.mrb[48].mxu0 %vm99_vm0, %v67_v10 }
  0xa5   :  { %4779 = vmatprep.mubr.msk.f32.mxu0 %vm99_vm0, %v68_v11 }
  0xa8   :  { %4780 = vmatmul.mubr.msk.f32.gmra.mrb[50].mxu0 %vm99_vm0, %v69_v12 }
  0xa9   :  { %4782 = vmatprep.mubr.msk.f32.mxu0 %vm99_vm0, %v70_v13 }
  0xac   :  { %4783 = vmatmul.mubr.msk.f32.gmra.mrb[52].mxu0 %vm99_vm0, %v71_v14 }
  0xad   :  { %4785 = vmatprep.mubr.msk.f32.mxu0 %vm99_vm0, %v72_v15 }
  0xb0   :  { %4786 = vmatmul.mubr.msk.f32.gmra.mrb[54].mxu0 %vm99_vm0, %v73_v16 }
  0xb1   :  { %4788 = vmatprep.mubr.msk.f32.mxu0 %vm99_vm0, %v74_v17 }
  0xb4   :  { %4789 = vmatmul.mubr.msk.f32.gmra.mrb[56].mxu0 %vm99_vm0, %v75_v18 }
  0xb5   :  { %4791 = vmatprep.mubr.msk.f32.mxu0 %vm99_vm0, %v76_v19 }
  0xb8   :  { %4792 = vmatmul.mubr.msk.f32.gmra.mrb[58].mxu0 %vm99_vm0, %v77_v20 }
  0xb9   :  { %4794 = vmatprep.mubr.msk.f32.mxu0 %vm99_vm0, %v78_v21 }
  0xbc   :  { %4795 = vmatmul.mubr.msk.f32.gmra.mrb[60].mxu0 %vm99_vm0, %v79_v22 }
  0xbd   :  { %4797 = vmatprep.mubr.msk.f32.mxu0 %vm99_vm0, %v80_v23 }
  0xc0   :  { %4798 = vmatmul.mubr.msk.f32.gmra.mrb[62].mxu0 %vm99_vm0, %v81_v24 }
 0x117   :  { %v4706_v26 = vpop.f32.mrb[0].mxu0 }
 0x118   :  { %v5480_v27 = vsub.f32 %v5477_v25, %v4706_v26  ;;  %v406_v28 = vpop.f32.mrb[1].mxu0 }
 0x119   :  { %v5484_v30 = vsub.f32 %v5477_v25, %v406_v28 }
 0x11a   :  { %799 = vmin.xlane.f32.xlu0 %v5480_v27 }
 0x11b   :  { %v4709_v29 = vpop.f32.mrb[2].mxu0 }
 0x11c   :  { %v5487_v31 = vsub.f32 %v5477_v25, %v4709_v29  ;;  %v416_v32 = vpop.f32.mrb[3].mxu0 }
 0x11d   :  { %v5492_v34 = vsub.f32 %v5477_v25, %v416_v32 }
 0x11e   :  { %797 = vmin.xlane.f32.xlu0 %v5484_v30  ;;  %803 = vmin.xlane.f32.xlu1 %v5487_v31 }
 0x11f   :  { %v4712_v33 = vpop.f32.mrb[4].mxu0 }
 0x120   :  { %v426_v35 = vpop.f32.mrb[5].mxu0  ;;  %v5498_v37 = vsub.f32 %v5477_v25, %v4712_v33 }
 0x121   :  { %v5495_v36 = vsub.f32 %v5477_v25, %v426_v35 }
 0x122   :  { %801 = vmin.xlane.f32.xlu1 %v5492_v34 }
 0x123   :  { %805 = vmin.xlane.f32.xlu0 %v5495_v36  ;;  %v4715_v38 = vpop.f32.mrb[6].mxu0 }
 0x124   :  { %v436_v39 = vpop.f32.mrb[7].mxu0  ;;  %v5506_v41 = vsub.f32 %v5477_v25, %v4715_v38 }
 0x125   :  { %v5503_v40 = vsub.f32 %v5477_v25, %v436_v39 }
 0x126   :  { %807 = vmin.xlane.f32.xlu1 %v5498_v37 }
 0x127   :  { %809 = vmin.xlane.f32.xlu0 %v5503_v40  ;;  %v4718_v42 = vpop.f32.mrb[8].mxu0 }
 0x128   :  { %v446_v43 = vpop.f32.mrb[9].mxu0  ;;  %v5514_v45 = vsub.f32 %v5477_v25, %v4718_v42 }
 0x129   :  { %v5511_v44 = vsub.f32 %v5477_v25, %v446_v43 }
 0x12a   :  { %811 = vmin.xlane.f32.xlu1 %v5506_v41 }
 0x12b   :  { %813 = vmin.xlane.f32.xlu0 %v5511_v44  ;;  %v4721_v46 = vpop.f32.mrb[10].mxu0 }
 0x12c   :  { %v456_v47 = vpop.f32.mrb[11].mxu0  ;;  %v5522_v49 = vsub.f32 %v5477_v25, %v4721_v46 }
 0x12d   :  { %v5519_v48 = vsub.f32 %v5477_v25, %v456_v47 }
 0x12e   :  { %815 = vmin.xlane.f32.xlu1 %v5514_v45 }
 0x12f   :  { %817 = vmin.xlane.f32.xlu0 %v5519_v48  ;;  %v4724_v50 = vpop.f32.mrb[12].mxu0 }
 0x130   :  { %v466_v51 = vpop.f32.mrb[13].mxu0  ;;  %v5530_v53 = vsub.f32 %v5477_v25, %v4724_v50 }
 0x131   :  { %v5527_v52 = vsub.f32 %v5477_v25, %v466_v51 }
 0x132   :  { %819 = vmin.xlane.f32.xlu1 %v5522_v49 }
 0x133   :  { %821 = vmin.xlane.f32.xlu0 %v5527_v52  ;;  %v4727_v54 = vpop.f32.mrb[14].mxu0 }
 0x134   :  { %v476_v55 = vpop.f32.mrb[15].mxu0  ;;  %v5538_v57 = vsub.f32 %v5477_v25, %v4727_v54 }
 0x135   :  { %v5535_v56 = vsub.f32 %v5477_v25, %v476_v55 }
 0x136   :  { %823 = vmin.xlane.f32.xlu1 %v5530_v53 }
 0x137   :  { %825 = vmin.xlane.f32.xlu0 %v5535_v56  ;;  %v4730_v58 = vpop.f32.mrb[16].mxu0 }
 0x138   :  { %v486_v59 = vpop.f32.mrb[17].mxu0  ;;  %v5546_v61 = vsub.f32 %v5477_v25, %v4730_v58 }
 0x139   :  { %v5543_v60 = vsub.f32 %v5477_v25, %v486_v59 }
 0x13a   :  { %827 = vmin.xlane.f32.xlu1 %v5538_v57 }
 0x13b   :  { %829 = vmin.xlane.f32.xlu0 %v5543_v60  ;;  %v4733_v62 = vpop.f32.mrb[18].mxu0 }
 0x13c   :  { %v496_v63 = vpop.f32.mrb[19].mxu0  ;;  %v5554_v1 = vsub.f32 %v5477_v25, %v4733_v62 }
 0x13d   :  { %v5551_v0 = vsub.f32 %v5477_v25, %v496_v63 }
 0x13e   :  { %831 = vmin.xlane.f32.xlu1 %v5546_v61 }
 0x13f   :  { %833 = vmin.xlane.f32.xlu0 %v5551_v0  ;;  %v4736_v2 = vpop.f32.mrb[20].mxu0 }
 0x140   :  { %v506_v3 = vpop.f32.mrb[21].mxu0  ;;  %v5562_v5 = vsub.f32 %v5477_v25, %v4736_v2 }
 0x141   :  { %v5559_v4 = vsub.f32 %v5477_v25, %v506_v3 }
 0x142   :  { %835 = vmin.xlane.f32.xlu1 %v5554_v1 }
 0x143   :  { %837 = vmin.xlane.f32.xlu0 %v5559_v4  ;;  %v4739_v6 = vpop.f32.mrb[22].mxu0 }
 0x144   :  { %v516_v7 = vpop.f32.mrb[23].mxu0  ;;  %v5570_v9 = vsub.f32 %v5477_v25, %v4739_v6 }
 0x145   :  { %v5567_v8 = vsub.f32 %v5477_v25, %v516_v7 }
 0x146   :  { %839 = vmin.xlane.f32.xlu1 %v5562_v5 }
 0x147   :  { %841 = vmin.xlane.f32.xlu0 %v5567_v8  ;;  %v4742_v10 = vpop.f32.mrb[24].mxu0 }
 0x148   :  { %v526_v11 = vpop.f32.mrb[25].mxu0  ;;  %v5578_v13 = vsub.f32 %v5477_v25, %v4742_v10 }
 0x149   :  { %v5575_v12 = vsub.f32 %v5477_v25, %v526_v11 }
 0x14a   :  { %843 = vmin.xlane.f32.xlu1 %v5570_v9 }
 0x14b   :  { %845 = vmin.xlane.f32.xlu0 %v5575_v12  ;;  %v4745_v14 = vpop.f32.mrb[26].mxu0 }
 0x14c   :  { %v536_v15 = vpop.f32.mrb[27].mxu0  ;;  %v5586_v17 = vsub.f32 %v5477_v25, %v4745_v14 }
 0x14d   :  { %v5583_v16 = vsub.f32 %v5477_v25, %v536_v15 }
 0x14e   :  { %847 = vmin.xlane.f32.xlu1 %v5578_v13 }
 0x14f   :  { %849 = vmin.xlane.f32.xlu0 %v5583_v16  ;;  %v4748_v18 = vpop.f32.mrb[28].mxu0 }
 0x150   :  { %v546_v19 = vpop.f32.mrb[29].mxu0  ;;  %v5594_v21 = vsub.f32 %v5477_v25, %v4748_v18 }
 0x151   :  { %v5591_v20 = vsub.f32 %v5477_v25, %v546_v19 }
 0x152   :  { %851 = vmin.xlane.f32.xlu1 %v5586_v17 }
 0x153   :  { %853 = vmin.xlane.f32.xlu0 %v5591_v20  ;;  %v4751_v22 = vpop.f32.mrb[30].mxu0 }
 0x154   :  { %v556_v23 = vpop.f32.mrb[31].mxu0  ;;  %v5602_v26 = vsub.f32 %v5477_v25, %v4751_v22 }
 0x155   :  { %v5599_v24 = vsub.f32 %v5477_v25, %v556_v23 }
 0x156   :  { %855 = vmin.xlane.f32.xlu1 %v5594_v21 }
 0x157   :  { %857 = vmin.xlane.f32.xlu0 %v5599_v24  ;;  %v4754_v28 = vpop.f32.mrb[32].mxu0 }
 0x158   :  { %v566_v29 = vpop.f32.mrb[33].mxu0  ;;  %v5610_v33 = vsub.f32 %v5477_v25, %v4754_v28 }
 0x159   :  { %v5607_v32 = vsub.f32 %v5477_v25, %v566_v29 }
 0x15a   :  { %859 = vmin.xlane.f32.xlu1 %v5602_v26 }
 0x15b   :  { %861 = vmin.xlane.f32.xlu0 %v5607_v32  ;;  %v4757_v35 = vpop.f32.mrb[34].mxu0 }
 0x15c   :  { %v576_v38 = vpop.f32.mrb[35].mxu0  ;;  %v5618_v42 = vsub.f32 %v5477_v25, %v4757_v35 }
 0x15d   :  { %v5615_v39 = vsub.f32 %v5477_v25, %v576_v38 }
 0x15e   :  { %863 = vmin.xlane.f32.xlu1 %v5610_v33 }
 0x15f   :  { %865 = vmin.xlane.f32.xlu0 %v5615_v39  ;;  %v4760_v43 = vpop.f32.mrb[36].mxu0 }
 0x160   :  { %v586_v46 = vpop.f32.mrb[37].mxu0  ;;  %v5626_v50 = vsub.f32 %v5477_v25, %v4760_v43 }
 0x161   :  { %v5623_v47 = vsub.f32 %v5477_v25, %v586_v46 }
 0x162   :  { %867 = vmin.xlane.f32.xlu1 %v5618_v42 }
 0x163   :  { %869 = vmin.xlane.f32.xlu0 %v5623_v47  ;;  %v4763_v51 = vpop.f32.mrb[38].mxu0 }
 0x164   :  { %v596_v54 = vpop.f32.mrb[39].mxu0  ;;  %v5634_v58 = vsub.f32 %v5477_v25, %v4763_v51 }
 0x165   :  { %v5631_v55 = vsub.f32 %v5477_v25, %v596_v54 }
 0x166   :  { %871 = vmin.xlane.f32.xlu1 %v5626_v50 }
 0x167   :  { %873 = vmin.xlane.f32.xlu0 %v5631_v55  ;;  %v4766_v59 = vpop.f32.mrb[40].mxu0 }
 0x168   :  { %v606_v62 = vpop.f32.mrb[41].mxu0  ;;  %v5642_v2 = vsub.f32 %v5477_v25, %v4766_v59 }
 0x169   :  { %v5639_v63 = vsub.f32 %v5477_v25, %v606_v62 }
 0x16a   :  { %875 = vmin.xlane.f32.xlu1 %v5634_v58 }
 0x16b   :  { %877 = vmin.xlane.f32.xlu0 %v5639_v63  ;;  %v4769_v3 = vpop.f32.mrb[42].mxu0 }
 0x16c   :  { %v616_v6 = vpop.f32.mrb[43].mxu0  ;;  %v5650_v10 = vsub.f32 %v5477_v25, %v4769_v3 }
 0x16d   :  { %v5647_v7 = vsub.f32 %v5477_v25, %v616_v6 }
 0x16e   :  { %879 = vmin.xlane.f32.xlu1 %v5642_v2 }
 0x16f   :  { %881 = vmin.xlane.f32.xlu0 %v5647_v7  ;;  %v4772_v11 = vpop.f32.mrb[44].mxu0 }
 0x170   :  { %v626_v14 = vpop.f32.mrb[45].mxu0  ;;  %v5658_v18 = vsub.f32 %v5477_v25, %v4772_v11 }
 0x171   :  { %v5655_v15 = vsub.f32 %v5477_v25, %v626_v14 }
 0x172   :  { %883 = vmin.xlane.f32.xlu1 %v5650_v10 }
 0x173   :  { %885 = vmin.xlane.f32.xlu0 %v5655_v15  ;;  %v4775_v19 = vpop.f32.mrb[46].mxu0 }
 0x174   :  { %v636_v22 = vpop.f32.mrb[47].mxu0  ;;  %v5666_v28 = vsub.f32 %v5477_v25, %v4775_v19 }
 0x175   :  { %v5663_v23 = vsub.f32 %v5477_v25, %v636_v22 }
 0x176   :  { %887 = vmin.xlane.f32.xlu1 %v5658_v18 }
 0x177   :  { %889 = vmin.xlane.f32.xlu0 %v5663_v23  ;;  %v4778_v29 = vpop.f32.mrb[48].mxu0 }
 0x178   :  { %v646_v35 = vpop.f32.mrb[49].mxu0  ;;  %v5674_v43 = vsub.f32 %v5477_v25, %v4778_v29 }
 0x179   :  { %v5671_v38 = vsub.f32 %v5477_v25, %v646_v35 }
 0x17a   :  { %891 = vmin.xlane.f32.xlu1 %v5666_v28 }
 0x17b   :  { %893 = vmin.xlane.f32.xlu0 %v5671_v38  ;;  %v4781_v46 = vpop.f32.mrb[50].mxu0 }
 0x17c   :  { %v656_v51 = vpop.f32.mrb[51].mxu0  ;;  %v5682_v59 = vsub.f32 %v5477_v25, %v4781_v46 }
 0x17d   :  { %v5679_v54 = vsub.f32 %v5477_v25, %v656_v51 }
 0x17e   :  { %895 = vmin.xlane.f32.xlu1 %v5674_v43 }
 0x17f   :  { %897 = vmin.xlane.f32.xlu0 %v5679_v54  ;;  %v4784_v62 = vpop.f32.mrb[52].mxu0 }
 0x180   :  { %v666_v3 = vpop.f32.mrb[53].mxu0  ;;  %v5690_v11 = vsub.f32 %v5477_v25, %v4784_v62 }
 0x181   :  { %v5687_v6 = vsub.f32 %v5477_v25, %v666_v3 }
 0x182   :  { %7782 = vst [vmem:[#allocation8_spill] sm:$0xff] %v5690_v11  ;;  %899 = vmin.xlane.f32.xlu1 %v5682_v59 }
 0x183   :  { %901 = vmin.xlane.f32.xlu0 %v5687_v6  ;;  %v4787_v14 = vpop.f32.mrb[54].mxu0 }
 0x184   :  { %v676_v19 = vpop.f32.mrb[55].mxu0  ;;  %v5698_v29 = vsub.f32 %v5477_v25, %v4787_v14 }
 0x185   :  { %v5695_v22 = vsub.f32 %v5477_v25, %v676_v19 }
 0x186   :  { %7784 = vst [vmem:[#allocation10_spill] sm:$0xff] %v5698_v29  ;;  %903 = vmin.xlane.f32.xlu1 %v5690_v11 }
 0x187   :  { %7783 = vst [vmem:[#allocation9_spill] sm:$0xff] %v5695_v22  ;;  %905 = vmin.xlane.f32.xlu0 %v5695_v22  ;;  %v4790_v35 = vpop.f32.mrb[56].mxu0 }
 0x188   :  { %v686_v46 = vpop.f32.mrb[57].mxu0  ;;  %v5706_v62 = vsub.f32 %v5477_v25, %v4790_v35 }
 0x189   :  { %v5703_v51 = vsub.f32 %v5477_v25, %v686_v46 }
 0x18a   :  { %7786 = vst [vmem:[#allocation12_spill] sm:$0xff] %v5706_v62  ;;  %907 = vmin.xlane.f32.xlu1 %v5698_v29 }
 0x18b   :  { %7785 = vst [vmem:[#allocation11_spill] sm:$0xff] %v5703_v51  ;;  %909 = vmin.xlane.f32.xlu0 %v5703_v51  ;;  %v4793_v3 = vpop.f32.mrb[58].mxu0 }
 0x18c   :  { %v696_v19 = vpop.f32.mrb[59].mxu0  ;;  %v5714_v11 = vsub.f32 %v5477_v25, %v4793_v3 }
 0x18d   :  { %v5711_v14 = vsub.f32 %v5477_v25, %v696_v19 }
 0x18e   :  { %7787 = vst [vmem:[#allocation13_spill] sm:$0xff] %v5714_v11  ;;  %911 = vmin.xlane.f32.xlu1 %v5706_v62 }
 0x18f   :  { %913 = vmin.xlane.f32.xlu0 %v5711_v14  ;;  %v4796_v46 = vpop.f32.mrb[60].mxu0 }
 0x190   :  { %v706_v22 = vpop.f32.mrb[61].mxu0  ;;  %v5722_v29 = vsub.f32 %v5477_v25, %v4796_v46 }
 0x191   :  { %v5719_v35 = vsub.f32 %v5477_v25, %v706_v22  ;;  %v795_v22 = vlaneseq }
 0x192   :  { %915 = vmin.xlane.f32.xlu1 %v5714_v11 }
 0x193   :  { %7788 = vst [vmem:[#allocation14_spill] sm:$0xff] %v5719_v35  ;;  %917 = vmin.xlane.f32.xlu0 %v5719_v35  ;;  %v4799_v19 = vpop.f32.mrb[62].mxu0  ;;  %v5735_v46 = vand.u32 127, %v795_v22 }
 0x194   :  { %v716_v51 = vpop.f32.mrb[63].mxu0  ;;  %v5730_v62 = vsub.f32 %v5477_v25, %v4799_v19 }
 0x195   :  { %v5727_v3 = vsub.f32 %v5477_v25, %v716_v51  ;;  %7791 = vst [vmem:[#allocation17_spill] sm:$0xff] %v5735_v46 }
 0x196   :  { %7790 = vst [vmem:[#allocation16_spill] sm:$0xff] %v5730_v62  ;;  %919 = vmin.xlane.f32.xlu1 %v5722_v29 }
 0x197   :  { %7789 = vst [vmem:[#allocation15_spill] sm:$0xff] %v5727_v3  ;;  %921 = vmin.xlane.f32.xlu0 %v5727_v3 }
 0x19a   :  { %923 = vmin.xlane.f32.xlu1 %v5730_v62 }
 0x1a7   :  { %v800_v11 = vpop.xlane.xlu0 %799 }
 0x1a8   :  { %vm926_vm3 = vcmp.eq.f32.partialorder %v5480_v27, %v800_v11 }
 0x1a9   :  { %v5739_v35 = vsel %vm926_vm3, %v5735_v46, 128 }
 0x1aa   :  { %7792 = vst [vmem:[#allocation18_spill] sm:$0xff] %v5739_v35  ;;  %v1068_v51 = vshra.s32 %v5739_v35, 16 }
 0x1ab   :  { %v798_v25 = vpop.xlane.xlu0 %797  ;;  %v804_v19 = vpop.xlane.xlu1 %803 }
 0x1ac   :  { %vm925_vm4 = vcmp.eq.f32.partialorder %v5484_v30, %v798_v25  ;;  %vm928_vm5 = vcmp.eq.f32.partialorder %v5487_v31, %v804_v19  ;;  %v5744_v3 = vcvt.s32.f32 %v1068_v51 }
 0x1ad   :  { %v5747_v62 = vsel %vm928_vm5, %v5735_v46, 128  ;;  %v5750_v22 = vsel %vm925_vm4, %v5735_v46, 128 }
 0x1ae   :  { %7793 = vst [vmem:[#allocation19_spill] sm:$0xff] %v5744_v3  ;;  %1071 = vmin.xlane.f32.xlu1 %v5744_v3  ;;  %v1096_v27 = vshra.s32 %v5747_v62, 16  ;;  %v1054_v11 = vshra.s32 %v5750_v22, 16 }
 0x1af   :  { %v802_v35 = vpop.xlane.xlu1 %801 }
 0x1b0   :  { %vm927_vm6 = vcmp.eq.f32.partialorder %v5492_v34, %v802_v35  ;;  %v806_v30 = vpop.xlane.xlu0 %805  ;;  %v5756_v25 = vcvt.s32.f32 %v1096_v27  ;;  %v5758_v31 = vcvt.s32.f32 %v1054_v11 }
 0x1b1   :  { %vm929_vm7 = vcmp.eq.f32.partialorder %v5495_v36, %v806_v30  ;;  %v5762_v51 = vsel %vm927_vm6, %v5735_v46, 128 }
 0x1b2   :  { %7794 = vst [vmem:[#allocation20_spill] sm:$0xff] %v5756_v25  ;;  %7795 = vst [vmem:[#allocation21_spill] sm:$0xff] %v5758_v31  ;;  %1099 = vmin.xlane.f32.xlu1 %v5756_v25  ;;  %1057 = vmin.xlane.f32.xlu0 %v5758_v31  ;;  %v1082_v19 = vshra.s32 %v5762_v51, 16  ;;  %v5768_v3 = vsel %vm929_vm7, %v5735_v46, 128 }
 0x1b3   :  { %v808_v34 = vpop.xlane.xlu1 %807  ;;  %v1110_v36 = vshra.s32 %v5768_v3, 16 }
 0x1b4   :  { %vm930_vm8 = vcmp.eq.f32.partialorder %v5498_v37, %v808_v34  ;;  %v810_v35 = vpop.xlane.xlu0 %809  ;;  %v5771_v27 = vcvt.s32.f32 %v1082_v19 }
 0x1b5   :  { %vm931_vm9 = vcmp.eq.f32.partialorder %v5503_v40, %v810_v35  ;;  %v5776_v11 = vsel %vm930_vm8, %v5735_v46, 128  ;;  %v5786_v34 = vcvt.s32.f32 %v1110_v36 }
 0x1b6   :  { %7796 = vst [vmem:[#allocation22_spill] sm:$0xff] %v5771_v27  ;;  %1085 = vmin.xlane.f32.xlu0 %v5771_v27  ;;  %v1124_v30 = vshra.s32 %v5776_v11, 16  ;;  %v5781_v31 = vsel %vm931_vm9, %v5735_v46, 128 }
 0x1b7   :  { %7797 = vst [vmem:[#allocation23_spill] sm:$0xff] %v5781_v31  ;;  %v812_v25 = vpop.xlane.xlu1 %811  ;;  %7798 = vst [vmem:[#allocation24_spill] sm:$0xff] %v5786_v34  ;;  %v1138_v40 = vshra.s32 %v5781_v31, 16 }
 0x1b8   :  { %vm932_vm10 = vcmp.eq.f32.partialorder %v5506_v41, %v812_v25  ;;  %v814_v37 = vpop.xlane.xlu0 %813  ;;  %v5784_v19 = vcvt.s32.f32 %v1124_v30 }
 0x1b9   :  { %vm933_vm11 = vcmp.eq.f32.partialorder %v5511_v44, %v814_v37  ;;  %v5791_v35 = vsel %vm932_vm10, %v5735_v46, 128  ;;  %v5802_v31 = vcvt.s32.f32 %v1138_v40 }
 0x1ba   :  { %1127 = vmin.xlane.f32.xlu1 %v5784_v19  ;;  %1113 = vmin.xlane.f32.xlu0 %v5786_v34  ;;  %v1152_v27 = vshra.s32 %v5791_v35, 16  ;;  %v5797_v41 = vsel %vm933_vm11, %v5735_v46, 128 }
 0x1bb   :  { %7799 = vst [vmem:[#allocation25_spill] sm:$0xff] %v5797_v41  ;;  %v816_v25 = vpop.xlane.xlu1 %815  ;;  %7800 = vst [vmem:[#allocation26_spill] sm:$0xff] %v5802_v31  ;;  %v1166_v44 = vshra.s32 %v5797_v41, 16 }
 0x1bc   :  { %vm934_vm12 = vcmp.eq.f32.partialorder %v5514_v45, %v816_v25  ;;  %v818_v36 = vpop.xlane.xlu0 %817  ;;  %v5800_v30 = vcvt.s32.f32 %v1152_v27 }
 0x1bd   :  { %vm935_vm13 = vcmp.eq.f32.partialorder %v5519_v48, %v818_v36  ;;  %v5807_v37 = vsel %vm934_vm12, %v5735_v46, 128  ;;  %v5818_v41 = vcvt.s32.f32 %v1166_v44 }
 0x1be   :  { %1155 = vmin.xlane.f32.xlu1 %v5800_v30  ;;  %1141 = vmin.xlane.f32.xlu0 %v5802_v31  ;;  %v1180_v34 = vshra.s32 %v5807_v37, 16  ;;  %v5813_v45 = vsel %vm935_vm13, %v5735_v46, 128 }
 0x1bf   :  { %7801 = vst [vmem:[#allocation27_spill] sm:$0xff] %v5813_v45  ;;  %v820_v27 = vpop.xlane.xlu1 %819  ;;  %7802 = vst [vmem:[#allocation28_spill] sm:$0xff] %v5818_v41  ;;  %v1194_v48 = vshra.s32 %v5813_v45, 16 }
 0x1c0   :  { %vm936_vm14 = vcmp.eq.f32.partialorder %v5522_v49, %v820_v27  ;;  %v822_v40 = vpop.xlane.xlu0 %821  ;;  %v5816_v25 = vcvt.s32.f32 %v1180_v34 }
 0x1c1   :  { %vm937_vm15 = vcmp.eq.f32.partialorder %v5527_v52, %v822_v40  ;;  %v5823_v36 = vsel %vm936_vm14, %v5735_v46, 128  ;;  %v5834_v45 = vcvt.s32.f32 %v1194_v48 }
 0x1c2   :  { %1183 = vmin.xlane.f32.xlu1 %v5816_v25  ;;  %1169 = vmin.xlane.f32.xlu0 %v5818_v41  ;;  %v1208_v31 = vshra.s32 %v5823_v36, 16  ;;  %v5829_v49 = vsel %vm937_vm15, %v5735_v46, 128 }
 0x1c3   :  { %7803 = vst [vmem:[#allocation29_spill] sm:$0xff] %v5829_v49  ;;  %v824_v34 = vpop.xlane.xlu1 %823  ;;  %7804 = vst [vmem:[#allocation30_spill] sm:$0xff] %v5834_v45  ;;  %v1222_v52 = vshra.s32 %v5829_v49, 16 }
 0x1c4   :  { %vm938_vm1 = vcmp.eq.f32.partialorder %v5530_v53, %v824_v34  ;;  %v826_v44 = vpop.xlane.xlu0 %825  ;;  %v5832_v27 = vcvt.s32.f32 %v1208_v31 }
 0x1c5   :  { %vm939_vm3 = vcmp.eq.f32.partialorder %v5535_v56, %v826_v44  ;;  %v5839_v40 = vsel %vm938_vm1, %v5735_v46, 128  ;;  %v5850_v49 = vcvt.s32.f32 %v1222_v52 }
 0x1c6   :  { %1211 = vmin.xlane.f32.xlu1 %v5832_v27  ;;  %1197 = vmin.xlane.f32.xlu0 %v5834_v45  ;;  %v1236_v41 = vshra.s32 %v5839_v40, 16  ;;  %v5845_v53 = vsel %vm939_vm3, %v5735_v46, 128 }
 0x1c7   :  { %7805 = vst [vmem:[#allocation31_spill] sm:$0xff] %v5845_v53  ;;  %v828_v31 = vpop.xlane.xlu1 %827  ;;  %7806 = vst [vmem:[#allocation32_spill] sm:$0xff] %v5850_v49  ;;  %v1250_v56 = vshra.s32 %v5845_v53, 16 }
 0x1c8   :  { %vm940_vm4 = vcmp.eq.f32.partialorder %v5538_v57, %v828_v31  ;;  %v830_v48 = vpop.xlane.xlu0 %829  ;;  %v5848_v34 = vcvt.s32.f32 %v1236_v41 }
 0x1c9   :  { %vm941_vm5 = vcmp.eq.f32.partialorder %v5543_v60, %v830_v48  ;;  %v5855_v44 = vsel %vm940_vm4, %v5735_v46, 128  ;;  %v5866_v53 = vcvt.s32.f32 %v1250_v56 }
 0x1ca   :  { %1239 = vmin.xlane.f32.xlu1 %v5848_v34  ;;  %1225 = vmin.xlane.f32.xlu0 %v5850_v49  ;;  %v1264_v45 = vshra.s32 %v5855_v44, 16  ;;  %v5861_v57 = vsel %vm941_vm5, %v5735_v46, 128 }
 0x1cb   :  { %7807 = vst [vmem:[#allocation33_spill] sm:$0xff] %v5861_v57  ;;  %v832_v41 = vpop.xlane.xlu1 %831  ;;  %7808 = vst [vmem:[#allocation34_spill] sm:$0xff] %v5866_v53  ;;  %v1278_v60 = vshra.s32 %v5861_v57, 16 }
 0x1cc   :  { %vm942_vm6 = vcmp.eq.f32.partialorder %v5546_v61, %v832_v41  ;;  %v834_v52 = vpop.xlane.xlu0 %833  ;;  %v5864_v31 = vcvt.s32.f32 %v1264_v45 }
 0x1cd   :  { %vm943_vm7 = vcmp.eq.f32.partialorder %v5551_v0, %v834_v52  ;;  %v5871_v48 = vsel %vm942_vm6, %v5735_v46, 128  ;;  %v5882_v57 = vcvt.s32.f32 %v1278_v60 }
 0x1ce   :  { %1267 = vmin.xlane.f32.xlu1 %v5864_v31  ;;  %1253 = vmin.xlane.f32.xlu0 %v5866_v53  ;;  %v1292_v49 = vshra.s32 %v5871_v48, 16  ;;  %v5877_v61 = vsel %vm943_vm7, %v5735_v46, 128 }
 0x1cf   :  { %7809 = vst [vmem:[#allocation35_spill] sm:$0xff] %v5877_v61  ;;  %v836_v45 = vpop.xlane.xlu1 %835  ;;  %7810 = vst [vmem:[#allocation36_spill] sm:$0xff] %v5882_v57  ;;  %v1306_v0 = vshra.s32 %v5877_v61, 16 }
 0x1d0   :  { %vm944_vm8 = vcmp.eq.f32.partialorder %v5554_v1, %v836_v45  ;;  %v838_v56 = vpop.xlane.xlu0 %837  ;;  %v5880_v41 = vcvt.s32.f32 %v1292_v49 }
 0x1d1   :  { %vm945_vm9 = vcmp.eq.f32.partialorder %v5559_v4, %v838_v56  ;;  %v5887_v52 = vsel %vm944_vm8, %v5735_v46, 128  ;;  %v5898_v61 = vcvt.s32.f32 %v1306_v0 }
 0x1d2   :  { %1295 = vmin.xlane.f32.xlu1 %v5880_v41  ;;  %1281 = vmin.xlane.f32.xlu0 %v5882_v57  ;;  %v1320_v53 = vshra.s32 %v5887_v52, 16  ;;  %v5893_v1 = vsel %vm945_vm9, %v5735_v46, 128 }
 0x1d3   :  { %7811 = vst [vmem:[#allocation37_spill] sm:$0xff] %v5893_v1  ;;  %v840_v49 = vpop.xlane.xlu1 %839  ;;  %7812 = vst [vmem:[#allocation38_spill] sm:$0xff] %v5898_v61  ;;  %v1334_v4 = vshra.s32 %v5893_v1, 16 }
 0x1d4   :  { %vm946_vm10 = vcmp.eq.f32.partialorder %v5562_v5, %v840_v49  ;;  %v842_v60 = vpop.xlane.xlu0 %841  ;;  %v5896_v45 = vcvt.s32.f32 %v1320_v53 }
 0x1d5   :  { %vm947_vm11 = vcmp.eq.f32.partialorder %v5567_v8, %v842_v60  ;;  %v5903_v56 = vsel %vm946_vm10, %v5735_v46, 128  ;;  %v5914_v1 = vcvt.s32.f32 %v1334_v4 }
 0x1d6   :  { %1323 = vmin.xlane.f32.xlu1 %v5896_v45  ;;  %1309 = vmin.xlane.f32.xlu0 %v5898_v61  ;;  %v1348_v57 = vshra.s32 %v5903_v56, 16  ;;  %v5909_v5 = vsel %vm947_vm11, %v5735_v46, 128 }
 0x1d7   :  { %7813 = vst [vmem:[#allocation39_spill] sm:$0xff] %v5909_v5  ;;  %v844_v53 = vpop.xlane.xlu1 %843  ;;  %7814 = vst [vmem:[#allocation40_spill] sm:$0xff] %v5914_v1  ;;  %v1362_v8 = vshra.s32 %v5909_v5, 16 }
 0x1d8   :  { %vm948_vm12 = vcmp.eq.f32.partialorder %v5570_v9, %v844_v53  ;;  %v846_v0 = vpop.xlane.xlu0 %845  ;;  %v5912_v49 = vcvt.s32.f32 %v1348_v57 }
 0x1d9   :  { %vm949_vm13 = vcmp.eq.f32.partialorder %v5575_v12, %v846_v0  ;;  %v5919_v60 = vsel %vm948_vm12, %v5735_v46, 128  ;;  %v5930_v5 = vcvt.s32.f32 %v1362_v8 }
 0x1da   :  { %1351 = vmin.xlane.f32.xlu1 %v5912_v49  ;;  %1337 = vmin.xlane.f32.xlu0 %v5914_v1  ;;  %v1376_v61 = vshra.s32 %v5919_v60, 16  ;;  %v5925_v9 = vsel %vm949_vm13, %v5735_v46, 128 }
 0x1db   :  { %7815 = vst [vmem:[#allocation41_spill] sm:$0xff] %v5925_v9  ;;  %v848_v57 = vpop.xlane.xlu1 %847  ;;  %7816 = vst [vmem:[#allocation42_spill] sm:$0xff] %v5930_v5  ;;  %v1390_v12 = vshra.s32 %v5925_v9, 16 }
 0x1dc   :  { %vm950_vm14 = vcmp.eq.f32.partialorder %v5578_v13, %v848_v57  ;;  %v850_v4 = vpop.xlane.xlu0 %849  ;;  %v5928_v53 = vcvt.s32.f32 %v1376_v61 }
 0x1dd   :  { %vm951_vm15 = vcmp.eq.f32.partialorder %v5583_v16, %v850_v4  ;;  %v5935_v0 = vsel %vm950_vm14, %v5735_v46, 128  ;;  %v5946_v9 = vcvt.s32.f32 %v1390_v12 }
 0x1de   :  { %1379 = vmin.xlane.f32.xlu1 %v5928_v53  ;;  %1365 = vmin.xlane.f32.xlu0 %v5930_v5  ;;  %v1404_v1 = vshra.s32 %v5935_v0, 16  ;;  %v5941_v13 = vsel %vm951_vm15, %v5735_v46, 128 }
 0x1df   :  { %7817 = vst [vmem:[#allocation43_spill] sm:$0xff] %v5941_v13  ;;  %v852_v61 = vpop.xlane.xlu1 %851  ;;  %7818 = vst [vmem:[#allocation44_spill] sm:$0xff] %v5946_v9  ;;  %v1418_v16 = vshra.s32 %v5941_v13, 16 }
 0x1e0   :  { %vm952_vm1 = vcmp.eq.f32.partialorder %v5586_v17, %v852_v61  ;;  %v854_v8 = vpop.xlane.xlu0 %853  ;;  %v5944_v57 = vcvt.s32.f32 %v1404_v1 }
 0x1e1   :  { %vm953_vm3 = vcmp.eq.f32.partialorder %v5591_v20, %v854_v8  ;;  %v5951_v4 = vsel %vm952_vm1, %v5735_v46, 128  ;;  %v5962_v13 = vcvt.s32.f32 %v1418_v16 }
 0x1e2   :  { %1407 = vmin.xlane.f32.xlu1 %v5944_v57  ;;  %1393 = vmin.xlane.f32.xlu0 %v5946_v9  ;;  %v1432_v5 = vshra.s32 %v5951_v4, 16  ;;  %v5957_v17 = vsel %vm953_vm3, %v5735_v46, 128 }
 0x1e3   :  { %7819 = vst [vmem:[#allocation45_spill] sm:$0xff] %v5957_v17  ;;  %v856_v1 = vpop.xlane.xlu1 %855  ;;  %7820 = vst [vmem:[#allocation46_spill] sm:$0xff] %v5962_v13  ;;  %v1446_v20 = vshra.s32 %v5957_v17, 16 }
 0x1e4   :  { %vm954_vm4 = vcmp.eq.f32.partialorder %v5594_v21, %v856_v1  ;;  %v858_v12 = vpop.xlane.xlu0 %857  ;;  %v5960_v61 = vcvt.s32.f32 %v1432_v5 }
 0x1e5   :  { %vm955_vm5 = vcmp.eq.f32.partialorder %v5599_v24, %v858_v12  ;;  %v5967_v8 = vsel %vm954_vm4, %v5735_v46, 128  ;;  %v5978_v17 = vcvt.s32.f32 %v1446_v20 }
 0x1e6   :  { %1435 = vmin.xlane.f32.xlu1 %v5960_v61  ;;  %1421 = vmin.xlane.f32.xlu0 %v5962_v13  ;;  %v1460_v9 = vshra.s32 %v5967_v8, 16  ;;  %v5973_v21 = vsel %vm955_vm5, %v5735_v46, 128 }
 0x1e7   :  { %7821 = vst [vmem:[#allocation47_spill] sm:$0xff] %v5973_v21  ;;  %v860_v5 = vpop.xlane.xlu1 %859  ;;  %7822 = vst [vmem:[#allocation48_spill] sm:$0xff] %v5978_v17  ;;  %v1474_v24 = vshra.s32 %v5973_v21, 16 }
 0x1e8   :  { %vm956_vm6 = vcmp.eq.f32.partialorder %v5602_v26, %v860_v5  ;;  %v862_v16 = vpop.xlane.xlu0 %861  ;;  %v5976_v1 = vcvt.s32.f32 %v1460_v9 }
 0x1e9   :  { %vm957_vm7 = vcmp.eq.f32.partialorder %v5607_v32, %v862_v16  ;;  %v5983_v12 = vsel %vm956_vm6, %v5735_v46, 128  ;;  %v5994_v21 = vcvt.s32.f32 %v1474_v24 }
 0x1ea   :  { %1463 = vmin.xlane.f32.xlu1 %v5976_v1  ;;  %1449 = vmin.xlane.f32.xlu0 %v5978_v17  ;;  %v1488_v13 = vshra.s32 %v5983_v12, 16  ;;  %v5989_v26 = vsel %vm957_vm7, %v5735_v46, 128 }
 0x1eb   :  { %7823 = vst [vmem:[#allocation49_spill] sm:$0xff] %v5989_v26  ;;  %v864_v9 = vpop.xlane.xlu1 %863  ;;  %7825 = vst [vmem:[#allocation51_spill] sm:$0xff] %v5994_v21  ;;  %v1502_v32 = vshra.s32 %v5989_v26, 16 }
 0x1ec   :  { %vm958_vm8 = vcmp.eq.f32.partialorder %v5610_v33, %v864_v9  ;;  %v866_v20 = vpop.xlane.xlu0 %865  ;;  %v5992_v5 = vcvt.s32.f32 %v1488_v13 }
 0x1ed   :  { %vm959_vm9 = vcmp.eq.f32.partialorder %v5615_v39, %v866_v20  ;;  %v5999_v16 = vsel %vm958_vm8, %v5735_v46, 128  ;;  %v6010_v26 = vcvt.s32.f32 %v1502_v32 }
 0x1ee   :  { %7824 = vst [vmem:[#allocation50_spill] sm:$0xff] %v5992_v5  ;;  %v6002_v17 = vsel %vm959_vm9, %v5735_v46, 128  ;;  %1491 = vmin.xlane.f32.xlu1 %v5992_v5  ;;  %1477 = vmin.xlane.f32.xlu0 %v5994_v21  ;;  %v1516_v33 = vshra.s32 %v5999_v16, 16 }
 0x1ef   :  { %7826 = vst [vmem:[#allocation52_spill] sm:$0xff] %v6002_v17  ;;  %v868_v13 = vpop.xlane.xlu1 %867  ;;  %7827 = vst [vmem:[#allocation53_spill] sm:$0xff] %v6010_v26  ;;  %v1530_v39 = vshra.s32 %v6002_v17, 16 }
 0x1f0   :  { %vm960_vm10 = vcmp.eq.f32.partialorder %v5618_v42, %v868_v13  ;;  %v870_v24 = vpop.xlane.xlu0 %869  ;;  %v6008_v9 = vcvt.s32.f32 %v1516_v33 }
 0x1f1   :  { %v6014_v20 = vsel %vm960_vm10, %v5735_v46, 128  ;;  %vm961_vm11 = vcmp.eq.f32.partialorder %v5623_v47, %v870_v24  ;;  %v6026_v17 = vcvt.s32.f32 %v1530_v39 }
 0x1f2   :  { %v6018_v5 = vsel %vm961_vm11, %v5735_v46, 128  ;;  %1519 = vmin.xlane.f32.xlu1 %v6008_v9  ;;  %1505 = vmin.xlane.f32.xlu0 %v6010_v26  ;;  %v1544_v42 = vshra.s32 %v6014_v20, 16 }
 0x1f3   :  { %7828 = vst [vmem:[#allocation54_spill] sm:$0xff] %v6018_v5  ;;  %v872_v33 = vpop.xlane.xlu1 %871  ;;  %7829 = vst [vmem:[#allocation55_spill] sm:$0xff] %v6026_v17  ;;  %v1558_v21 = vshra.s32 %v6018_v5, 16 }
 0x1f4   :  { %vm962_vm12 = vcmp.eq.f32.partialorder %v5626_v50, %v872_v33  ;;  %v874_v32 = vpop.xlane.xlu0 %873  ;;  %v6024_v13 = vcvt.s32.f32 %v1544_v42 }
 0x1f5   :  { %v6030_v47 = vsel %vm962_vm12, %v5735_v46, 128  ;;  %vm963_vm13 = vcmp.eq.f32.partialorder %v5631_v55, %v874_v32  ;;  %v6042_v5 = vcvt.s32.f32 %v1558_v21 }
 0x1f6   :  { %v6034_v24 = vsel %vm963_vm13, %v5735_v46, 128  ;;  %1547 = vmin.xlane.f32.xlu1 %v6024_v13  ;;  %1533 = vmin.xlane.f32.xlu0 %v6026_v17  ;;  %v1572_v50 = vshra.s32 %v6030_v47, 16 }
 0x1f7   :  { %7830 = vst [vmem:[#allocation56_spill] sm:$0xff] %v6034_v24  ;;  %v876_v42 = vpop.xlane.xlu1 %875  ;;  %7831 = vst [vmem:[#allocation57_spill] sm:$0xff] %v6042_v5  ;;  %v1586_v26 = vshra.s32 %v6034_v24, 16 }
 0x1f8   :  { %vm964_vm14 = vcmp.eq.f32.partialorder %v5634_v58, %v876_v42  ;;  %v878_v39 = vpop.xlane.xlu0 %877  ;;  %v6040_v33 = vcvt.s32.f32 %v1572_v50 }
 0x1f9   :  { %v6046_v55 = vsel %vm964_vm14, %v5735_v46, 128  ;;  %vm965_vm15 = vcmp.eq.f32.partialorder %v5639_v63, %v878_v39  ;;  %v6058_v24 = vcvt.s32.f32 %v1586_v26 }
 0x1fa   :  { %v6050_v32 = vsel %vm965_vm15, %v5735_v46, 128  ;;  %1575 = vmin.xlane.f32.xlu1 %v6040_v33  ;;  %1561 = vmin.xlane.f32.xlu0 %v6042_v5  ;;  %v1600_v58 = vshra.s32 %v6046_v55, 16 }
 0x1fb   :  { %7832 = vst [vmem:[#allocation58_spill] sm:$0xff] %v6050_v32  ;;  %v880_v50 = vpop.xlane.xlu1 %879  ;;  %7833 = vst [vmem:[#allocation59_spill] sm:$0xff] %v6058_v24  ;;  %v1614_v17 = vshra.s32 %v6050_v32, 16 }
 0x1fc   :  { %vm966_vm1 = vcmp.eq.f32.partialorder %v5642_v2, %v880_v50  ;;  %v882_v21 = vpop.xlane.xlu0 %881  ;;  %v6056_v42 = vcvt.s32.f32 %v1600_v58 }
 0x1fd   :  { %v6062_v63 = vsel %vm966_vm1, %v5735_v46, 128  ;;  %vm967_vm3 = vcmp.eq.f32.partialorder %v5647_v7, %v882_v21  ;;  %v6074_v32 = vcvt.s32.f32 %v1614_v17 }
 0x1fe   :  { %v6066_v39 = vsel %vm967_vm3, %v5735_v46, 128  ;;  %1603 = vmin.xlane.f32.xlu1 %v6056_v42  ;;  %1589 = vmin.xlane.f32.xlu0 %v6058_v24  ;;  %v1628_v2 = vshra.s32 %v6062_v63, 16 }
 0x1ff   :  { %7834 = vst [vmem:[#allocation60_spill] sm:$0xff] %v6066_v39  ;;  %v884_v58 = vpop.xlane.xlu1 %883  ;;  %7835 = vst [vmem:[#allocation61_spill] sm:$0xff] %v6074_v32  ;;  %v1642_v5 = vshra.s32 %v6066_v39, 16 }
 0x200   :  { %vm968_vm4 = vcmp.eq.f32.partialorder %v5650_v10, %v884_v58  ;;  %v886_v26 = vpop.xlane.xlu0 %885  ;;  %v6072_v50 = vcvt.s32.f32 %v1628_v2 }
 0x201   :  { %v6078_v7 = vsel %vm968_vm4, %v5735_v46, 128  ;;  %vm969_vm5 = vcmp.eq.f32.partialorder %v5655_v15, %v886_v26  ;;  %v6090_v39 = vcvt.s32.f32 %v1642_v5 }
 0x202   :  { %v6082_v21 = vsel %vm969_vm5, %v5735_v46, 128  ;;  %1631 = vmin.xlane.f32.xlu1 %v6072_v50  ;;  %1617 = vmin.xlane.f32.xlu0 %v6074_v32  ;;  %v1656_v10 = vshra.s32 %v6078_v7, 16 }
 0x203   :  { %7836 = vst [vmem:[#allocation62_spill] sm:$0xff] %v6082_v21  ;;  %v888_v2 = vpop.xlane.xlu1 %887  ;;  %7837 = vst [vmem:[#allocation63_spill] sm:$0xff] %v6090_v39  ;;  %v1670_v24 = vshra.s32 %v6082_v21, 16 }
 0x204   :  { %vm970_vm6 = vcmp.eq.f32.partialorder %v5658_v18, %v888_v2  ;;  %v890_v17 = vpop.xlane.xlu0 %889  ;;  %v6088_v58 = vcvt.s32.f32 %v1656_v10 }
 0x205   :  { %v6094_v15 = vsel %vm970_vm6, %v5735_v46, 128  ;;  %vm971_vm7 = vcmp.eq.f32.partialorder %v5663_v23, %v890_v17  ;;  %v6106_v21 = vcvt.s32.f32 %v1670_v24 }
 0x206   :  { %v6098_v26 = vsel %vm971_vm7, %v5735_v46, 128  ;;  %1659 = vmin.xlane.f32.xlu1 %v6088_v58  ;;  %1645 = vmin.xlane.f32.xlu0 %v6090_v39  ;;  %v1684_v18 = vshra.s32 %v6094_v15, 16 }
 0x207   :  { %7838 = vst [vmem:[#allocation64_spill] sm:$0xff] %v6098_v26  ;;  %v892_v10 = vpop.xlane.xlu1 %891  ;;  %7839 = vst [vmem:[#allocation65_spill] sm:$0xff] %v6106_v21  ;;  %v1698_v32 = vshra.s32 %v6098_v26, 16 }
 0x208   :  { %vm972_vm8 = vcmp.eq.f32.partialorder %v5666_v28, %v892_v10  ;;  %v894_v5 = vpop.xlane.xlu0 %893  ;;  %v6104_v2 = vcvt.s32.f32 %v1684_v18 }
 0x209   :  { %v6110_v23 = vsel %vm972_vm8, %v5735_v46, 128  ;;  %vm973_vm9 = vcmp.eq.f32.partialorder %v5671_v38, %v894_v5  ;;  %v6122_v26 = vcvt.s32.f32 %v1698_v32 }
 0x20a   :  { %v6114_v17 = vsel %vm973_vm9, %v5735_v46, 128  ;;  %1687 = vmin.xlane.f32.xlu1 %v6104_v2  ;;  %1673 = vmin.xlane.f32.xlu0 %v6106_v21  ;;  %v1712_v28 = vshra.s32 %v6110_v23, 16 }
 0x20b   :  { %7840 = vst [vmem:[#allocation66_spill] sm:$0xff] %v6114_v17  ;;  %v896_v18 = vpop.xlane.xlu1 %895  ;;  %7842 = vst [vmem:[#allocation68_spill] sm:$0xff] %v6122_v26  ;;  %v1726_v39 = vshra.s32 %v6114_v17, 16 }
 0x20c   :  { %vm974_vm10 = vcmp.eq.f32.partialorder %v5674_v43, %v896_v18  ;;  %v898_v24 = vpop.xlane.xlu0 %897  ;;  %v6120_v10 = vcvt.s32.f32 %v1712_v28 }
 0x20d   :  { %v6126_v38 = vsel %vm974_vm10, %v5735_v46, 128  ;;  %vm975_vm11 = vcmp.eq.f32.partialorder %v5679_v54, %v898_v24  ;;  %v6138_v17 = vcvt.s32.f32 %v1726_v39 }
 0x20e   :  { %7841 = vst [vmem:[#allocation67_spill] sm:$0xff] %v6120_v10  ;;  %v6130_v5 = vsel %vm975_vm11, %v5735_v46, 128  ;;  %1715 = vmin.xlane.f32.xlu1 %v6120_v10  ;;  %1701 = vmin.xlane.f32.xlu0 %v6122_v26  ;;  %v1740_v43 = vshra.s32 %v6126_v38, 16 }
 0x20f   :  { %7843 = vst [vmem:[#allocation69_spill] sm:$0xff] %v6130_v5  ;;  %v900_v28 = vpop.xlane.xlu1 %899  ;;  %7845 = vst [vmem:[#allocation71_spill] sm:$0xff] %v6138_v17  ;;  %v1754_v21 = vshra.s32 %v6130_v5, 16 }
 0x210   :  { %vm976_vm12 = vcmp.eq.f32.partialorder %v5682_v59, %v900_v28  ;;  %v902_v32 = vpop.xlane.xlu0 %901  ;;  %v6136_v18 = vcvt.s32.f32 %v1740_v43  ;;  %v7848_v28 = vld [vmem:[#allocation8_spill] sm:$0xff] }
 0x211   :  { %v6142_v54 = vsel %vm976_vm12, %v5735_v46, 128  ;;  %vm977_vm13 = vcmp.eq.f32.partialorder %v5687_v6, %v902_v32  ;;  %v6154_v5 = vcvt.s32.f32 %v1754_v21  ;;  %v7852_v32 = vld [vmem:[#allocation9_spill] sm:$0xff] }
 0x212   :  { %7844 = vst [vmem:[#allocation70_spill] sm:$0xff] %v6136_v18  ;;  %7846 = vst [vmem:[#allocation72_spill] sm:$0xff] %v6142_v54  ;;  %v6146_v24 = vsel %vm977_vm13, %v5735_v46, 128  ;;  %1743 = vmin.xlane.f32.xlu1 %v6136_v18  ;;  %1729 = vmin.xlane.f32.xlu0 %v6138_v17  ;;  %v1768_v59 = vshra.s32 %v6142_v54, 16 }
 0x213   :  { %7847 = vst [vmem:[#allocation73_spill] sm:$0xff] %v6146_v24  ;;  %v904_v43 = vpop.xlane.xlu1 %903  ;;  %7850 = vst [vmem:[#allocation74_spill] sm:$0xff] %v6154_v5  ;;  %v1782_v10 = vshra.s32 %v6146_v24, 16 }
 0x214   :  { %vm978_vm14 = vcmp.eq.f32.partialorder %v7848_v28, %v904_v43  ;;  %v906_v39 = vpop.xlane.xlu0 %905  ;;  %v6152_v26 = vcvt.s32.f32 %v1768_v59  ;;  %v7854_v28 = vld [vmem:[#allocation10_spill] sm:$0xff] }
 0x215   :  { %v6158_v6 = vsel %vm978_vm14, %v5735_v46, 128  ;;  %vm979_vm15 = vcmp.eq.f32.partialorder %v7852_v32, %v906_v39  ;;  %v6170_v24 = vcvt.s32.f32 %v1782_v10  ;;  %v7857_v32 = vld [vmem:[#allocation11_spill] sm:$0xff] }
 0x216   :  { %7849 = vst [vmem:[#allocation8_spill] sm:$0xff] %v6152_v26  ;;  %7851 = vst [vmem:[#allocation75_spill] sm:$0xff] %v6158_v6  ;;  %v6162_v18 = vsel %vm979_vm15, %v5735_v46, 128  ;;  %1771 = vmin.xlane.f32.xlu1 %v6152_v26  ;;  %1757 = vmin.xlane.f32.xlu0 %v6154_v5  ;;  %v1796_v43 = vshra.s32 %v6158_v6, 16 }
 0x217   :  { %7853 = vst [vmem:[#allocation9_spill] sm:$0xff] %v6162_v18  ;;  %v908_v59 = vpop.xlane.xlu1 %907  ;;  %7856 = vst [vmem:[#allocation76_spill] sm:$0xff] %v6170_v24  ;;  %v1810_v54 = vshra.s32 %v6162_v18, 16 }
 0x218   :  { %vm980_vm1 = vcmp.eq.f32.partialorder %v7854_v28, %v908_v59  ;;  %v910_v21 = vpop.xlane.xlu0 %909  ;;  %v6168_v17 = vcvt.s32.f32 %v1796_v43  ;;  %v7859_v28 = vld [vmem:[#allocation12_spill] sm:$0xff] }
 0x219   :  { %v6174_v39 = vsel %vm980_vm1, %v5735_v46, 128  ;;  %vm981_vm3 = vcmp.eq.f32.partialorder %v7857_v32, %v910_v21  ;;  %v6186_v18 = vcvt.s32.f32 %v1810_v54 }
 0x21a   :  { %7855 = vst [vmem:[#allocation10_spill] sm:$0xff] %v6168_v17  ;;  %v6178_v26 = vsel %vm981_vm3, %v5735_v46, 128  ;;  %1799 = vmin.xlane.f32.xlu1 %v6168_v17  ;;  %1785 = vmin.xlane.f32.xlu0 %v6170_v24  ;;  %v1824_v59 = vshra.s32 %v6174_v39, 16 }
 0x21b   :  { %7858 = vst [vmem:[#allocation11_spill] sm:$0xff] %v6178_v26  ;;  %v912_v43 = vpop.xlane.xlu1 %911  ;;  %7861 = vst [vmem:[#allocation77_spill] sm:$0xff] %v6186_v18  ;;  %v1838_v6 = vshra.s32 %v6178_v26, 16 }
 0x21c   :  { %vm982_vm4 = vcmp.eq.f32.partialorder %v7859_v28, %v912_v43  ;;  %v914_v10 = vpop.xlane.xlu0 %913  ;;  %v6184_v5 = vcvt.s32.f32 %v1824_v59  ;;  %v7863_v28 = vld [vmem:[#allocation13_spill] sm:$0xff] }
 0x21d   :  { %v6190_v21 = vsel %vm982_vm4, %v5735_v46, 128  ;;  %vm983_vm5 = vcmp.eq.f32.partialorder %v5711_v14, %v914_v10  ;;  %v6202_v26 = vcvt.s32.f32 %v1838_v6  ;;  %v7866_v10 = vld [vmem:[#allocation14_spill] sm:$0xff] }
 0x21e   :  { %7860 = vst [vmem:[#allocation12_spill] sm:$0xff] %v6184_v5  ;;  %v6194_v32 = vsel %vm983_vm5, %v5735_v46, 128  ;;  %1827 = vmin.xlane.f32.xlu1 %v6184_v5  ;;  %1813 = vmin.xlane.f32.xlu0 %v6186_v18  ;;  %v1852_v43 = vshra.s32 %v6190_v21, 16 }
 0x21f   :  { %7862 = vst [vmem:[#allocation78_spill] sm:$0xff] %v6194_v32  ;;  %v916_v59 = vpop.xlane.xlu1 %915  ;;  %7865 = vst [vmem:[#allocation79_spill] sm:$0xff] %v6202_v26  ;;  %v1866_v17 = vshra.s32 %v6194_v32, 16 }
 0x220   :  { %vm984_vm6 = vcmp.eq.f32.partialorder %v7863_v28, %v916_v59  ;;  %v918_v54 = vpop.xlane.xlu0 %917  ;;  %v6200_v24 = vcvt.s32.f32 %v1852_v43 }
 0x221   :  { %v6206_v14 = vsel %vm984_vm6, %v5735_v46, 128  ;;  %vm985_vm7 = vcmp.eq.f32.partialorder %v7866_v10, %v918_v54  ;;  %v6218_v32 = vcvt.s32.f32 %v1866_v17  ;;  %v7870_v10 = vld [vmem:[#allocation15_spill] sm:$0xff] }
 0x222   :  { %7864 = vst [vmem:[#allocation13_spill] sm:$0xff] %v6200_v24  ;;  %v6210_v5 = vsel %vm985_vm7, %v5735_v46, 128  ;;  %1855 = vmin.xlane.f32.xlu1 %v6200_v24  ;;  %1841 = vmin.xlane.f32.xlu0 %v6202_v26  ;;  %v1880_v59 = vshra.s32 %v6206_v14, 16 }
 0x223   :  { %7867 = vst [vmem:[#allocation14_spill] sm:$0xff] %v6210_v5  ;;  %v920_v43 = vpop.xlane.xlu1 %919  ;;  %7869 = vst [vmem:[#allocation81_spill] sm:$0xff] %v6218_v32  ;;  %v1894_v18 = vshra.s32 %v6210_v5, 16 }
 0x224   :  { %vm986_vm8 = vcmp.eq.f32.partialorder %v5722_v29, %v920_v43  ;;  %v922_v6 = vpop.xlane.xlu0 %921  ;;  %v6216_v28 = vcvt.s32.f32 %v1880_v59  ;;  %v7872_v43 = vld [vmem:[#allocation16_spill] sm:$0xff] }
 0x225   :  { %v6222_v54 = vsel %vm986_vm8, %v5735_v46, 128  ;;  %vm987_vm9 = vcmp.eq.f32.partialorder %v7870_v10, %v922_v6  ;;  %v6234_v5 = vcvt.s32.f32 %v1894_v18  ;;  %v7878_v18 = vld [vmem:[#allocation18_spill] sm:$0xff] }
 0x226   :  { %7868 = vst [vmem:[#allocation80_spill] sm:$0xff] %v6216_v28  ;;  %v6226_v24 = vsel %vm987_vm9, %v5735_v46, 128  ;;  %1883 = vmin.xlane.f32.xlu1 %v6216_v28  ;;  %1869 = vmin.xlane.f32.xlu0 %v6218_v32  ;;  %v1908_v29 = vshra.s32 %v6222_v54, 16 }
 0x227   :  { %7871 = vst [vmem:[#allocation15_spill] sm:$0xff] %v6226_v24  ;;  %v924_v59 = vpop.xlane.xlu1 %923  ;;  %7874 = vst [vmem:[#allocation82_spill] sm:$0xff] %v6234_v5  ;;  %v1922_v26 = vshra.s32 %v6226_v24, 16 }
 0x228   :  { %vm988_vm10 = vcmp.eq.f32.partialorder %v7872_v43, %v924_v59  ;;  %v6232_v17 = vcvt.s32.f32 %v1908_v29  ;;  %v1067_v29 = vand.u32 65535, %v7878_v18  ;;  %v1095_v59 = vand.u32 65535, %v5747_v62  ;;  %v7881_v62 = vld [vmem:[#allocation20_spill] sm:$0xff] }
 0x229   :  { %v6238_v6 = vsel %vm988_vm10, %v5735_v46, 128  ;;  %v6245_v28 = vcvt.s32.f32 %v1922_v26  ;;  %v1053_v43 = vand.u32 65535, %v5750_v22  ;;  %v1081_v26 = vand.u32 65535, %v5762_v51  ;;  %v7882_v22 = vld [vmem:[#allocation21_spill] sm:$0xff] }
 0x22a   :  { %7873 = vst [vmem:[#allocation16_spill] sm:$0xff] %v6232_v17  ;;  %7875 = vst [vmem:[#allocation83_spill] sm:$0xff] %v6238_v6  ;;  %1911 = vmin.xlane.f32.xlu1 %v6232_v17  ;;  %1897 = vmin.xlane.f32.xlu0 %v6234_v5  ;;  %v1936_v10 = vshra.s32 %v6238_v6, 16  ;;  %v1069_v17 = vcvt.s32.f32 %v1067_v29  ;;  %v7879_v5 = vld [vmem:[#allocation19_spill] sm:$0xff]  ;;  %v1109_v51 = vand.u32 65535, %v5768_v3  ;;  %v7885_v3 = vld [vmem:[#allocation24_spill] sm:$0xff] }
 0x22b   :  { %7877 = vst [vmem:[#allocation85_spill] sm:$0xff] %v6245_v28  ;;  %v1055_v18 = vcvt.s32.f32 %v1053_v43 }
 0x22c   :  { %v6243_v32 = vcvt.s32.f32 %v1936_v10 }
 0x22e   :  { %7876 = vst [vmem:[#allocation84_spill] sm:$0xff] %v6243_v32  ;;  %1939 = vmin.xlane.f32.xlu1 %v6243_v32  ;;  %1925 = vmin.xlane.f32.xlu0 %v6245_v28  ;;  %v1097_v28 = vcvt.s32.f32 %v1095_v59  ;;  %v7883_v59 = vld [vmem:[#allocation22_spill] sm:$0xff] }
 0x23b   :  { %v6252_v46 = vpop.xlane.xlu1 %1071 }
 0x23c   :  { %vm1073_vm11 = vcmp.eq.f32.partialorder %v7879_v5, %v6252_v46  ;;  %v1123_v5 = vand.u32 65535, %v5776_v11  ;;  %v1111_v11 = vcvt.s32.f32 %v1109_v51 }
 0x23d   :  { %v1074_v10 = vsel %vm1073_vm11, %v1069_v17, inf }
 0x23e   :  { %1075 = vmin.xlane.f32.xlu1 %v1074_v10  ;;  %v1083_v10 = vcvt.s32.f32 %v1081_v26 }
 0x23f   :  { %v6257_v24 = vpop.xlane.xlu1 %1099  ;;  %v6259_v32 = vpop.xlane.xlu0 %1057 }
 0x240   :  { %7880 = vst [vmem:[#allocation18_spill] sm:$0xff] %v6257_v24  ;;  %vm1101_vm12 = vcmp.eq.f32.partialorder %v7881_v62, %v6257_v24  ;;  %vm1059_vm13 = vcmp.eq.f32.partialorder %v7882_v22, %v6259_v32  ;;  %v1151_v62 = vand.u32 65535, %v5791_v35  ;;  %v7884_v24 = vld [vmem:[#allocation23_spill] sm:$0xff]  ;;  %v1179_v35 = vand.u32 65535, %v5807_v37 }
 0x241   :  { %v1102_v29 = vsel %vm1101_vm12, %v1097_v28, inf  ;;  %v1060_v6 = vsel %vm1059_vm13, %v1055_v18, inf  ;;  %v1137_v22 = vand.u32 65535, %v7884_v24  ;;  %v1207_v37 = vand.u32 65535, %v5823_v36 }
 0x242   :  { %1103 = vmin.xlane.f32.xlu1 %v1102_v29  ;;  %1061 = vmin.xlane.f32.xlu0 %v1060_v6  ;;  %v1125_v6 = vcvt.s32.f32 %v1123_v5  ;;  %v1153_v5 = vcvt.s32.f32 %v1151_v62  ;;  %v1181_v62 = vcvt.s32.f32 %v1179_v35  ;;  %v1235_v36 = vand.u32 65535, %v5839_v40 }
 0x243   :  { %v6267_v17 = vpop.xlane.xlu0 %1085  ;;  %v1139_v51 = vcvt.s32.f32 %v1137_v22  ;;  %v1209_v35 = vcvt.s32.f32 %v1207_v37  ;;  %v1263_v40 = vand.u32 65535, %v5855_v44  ;;  %v1291_v44 = vand.u32 65535, %v5871_v48 }
 0x244   :  { %vm1087_vm14 = vcmp.eq.f32.partialorder %v7883_v59, %v6267_v17  ;;  %v1237_v37 = vcvt.s32.f32 %v1235_v36  ;;  %v1319_v48 = vand.u32 65535, %v5887_v52  ;;  %v1347_v52 = vand.u32 65535, %v5903_v56 }
 0x245   :  { %v1088_v43 = vsel %vm1087_vm14, %v1083_v10, inf  ;;  %v7886_v10 = vld [vmem:[#allocation25_spill] sm:$0xff]  ;;  %v1265_v36 = vcvt.s32.f32 %v1263_v40  ;;  %v1293_v40 = vcvt.s32.f32 %v1291_v44  ;;  %v1375_v56 = vand.u32 65535, %v5919_v60 }
 0x246   :  { %1089 = vmin.xlane.f32.xlu0 %v1088_v43  ;;  %v1165_v24 = vand.u32 65535, %v7886_v10  ;;  %v1321_v44 = vcvt.s32.f32 %v1319_v48  ;;  %v1349_v48 = vcvt.s32.f32 %v1347_v52  ;;  %v1403_v60 = vand.u32 65535, %v5935_v0 }
 0x247   :  { %v6273_v28 = vpop.xlane.xlu1 %1127  ;;  %v6275_v18 = vpop.xlane.xlu0 %1113  ;;  %v1377_v52 = vcvt.s32.f32 %v1375_v56  ;;  %v1431_v0 = vand.u32 65535, %v5951_v4  ;;  %v1459_v4 = vand.u32 65535, %v5967_v8  ;;  %v1487_v8 = vand.u32 65535, %v5983_v12 }
 0x248   :  { %vm1129_vm15 = vcmp.eq.f32.partialorder %v5784_v19, %v6273_v28  ;;  %vm1115_vm1 = vcmp.eq.f32.partialorder %v7885_v3, %v6275_v18  ;;  %v7887_v19 = vld [vmem:[#allocation26_spill] sm:$0xff]  ;;  %v7888_v3 = vld [vmem:[#allocation27_spill] sm:$0xff]  ;;  %v1167_v22 = vcvt.s32.f32 %v1165_v24  ;;  %v1405_v56 = vcvt.s32.f32 %v1403_v60 }
 0x249   :  { %v1130_v26 = vsel %vm1129_vm15, %v1125_v6, inf  ;;  %v1116_v29 = vsel %vm1115_vm1, %v1111_v11, inf  ;;  %v1433_v60 = vcvt.s32.f32 %v1431_v0  ;;  %v1461_v0 = vcvt.s32.f32 %v1459_v4 }
 0x24a   :  { %1131 = vmin.xlane.f32.xlu1 %v1130_v26  ;;  %1117 = vmin.xlane.f32.xlu0 %v1116_v29  ;;  %v1193_v26 = vand.u32 65535, %v7888_v3  ;;  %v1515_v12 = vand.u32 65535, %v5999_v16  ;;  %v1489_v4 = vcvt.s32.f32 %v1487_v8  ;;  %v7914_v8 = vld [vmem:[#allocation52_spill] sm:$0xff] }
 0x24b   :  { %v6283_v59 = vpop.xlane.xlu1 %1155  ;;  %v6285_v43 = vpop.xlane.xlu0 %1141 }
 0x24c   :  { %vm1157_vm3 = vcmp.eq.f32.partialorder %v5800_v30, %v6283_v59  ;;  %vm1143_vm4 = vcmp.eq.f32.partialorder %v7887_v19, %v6285_v43  ;;  %v7889_v30 = vld [vmem:[#allocation28_spill] sm:$0xff]  ;;  %v7890_v19 = vld [vmem:[#allocation29_spill] sm:$0xff]  ;;  %v1195_v24 = vcvt.s32.f32 %v1193_v26 }
 0x24d   :  { %v1158_v6 = vsel %vm1157_vm3, %v1153_v5, inf  ;;  %v1144_v11 = vsel %vm1143_vm4, %v1139_v51, inf }
 0x24e   :  { %1159 = vmin.xlane.f32.xlu1 %v1158_v6  ;;  %1145 = vmin.xlane.f32.xlu0 %v1144_v11  ;;  %v1221_v6 = vand.u32 65535, %v7890_v19 }
 0x24f   :  { %v6293_v29 = vpop.xlane.xlu1 %1183  ;;  %v6295_v10 = vpop.xlane.xlu0 %1169 }
 0x250   :  { %vm1185_vm5 = vcmp.eq.f32.partialorder %v5816_v25, %v6293_v29  ;;  %vm1171_vm6 = vcmp.eq.f32.partialorder %v7889_v30, %v6295_v10  ;;  %v7891_v25 = vld [vmem:[#allocation30_spill] sm:$0xff]  ;;  %v7892_v30 = vld [vmem:[#allocation31_spill] sm:$0xff]  ;;  %v1223_v26 = vcvt.s32.f32 %v1221_v6 }
 0x251   :  { %v1186_v5 = vsel %vm1185_vm5, %v1181_v62, inf  ;;  %v1172_v51 = vsel %vm1171_vm6, %v1167_v22, inf }
 0x252   :  { %1187 = vmin.xlane.f32.xlu1 %v1186_v5  ;;  %1173 = vmin.xlane.f32.xlu0 %v1172_v51  ;;  %v1249_v5 = vand.u32 65535, %v7892_v30 }
 0x253   :  { %v6303_v11 = vpop.xlane.xlu1 %1211  ;;  %v6305_v3 = vpop.xlane.xlu0 %1197 }
 0x254   :  { %vm1213_vm7 = vcmp.eq.f32.partialorder %v5832_v27, %v6303_v11  ;;  %vm1199_vm8 = vcmp.eq.f32.partialorder %v7891_v25, %v6305_v3  ;;  %v7893_v27 = vld [vmem:[#allocation32_spill] sm:$0xff]  ;;  %v7894_v25 = vld [vmem:[#allocation33_spill] sm:$0xff]  ;;  %v1251_v6 = vcvt.s32.f32 %v1249_v5 }
 0x255   :  { %v1214_v62 = vsel %vm1213_vm7, %v1209_v35, inf  ;;  %v1200_v22 = vsel %vm1199_vm8, %v1195_v24, inf }
 0x256   :  { %1215 = vmin.xlane.f32.xlu1 %v1214_v62  ;;  %1201 = vmin.xlane.f32.xlu0 %v1200_v22  ;;  %v1277_v62 = vand.u32 65535, %v7894_v25 }
 0x257   :  { %v6313_v51 = vpop.xlane.xlu1 %1239  ;;  %v6315_v19 = vpop.xlane.xlu0 %1225 }
 0x258   :  { %vm1241_vm9 = vcmp.eq.f32.partialorder %v5848_v34, %v6313_v51  ;;  %vm1227_vm10 = vcmp.eq.f32.partialorder %v7893_v27, %v6315_v19  ;;  %v7895_v34 = vld [vmem:[#allocation34_spill] sm:$0xff]  ;;  %v7896_v27 = vld [vmem:[#allocation35_spill] sm:$0xff]  ;;  %v1279_v5 = vcvt.s32.f32 %v1277_v62 }
 0x259   :  { %v1242_v35 = vsel %vm1241_vm9, %v1237_v37, inf  ;;  %v1228_v24 = vsel %vm1227_vm10, %v1223_v26, inf }
 0x25a   :  { %1243 = vmin.xlane.f32.xlu1 %v1242_v35  ;;  %1229 = vmin.xlane.f32.xlu0 %v1228_v24  ;;  %v1305_v35 = vand.u32 65535, %v7896_v27 }
 0x25b   :  { %v6323_v22 = vpop.xlane.xlu1 %1267  ;;  %v6325_v30 = vpop.xlane.xlu0 %1253 }
 0x25c   :  { %vm1269_vm11 = vcmp.eq.f32.partialorder %v5864_v31, %v6323_v22  ;;  %vm1255_vm12 = vcmp.eq.f32.partialorder %v7895_v34, %v6325_v30  ;;  %v7897_v31 = vld [vmem:[#allocation36_spill] sm:$0xff]  ;;  %v7898_v34 = vld [vmem:[#allocation37_spill] sm:$0xff]  ;;  %v1307_v62 = vcvt.s32.f32 %v1305_v35 }
 0x25d   :  { %v1270_v37 = vsel %vm1269_vm11, %v1265_v36, inf  ;;  %v1256_v26 = vsel %vm1255_vm12, %v1251_v6, inf }
 0x25e   :  { %1271 = vmin.xlane.f32.xlu1 %v1270_v37  ;;  %1257 = vmin.xlane.f32.xlu0 %v1256_v26  ;;  %v1333_v37 = vand.u32 65535, %v7898_v34 }
 0x25f   :  { %v6333_v24 = vpop.xlane.xlu1 %1295  ;;  %v6335_v25 = vpop.xlane.xlu0 %1281 }
 0x260   :  { %vm1297_vm13 = vcmp.eq.f32.partialorder %v5880_v41, %v6333_v24  ;;  %vm1283_vm14 = vcmp.eq.f32.partialorder %v7897_v31, %v6335_v25  ;;  %v7899_v41 = vld [vmem:[#allocation38_spill] sm:$0xff]  ;;  %v7900_v31 = vld [vmem:[#allocation39_spill] sm:$0xff]  ;;  %v1335_v35 = vcvt.s32.f32 %v1333_v37 }
 0x261   :  { %v1298_v36 = vsel %vm1297_vm13, %v1293_v40, inf  ;;  %v1284_v6 = vsel %vm1283_vm14, %v1279_v5, inf }
 0x262   :  { %1299 = vmin.xlane.f32.xlu1 %v1298_v36  ;;  %1285 = vmin.xlane.f32.xlu0 %v1284_v6  ;;  %v1361_v36 = vand.u32 65535, %v7900_v31 }
 0x263   :  { %v6343_v26 = vpop.xlane.xlu1 %1323  ;;  %v6345_v27 = vpop.xlane.xlu0 %1309 }
 0x264   :  { %vm1325_vm15 = vcmp.eq.f32.partialorder %v5896_v45, %v6343_v26  ;;  %vm1311_vm1 = vcmp.eq.f32.partialorder %v7899_v41, %v6345_v27  ;;  %v7901_v45 = vld [vmem:[#allocation40_spill] sm:$0xff]  ;;  %v7902_v41 = vld [vmem:[#allocation41_spill] sm:$0xff]  ;;  %v1363_v37 = vcvt.s32.f32 %v1361_v36 }
 0x265   :  { %v1326_v40 = vsel %vm1325_vm15, %v1321_v44, inf  ;;  %v1312_v5 = vsel %vm1311_vm1, %v1307_v62, inf }
 0x266   :  { %1327 = vmin.xlane.f32.xlu1 %v1326_v40  ;;  %1313 = vmin.xlane.f32.xlu0 %v1312_v5  ;;  %v1389_v40 = vand.u32 65535, %v7902_v41 }
 0x267   :  { %v6353_v6 = vpop.xlane.xlu1 %1351  ;;  %v6355_v34 = vpop.xlane.xlu0 %1337 }
 0x268   :  { %vm1353_vm3 = vcmp.eq.f32.partialorder %v5912_v49, %v6353_v6  ;;  %vm1339_vm4 = vcmp.eq.f32.partialorder %v7901_v45, %v6355_v34  ;;  %v7903_v49 = vld [vmem:[#allocation42_spill] sm:$0xff]  ;;  %v7904_v45 = vld [vmem:[#allocation43_spill] sm:$0xff]  ;;  %v1391_v36 = vcvt.s32.f32 %v1389_v40 }
 0x269   :  { %v1354_v44 = vsel %vm1353_vm3, %v1349_v48, inf  ;;  %v1340_v62 = vsel %vm1339_vm4, %v1335_v35, inf }
 0x26a   :  { %1355 = vmin.xlane.f32.xlu1 %v1354_v44  ;;  %1341 = vmin.xlane.f32.xlu0 %v1340_v62  ;;  %v1417_v44 = vand.u32 65535, %v7904_v45 }
 0x26b   :  { %v6363_v5 = vpop.xlane.xlu1 %1379  ;;  %v6365_v31 = vpop.xlane.xlu0 %1365 }
 0x26c   :  { %vm1381_vm5 = vcmp.eq.f32.partialorder %v5928_v53, %v6363_v5  ;;  %vm1367_vm6 = vcmp.eq.f32.partialorder %v7903_v49, %v6365_v31  ;;  %v7905_v53 = vld [vmem:[#allocation44_spill] sm:$0xff]  ;;  %v7906_v49 = vld [vmem:[#allocation45_spill] sm:$0xff]  ;;  %v1419_v40 = vcvt.s32.f32 %v1417_v44 }
 0x26d   :  { %v1382_v48 = vsel %vm1381_vm5, %v1377_v52, inf  ;;  %v1368_v35 = vsel %vm1367_vm6, %v1363_v37, inf }
 0x26e   :  { %1383 = vmin.xlane.f32.xlu1 %v1382_v48  ;;  %1369 = vmin.xlane.f32.xlu0 %v1368_v35  ;;  %v1445_v48 = vand.u32 65535, %v7906_v49 }
 0x26f   :  { %v6373_v62 = vpop.xlane.xlu1 %1407  ;;  %v6375_v41 = vpop.xlane.xlu0 %1393 }
 0x270   :  { %vm1409_vm7 = vcmp.eq.f32.partialorder %v5944_v57, %v6373_v62  ;;  %vm1395_vm8 = vcmp.eq.f32.partialorder %v7905_v53, %v6375_v41  ;;  %v7908_v57 = vld [vmem:[#allocation46_spill] sm:$0xff]  ;;  %v7909_v53 = vld [vmem:[#allocation47_spill] sm:$0xff]  ;;  %v1447_v44 = vcvt.s32.f32 %v1445_v48 }
 0x271   :  { %v1410_v52 = vsel %vm1409_vm7, %v1405_v56, inf  ;;  %v1396_v37 = vsel %vm1395_vm8, %v1391_v36, inf }
 0x272   :  { %1411 = vmin.xlane.f32.xlu1 %v1410_v52  ;;  %1397 = vmin.xlane.f32.xlu0 %v1396_v37  ;;  %v1473_v52 = vand.u32 65535, %v7909_v53 }
 0x273   :  { %v6383_v35 = vpop.xlane.xlu1 %1435  ;;  %v6385_v45 = vpop.xlane.xlu0 %1421 }
 0x274   :  { %7907 = vst [vmem:[#allocation19_spill] sm:$0xff] %v6385_v45  ;;  %vm1437_vm9 = vcmp.eq.f32.partialorder %v5960_v61, %v6383_v35  ;;  %vm1423_vm10 = vcmp.eq.f32.partialorder %v7908_v57, %v6385_v45  ;;  %v7910_v61 = vld [vmem:[#allocation48_spill] sm:$0xff]  ;;  %v7911_v57 = vld [vmem:[#allocation49_spill] sm:$0xff]  ;;  %v1475_v48 = vcvt.s32.f32 %v1473_v52  ;;  %v7912_v45 = vld [vmem:[#allocation50_spill] sm:$0xff]  ;;  %v1529_v52 = vand.u32 65535, %v7914_v8 }
 0x275   :  { %v1438_v56 = vsel %vm1437_vm9, %v1433_v60, inf  ;;  %v1424_v36 = vsel %vm1423_vm10, %v1419_v40, inf }
 0x276   :  { %1439 = vmin.xlane.f32.xlu1 %v1438_v56  ;;  %1425 = vmin.xlane.f32.xlu0 %v1424_v36  ;;  %v1501_v56 = vand.u32 65535, %v7911_v57  ;;  %v1543_v57 = vand.u32 65535, %v6014_v20  ;;  %v1571_v20 = vand.u32 65535, %v6030_v47  ;;  %v1599_v47 = vand.u32 65535, %v6046_v55 }
 0x277   :  { %v6393_v37 = vpop.xlane.xlu1 %1463  ;;  %v6395_v49 = vpop.xlane.xlu0 %1449  ;;  %v1627_v55 = vand.u32 65535, %v6062_v63  ;;  %v1655_v63 = vand.u32 65535, %v6078_v7  ;;  %v1683_v7 = vand.u32 65535, %v6094_v15  ;;  %v1711_v15 = vand.u32 65535, %v6110_v23 }
 0x278   :  { %vm1465_vm11 = vcmp.eq.f32.partialorder %v5976_v1, %v6393_v37  ;;  %vm1451_vm12 = vcmp.eq.f32.partialorder %v7910_v61, %v6395_v49  ;;  %v7913_v1 = vld [vmem:[#allocation51_spill] sm:$0xff]  ;;  %v1739_v23 = vand.u32 65535, %v6126_v38 }
 0x279   :  { %v1466_v60 = vsel %vm1465_vm11, %v1461_v0, inf  ;;  %v1452_v40 = vsel %vm1451_vm12, %v1447_v44, inf }
 0x27a   :  { %1467 = vmin.xlane.f32.xlu1 %v1466_v60  ;;  %1453 = vmin.xlane.f32.xlu0 %v1452_v40  ;;  %v1517_v60 = vcvt.s32.f32 %v1515_v12  ;;  %v1503_v40 = vcvt.s32.f32 %v1501_v56  ;;  %v1545_v12 = vcvt.s32.f32 %v1543_v57  ;;  %v1531_v56 = vcvt.s32.f32 %v1529_v52 }
 0x27b   :  { %v6403_v36 = vpop.xlane.xlu1 %1491  ;;  %v6405_v53 = vpop.xlane.xlu0 %1477  ;;  %v1573_v57 = vcvt.s32.f32 %v1571_v20  ;;  %v1601_v20 = vcvt.s32.f32 %v1599_v47  ;;  %v1629_v47 = vcvt.s32.f32 %v1627_v55  ;;  %v1657_v55 = vcvt.s32.f32 %v1655_v63 }
 0x27c   :  { %vm1493_vm13 = vcmp.eq.f32.partialorder %v7912_v45, %v6403_v36  ;;  %vm1479_vm14 = vcmp.eq.f32.partialorder %v7913_v1, %v6405_v53  ;;  %v7915_v45 = vld [vmem:[#allocation53_spill] sm:$0xff]  ;;  %v1685_v63 = vcvt.s32.f32 %v1683_v7  ;;  %v1713_v7 = vcvt.s32.f32 %v1711_v15 }
 0x27d   :  { %v1494_v0 = vsel %vm1493_vm13, %v1489_v4, inf  ;;  %v1480_v44 = vsel %vm1479_vm14, %v1475_v48, inf  ;;  %v1741_v15 = vcvt.s32.f32 %v1739_v23 }
 0x27e   :  { %1495 = vmin.xlane.f32.xlu1 %v1494_v0  ;;  %1481 = vmin.xlane.f32.xlu0 %v1480_v44  ;;  %v7916_v44 = vld [vmem:[#allocation54_spill] sm:$0xff] }
 0x27f   :  { %v6411_v61 = vpop.xlane.xlu1 %1519  ;;  %v6413_v16 = vpop.xlane.xlu0 %1505  ;;  %v1557_v8 = vand.u32 65535, %v7916_v44 }
 0x280   :  { %vm1521_vm15 = vcmp.eq.f32.partialorder %v6008_v9, %v6411_v61  ;;  %vm1507_vm1 = vcmp.eq.f32.partialorder %v7915_v45, %v6413_v16  ;;  %v7917_v9 = vld [vmem:[#allocation55_spill] sm:$0xff] }
 0x281   :  { %v1522_v4 = vsel %vm1521_vm15, %v1517_v60, inf  ;;  %v1508_v48 = vsel %vm1507_vm1, %v1503_v40, inf  ;;  %v1559_v52 = vcvt.s32.f32 %v1557_v8 }
 0x282   :  { %1523 = vmin.xlane.f32.xlu1 %v1522_v4  ;;  %1509 = vmin.xlane.f32.xlu0 %v1508_v48  ;;  %v7918_v48 = vld [vmem:[#allocation56_spill] sm:$0xff] }
 0x283   :  { %v6421_v1 = vpop.xlane.xlu1 %1547  ;;  %v6423_v0 = vpop.xlane.xlu0 %1533  ;;  %v1585_v44 = vand.u32 65535, %v7918_v48 }
 0x284   :  { %vm1549_vm3 = vcmp.eq.f32.partialorder %v6024_v13, %v6421_v1  ;;  %vm1535_vm4 = vcmp.eq.f32.partialorder %v7917_v9, %v6423_v0  ;;  %v7919_v13 = vld [vmem:[#allocation57_spill] sm:$0xff] }
 0x285   :  { %v1550_v60 = vsel %vm1549_vm3, %v1545_v12, inf  ;;  %v1536_v40 = vsel %vm1535_vm4, %v1531_v56, inf  ;;  %v1587_v8 = vcvt.s32.f32 %v1585_v44 }
 0x286   :  { %1551 = vmin.xlane.f32.xlu1 %v1550_v60  ;;  %1537 = vmin.xlane.f32.xlu0 %v1536_v40  ;;  %v7920_v40 = vld [vmem:[#allocation58_spill] sm:$0xff] }
 0x287   :  { %v6431_v45 = vpop.xlane.xlu1 %1575  ;;  %v6433_v4 = vpop.xlane.xlu0 %1561  ;;  %v1613_v48 = vand.u32 65535, %v7920_v40 }
 0x288   :  { %vm1577_vm5 = vcmp.eq.f32.partialorder %v6040_v33, %v6431_v45  ;;  %vm1563_vm6 = vcmp.eq.f32.partialorder %v7919_v13, %v6433_v4  ;;  %v7921_v33 = vld [vmem:[#allocation59_spill] sm:$0xff] }
 0x289   :  { %v1578_v12 = vsel %vm1577_vm5, %v1573_v57, inf  ;;  %v1564_v56 = vsel %vm1563_vm6, %v1559_v52, inf  ;;  %v1615_v44 = vcvt.s32.f32 %v1613_v48 }
 0x28a   :  { %1579 = vmin.xlane.f32.xlu1 %v1578_v12  ;;  %1565 = vmin.xlane.f32.xlu0 %v1564_v56  ;;  %v7922_v56 = vld [vmem:[#allocation60_spill] sm:$0xff] }
 0x28b   :  { %v6441_v9 = vpop.xlane.xlu1 %1603  ;;  %v6443_v60 = vpop.xlane.xlu0 %1589  ;;  %v1641_v40 = vand.u32 65535, %v7922_v56 }
 0x28c   :  { %vm1605_vm7 = vcmp.eq.f32.partialorder %v6056_v42, %v6441_v9  ;;  %vm1591_vm8 = vcmp.eq.f32.partialorder %v7921_v33, %v6443_v60  ;;  %v7923_v42 = vld [vmem:[#allocation61_spill] sm:$0xff] }
 0x28d   :  { %v1606_v57 = vsel %vm1605_vm7, %v1601_v20, inf  ;;  %v1592_v52 = vsel %vm1591_vm8, %v1587_v8, inf  ;;  %v1643_v48 = vcvt.s32.f32 %v1641_v40 }
 0x28e   :  { %1607 = vmin.xlane.f32.xlu1 %v1606_v57  ;;  %1593 = vmin.xlane.f32.xlu0 %v1592_v52  ;;  %v7925_v52 = vld [vmem:[#allocation62_spill] sm:$0xff] }
 0x28f   :  { %v6451_v13 = vpop.xlane.xlu1 %1631  ;;  %v6453_v12 = vpop.xlane.xlu0 %1617  ;;  %v1669_v56 = vand.u32 65535, %v7925_v52 }
 0x290   :  { %vm1633_vm9 = vcmp.eq.f32.partialorder %v6072_v50, %v6451_v13  ;;  %vm1619_vm10 = vcmp.eq.f32.partialorder %v7923_v42, %v6453_v12  ;;  %v7926_v50 = vld [vmem:[#allocation63_spill] sm:$0xff] }
 0x291   :  { %v1634_v20 = vsel %vm1633_vm9, %v1629_v47, inf  ;;  %v1620_v8 = vsel %vm1619_vm10, %v1615_v44, inf  ;;  %v1671_v40 = vcvt.s32.f32 %v1669_v56 }
 0x292   :  { %1635 = vmin.xlane.f32.xlu1 %v1634_v20  ;;  %1621 = vmin.xlane.f32.xlu0 %v1620_v8  ;;  %v7929_v8 = vld [vmem:[#allocation64_spill] sm:$0xff] }
 0x293   :  { %v6461_v33 = vpop.xlane.xlu1 %1659  ;;  %v6463_v57 = vpop.xlane.xlu0 %1645  ;;  %v1697_v52 = vand.u32 65535, %v7929_v8 }
 0x294   :  { %7924 = vst [vmem:[#allocation20_spill] sm:$0xff] %v6463_v57  ;;  %vm1661_vm11 = vcmp.eq.f32.partialorder %v6088_v58, %v6461_v33  ;;  %vm1647_vm12 = vcmp.eq.f32.partialorder %v7926_v50, %v6463_v57  ;;  %v7930_v58 = vld [vmem:[#allocation65_spill] sm:$0xff]  ;;  %v7934_v57 = vld [vmem:[#allocation67_spill] sm:$0xff] }
 0x295   :  { %v1662_v47 = vsel %vm1661_vm11, %v1657_v55, inf  ;;  %v1648_v44 = vsel %vm1647_vm12, %v1643_v48, inf  ;;  %v1699_v56 = vcvt.s32.f32 %v1697_v52 }
 0x296   :  { %1663 = vmin.xlane.f32.xlu1 %v1662_v47  ;;  %1649 = vmin.xlane.f32.xlu0 %v1648_v44  ;;  %v7933_v44 = vld [vmem:[#allocation66_spill] sm:$0xff] }
 0x297   :  { %v6471_v42 = vpop.xlane.xlu1 %1687  ;;  %v6473_v20 = vpop.xlane.xlu0 %1673  ;;  %v1725_v8 = vand.u32 65535, %v7933_v44 }
 0x298   :  { %7927 = vst [vmem:[#allocation21_spill] sm:$0xff] %v6471_v42  ;;  %7928 = vst [vmem:[#allocation22_spill] sm:$0xff] %v6473_v20  ;;  %vm1689_vm13 = vcmp.eq.f32.partialorder %v6104_v2, %v6471_v42  ;;  %vm1675_vm14 = vcmp.eq.f32.partialorder %v7930_v58, %v6473_v20  ;;  %v7935_v2 = vld [vmem:[#allocation68_spill] sm:$0xff]  ;;  %v7938_v20 = vld [vmem:[#allocation69_spill] sm:$0xff] }
 0x299   :  { %v1690_v55 = vsel %vm1689_vm13, %v1685_v63, inf  ;;  %v1676_v48 = vsel %vm1675_vm14, %v1671_v40, inf  ;;  %v1727_v52 = vcvt.s32.f32 %v1725_v8  ;;  %v1753_v44 = vand.u32 65535, %v7938_v20  ;;  %v7939_v42 = vld [vmem:[#allocation70_spill] sm:$0xff] }
 0x29a   :  { %1691 = vmin.xlane.f32.xlu1 %v1690_v55  ;;  %1677 = vmin.xlane.f32.xlu0 %v1676_v48  ;;  %v7937_v48 = vld [vmem:[#allocation72_spill] sm:$0xff] }
 0x29b   :  { %v6481_v50 = vpop.xlane.xlu1 %1715  ;;  %v6483_v47 = vpop.xlane.xlu0 %1701  ;;  %v1767_v38 = vand.u32 65535, %v7937_v48  ;;  %v1755_v8 = vcvt.s32.f32 %v1753_v44 }
 0x29c   :  { %7931 = vst [vmem:[#allocation23_spill] sm:$0xff] %v6481_v50  ;;  %7932 = vst [vmem:[#allocation24_spill] sm:$0xff] %v6483_v47  ;;  %vm1717_vm15 = vcmp.eq.f32.partialorder %v7934_v57, %v6481_v50  ;;  %vm1703_vm1 = vcmp.eq.f32.partialorder %v7935_v2, %v6483_v47  ;;  %v7940_v57 = vld [vmem:[#allocation71_spill] sm:$0xff]  ;;  %v7943_v47 = vld [vmem:[#allocation73_spill] sm:$0xff] }
 0x29d   :  { %v1718_v63 = vsel %vm1717_vm15, %v1713_v7, inf  ;;  %v1704_v40 = vsel %vm1703_vm1, %v1699_v56, inf  ;;  %v1769_v23 = vcvt.s32.f32 %v1767_v38  ;;  %v1781_v20 = vand.u32 65535, %v7943_v47  ;;  %v7944_v50 = vld [vmem:[#allocation8_spill] sm:$0xff] }
 0x29e   :  { %1719 = vmin.xlane.f32.xlu1 %v1718_v63  ;;  %1705 = vmin.xlane.f32.xlu0 %v1704_v40  ;;  %v7942_v40 = vld [vmem:[#allocation75_spill] sm:$0xff] }
 0x29f   :  { %v6491_v58 = vpop.xlane.xlu1 %1743  ;;  %v6493_v55 = vpop.xlane.xlu0 %1729  ;;  %v1795_v48 = vand.u32 65535, %v7942_v40  ;;  %v1783_v44 = vcvt.s32.f32 %v1781_v20  ;;  %v7947_v40 = vld [vmem:[#allocation9_spill] sm:$0xff] }
 0x2a0   :  { %7936 = vst [vmem:[#allocation25_spill] sm:$0xff] %v6493_v55  ;;  %vm1745_vm3 = vcmp.eq.f32.partialorder %v7939_v42, %v6491_v58  ;;  %vm1731_vm4 = vcmp.eq.f32.partialorder %v7940_v57, %v6493_v55  ;;  %v7945_v42 = vld [vmem:[#allocation74_spill] sm:$0xff]  ;;  %v1809_v47 = vand.u32 65535, %v7947_v40 }
 0x2a1   :  { %v1746_v7 = vsel %vm1745_vm3, %v1741_v15, inf  ;;  %v1732_v56 = vsel %vm1731_vm4, %v1727_v52, inf  ;;  %v1797_v38 = vcvt.s32.f32 %v1795_v48  ;;  %v7948_v55 = vld [vmem:[#allocation10_spill] sm:$0xff] }
 0x2a2   :  { %1747 = vmin.xlane.f32.xlu1 %v1746_v7  ;;  %1733 = vmin.xlane.f32.xlu0 %v1732_v56  ;;  %v1823_v56 = vand.u32 65535, %v6174_v39  ;;  %v1811_v20 = vcvt.s32.f32 %v1809_v47  ;;  %v1851_v39 = vand.u32 65535, %v6190_v21  ;;  %v1879_v21 = vand.u32 65535, %v6206_v14 }
 0x2a3   :  { %v6501_v2 = vpop.xlane.xlu1 %1771  ;;  %v6503_v63 = vpop.xlane.xlu0 %1757  ;;  %v1907_v14 = vand.u32 65535, %v6222_v54 }
 0x2a4   :  { %7941 = vst [vmem:[#allocation26_spill] sm:$0xff] %v6503_v63  ;;  %vm1773_vm5 = vcmp.eq.f32.partialorder %v7944_v50, %v6501_v2  ;;  %vm1759_vm6 = vcmp.eq.f32.partialorder %v7945_v42, %v6503_v63  ;;  %v7949_v50 = vld [vmem:[#allocation76_spill] sm:$0xff]  ;;  %v1825_v48 = vcvt.s32.f32 %v1823_v56  ;;  %v1853_v56 = vcvt.s32.f32 %v1851_v39 }
 0x2a5   :  { %v1774_v15 = vsel %vm1773_vm5, %v1769_v23, inf  ;;  %v1760_v52 = vsel %vm1759_vm6, %v1755_v8, inf  ;;  %v7952_v63 = vld [vmem:[#allocation12_spill] sm:$0xff]  ;;  %v1881_v39 = vcvt.s32.f32 %v1879_v21  ;;  %v1909_v21 = vcvt.s32.f32 %v1907_v14 }
 0x2a6   :  { %1775 = vmin.xlane.f32.xlu1 %v1774_v15  ;;  %1761 = vmin.xlane.f32.xlu0 %v1760_v52  ;;  %v7951_v52 = vld [vmem:[#allocation11_spill] sm:$0xff] }
 0x2a7   :  { %v6511_v57 = vpop.xlane.xlu1 %1799  ;;  %v6513_v7 = vpop.xlane.xlu0 %1785  ;;  %v1837_v40 = vand.u32 65535, %v7951_v52 }
 0x2a8   :  { %7946 = vst [vmem:[#allocation27_spill] sm:$0xff] %v6513_v7  ;;  %vm1801_vm7 = vcmp.eq.f32.partialorder %v7948_v55, %v6511_v57  ;;  %vm1787_vm8 = vcmp.eq.f32.partialorder %v7949_v50, %v6513_v7  ;;  %v7953_v55 = vld [vmem:[#allocation77_spill] sm:$0xff] }
 0x2a9   :  { %v1802_v23 = vsel %vm1801_vm7, %v1797_v38, inf  ;;  %v1788_v8 = vsel %vm1787_vm8, %v1783_v44, inf  ;;  %v1839_v47 = vcvt.s32.f32 %v1837_v40  ;;  %v7957_v7 = vld [vmem:[#allocation13_spill] sm:$0xff] }
 0x2aa   :  { %1803 = vmin.xlane.f32.xlu1 %v1802_v23  ;;  %1789 = vmin.xlane.f32.xlu0 %v1788_v8  ;;  %v7956_v8 = vld [vmem:[#allocation78_spill] sm:$0xff] }
 0x2ab   :  { %v6521_v42 = vpop.xlane.xlu1 %1827  ;;  %v6523_v15 = vpop.xlane.xlu0 %1813  ;;  %v1865_v52 = vand.u32 65535, %v7956_v8 }
 0x2ac   :  { %7950 = vst [vmem:[#allocation28_spill] sm:$0xff] %v6523_v15  ;;  %vm1829_vm9 = vcmp.eq.f32.partialorder %v7952_v63, %v6521_v42  ;;  %vm1815_vm10 = vcmp.eq.f32.partialorder %v7953_v55, %v6523_v15  ;;  %v7958_v63 = vld [vmem:[#allocation79_spill] sm:$0xff]  ;;  %v7961_v15 = vld [vmem:[#allocation80_spill] sm:$0xff] }
 0x2ad   :  { %v1830_v38 = vsel %vm1829_vm9, %v1825_v48, inf  ;;  %v1816_v44 = vsel %vm1815_vm10, %v1811_v20, inf  ;;  %v1867_v40 = vcvt.s32.f32 %v1865_v52 }
 0x2ae   :  { %1831 = vmin.xlane.f32.xlu1 %v1830_v38  ;;  %1817 = vmin.xlane.f32.xlu0 %v1816_v44  ;;  %v7960_v44 = vld [vmem:[#allocation14_spill] sm:$0xff] }
 0x2af   :  { %v6531_v50 = vpop.xlane.xlu1 %1855  ;;  %v6533_v23 = vpop.xlane.xlu0 %1841  ;;  %v1893_v8 = vand.u32 65535, %v7960_v44 }
 0x2b0   :  { %7954 = vst [vmem:[#allocation29_spill] sm:$0xff] %v6531_v50  ;;  %7955 = vst [vmem:[#allocation30_spill] sm:$0xff] %v6533_v23  ;;  %vm1857_vm11 = vcmp.eq.f32.partialorder %v7957_v7, %v6531_v50  ;;  %vm1843_vm12 = vcmp.eq.f32.partialorder %v7958_v63, %v6533_v23  ;;  %v7962_v7 = vld [vmem:[#allocation81_spill] sm:$0xff]  ;;  %v7966_v23 = vld [vmem:[#allocation15_spill] sm:$0xff] }
 0x2b1   :  { %v1858_v48 = vsel %vm1857_vm11, %v1853_v56, inf  ;;  %v1844_v20 = vsel %vm1843_vm12, %v1839_v47, inf  ;;  %v1895_v52 = vcvt.s32.f32 %v1893_v8  ;;  %v1921_v44 = vand.u32 65535, %v7966_v23  ;;  %v7967_v50 = vld [vmem:[#allocation16_spill] sm:$0xff]  ;;  %v7971_v23 = vld [vmem:[#allocation85_spill] sm:$0xff] }
 0x2b2   :  { %1859 = vmin.xlane.f32.xlu1 %v1858_v48  ;;  %1845 = vmin.xlane.f32.xlu0 %v1844_v20  ;;  %v7965_v20 = vld [vmem:[#allocation83_spill] sm:$0xff] }
 0x2b3   :  { %v6541_v55 = vpop.xlane.xlu1 %1883  ;;  %v6543_v38 = vpop.xlane.xlu0 %1869  ;;  %v1935_v54 = vand.u32 65535, %v7965_v20  ;;  %v1923_v8 = vcvt.s32.f32 %v1921_v44 }
 0x2b4   :  { %7959 = vst [vmem:[#allocation31_spill] sm:$0xff] %v6543_v38  ;;  %vm1885_vm13 = vcmp.eq.f32.partialorder %v7961_v15, %v6541_v55  ;;  %vm1871_vm14 = vcmp.eq.f32.partialorder %v7962_v7, %v6543_v38  ;;  %v7968_v15 = vld [vmem:[#allocation82_spill] sm:$0xff] }
 0x2b5   :  { %v1886_v56 = vsel %vm1885_vm13, %v1881_v39, inf  ;;  %v1872_v47 = vsel %vm1871_vm14, %v1867_v40, inf  ;;  %v1937_v14 = vcvt.s32.f32 %v1935_v54 }
 0x2b6   :  { %1887 = vmin.xlane.f32.xlu1 %v1886_v56  ;;  %1873 = vmin.xlane.f32.xlu0 %v1872_v47  ;;  %v7970_v47 = vld [vmem:[#allocation84_spill] sm:$0xff] }
 0x2b7   :  { %v6551_v63 = vpop.xlane.xlu1 %1911  ;;  %v6553_v48 = vpop.xlane.xlu0 %1897 }
 0x2b8   :  { %7963 = vst [vmem:[#allocation32_spill] sm:$0xff] %v6551_v63  ;;  %7964 = vst [vmem:[#allocation33_spill] sm:$0xff] %v6553_v48  ;;  %vm1913_vm15 = vcmp.eq.f32.partialorder %v7967_v50, %v6551_v63  ;;  %vm1899_vm1 = vcmp.eq.f32.partialorder %v7968_v15, %v6553_v48  ;;  %v1064_v48 = vcvt.f32.s32 %v6259_v32  ;;  %v1120_v32 = vcvt.f32.s32 %v6275_v18 }
 0x2b9   :  { %v1914_v39 = vsel %vm1913_vm15, %v1909_v21, inf  ;;  %v1900_v40 = vsel %vm1899_vm1, %v1895_v52, inf  ;;  %v1078_v21 = vcvt.f32.s32 %v6252_v46  ;;  %v7972_v52 = vld [vmem:[#allocation18_spill] sm:$0xff]  ;;  %v1148_v18 = vcvt.f32.s32 %v6285_v43 }
 0x2ba   :  { %1915 = vmin.xlane.f32.xlu1 %v1914_v39  ;;  %1901 = vmin.xlane.f32.xlu0 %v1900_v40  ;;  %v1106_v15 = vcvt.f32.s32 %v7972_v52 }
 0x2bb   :  { %v6561_v7 = vpop.xlane.xlu1 %1939  ;;  %v6563_v56 = vpop.xlane.xlu0 %1925  ;;  %v1079_v40 = vshll.u32 %v1078_v21, 16 }
 0x2bc   :  { %7969 = vst [vmem:[#allocation34_spill] sm:$0xff] %v6561_v7  ;;  %vm1941_vm3 = vcmp.eq.f32.partialorder %v7970_v47, %v6561_v7  ;;  %vm1927_vm4 = vcmp.eq.f32.partialorder %v7971_v23, %v6563_v56  ;;  %v1107_v63 = vshll.u32 %v1106_v15, 16  ;;  %v1065_v7 = vshll.u32 %v1064_v48, 16 }
 0x2bd   :  { %v1942_v50 = vsel %vm1941_vm3, %v1937_v14, inf  ;;  %v1928_v20 = vsel %vm1927_vm4, %v1923_v8, inf  ;;  %v1092_v23 = vcvt.f32.s32 %v6267_v17  ;;  %v5100_v17 = vmov 1.0  }
 0x2be   :  { %1943 = vmin.xlane.f32.xlu1 %v1942_v50  ;;  %1929 = vmin.xlane.f32.xlu0 %v1928_v20  ;;  %v1134_v20 = vcvt.f32.s32 %v6273_v28 }
 0x2bf   :  { %v1093_v21 = vshll.u32 %v1092_v23, 16 }
 0x2c0   :  { %v1135_v28 = vshll.u32 %v1134_v20, 16 }
 0x2cb   :  { %v1076_v39 = vpop.xlane.xlu1 %1075 }
 0x2cc   :  { %v1077_v54 = vcvt.f32.s32 %v1076_v39  ;;  %v7973_v39 = vld [vmem:[#allocation17_spill] sm:$0xff] }
 0x2ce   :  { %v1080_v44 = vadd.s32 %v1079_v40, %v1077_v54  ;;  %v1121_v54 = vshll.u32 %v1120_v32, 16 }
 0x2cf   :  { %v1104_v38 = vpop.xlane.xlu1 %1103  ;;  %v1062_v47 = vpop.xlane.xlu0 %1061 }
 0x2d0   :  { %2662 = vst.msk [vmem:[#allocation3 + $0x8] sm:$0xff] %vm2596_vm2, %v1080_v44  ;;  %v1105_v14 = vcvt.f32.s32 %v1104_v38  ;;  %v1063_v8 = vcvt.f32.s32 %v1062_v47  ;;  %vm1950_vm6 = vcmp.eq.s32.totalorder %v7973_v39, %v1080_v44 }
 0x2d2   :  { %v1108_v50 = vadd.s32 %v1107_v63, %v1105_v14  ;;  %v1066_v46 = vadd.s32 %v1065_v7, %v1063_v8  ;;  %v1162_v63 = vcvt.f32.s32 %v6283_v59  ;;  %v1149_v14 = vshll.u32 %v1148_v18, 16 }
 0x2d3   :  { %v1090_v52 = vpop.xlane.xlu0 %1089  ;;  %v1190_v8 = vcvt.f32.s32 %v6293_v29  ;;  %v1204_v18 = vcvt.f32.s32 %v6305_v3 }
 0x2d4   :  { %2664 = vst.msk [vmem:[#allocation3 + $0x18] sm:$0xff] %vm2596_vm2, %v1108_v50  ;;  %v1091_v15 = vcvt.f32.s32 %v1090_v52  ;;  %vm1949_vm5 = vcmp.eq.s32.totalorder %v7973_v39, %v1066_v46  ;;  %2661 = vst.msk [vmem:[#allocation3] sm:$0xff] %vm2596_vm2, %v1066_v46  ;;  %vm1952_vm8 = vcmp.eq.s32.totalorder %v7973_v39, %v1108_v50  ;;  %v1163_v23 = vshll.u32 %v1162_v63, 16 }
 0x2d5   :  { %4832 = vmatprep.mubr.msk.f32.mxu1 %vm1949_vm5, %v5100_v17  ;;  %v1176_v46 = vcvt.f32.s32 %v6295_v10  ;;  %v1218_v63 = vcvt.f32.s32 %v6303_v11 }
 0x2d6   :  { %v1094_v38 = vadd.s32 %v1093_v21, %v1091_v15  ;;  %4833 = vmatmul.mubr.msk.f32.vlgmr.msra.gmra.mrb[0].mxu1 %vm1950_vm6, %v5100_v17 }
 0x2d7   :  { %v3886_v48 = vld [vmem:[#allocation3 + $0x8] sm:$0xff]  ;;  %v1132_v7 = vpop.xlane.xlu1 %1131  ;;  %v1118_v40 = vpop.xlane.xlu0 %1117 }
 0x2d8   :  { %3951 = vst.msk [vmem:[%s7673_s4 + $0x8] sm:$0xff] %vm2596_vm2, %v3886_v48  ;;  %2663 = vst.msk [vmem:[#allocation3 + $0x10] sm:$0xff] %vm2596_vm2, %v1094_v38  ;;  %v1133_v44 = vcvt.f32.s32 %v1132_v7  ;;  %v1119_v47 = vcvt.f32.s32 %v1118_v40  ;;  %vm1951_vm7 = vcmp.eq.s32.totalorder %v7973_v39, %v1094_v38  ;;  %v1191_v38 = vshll.u32 %v1190_v8, 16 }
 0x2d9   :  { %4835 = vmatprep.mubr.msk.f32.mxu1 %vm1951_vm7, %v5100_v17 }
 0x2da   :  { %v1136_v59 = vadd.s32 %v1135_v28, %v1133_v44  ;;  %v1122_v43 = vadd.s32 %v1121_v54, %v1119_v47  ;;  %4836 = vmatmul.mubr.msk.f32.gmra.mrb[2].mxu1 %vm1952_vm8, %v5100_v17  ;;  %v1177_v28 = vshll.u32 %v1176_v46, 16  ;;  %v1219_v47 = vshll.u32 %v1218_v63, 16 }
 0x2db   :  { %v3888_v20 = vld [vmem:[#allocation3 + $0x18] sm:$0xff]  ;;  %v3885_v52 = vld [vmem:[#allocation3] sm:$0xff]  ;;  %v1160_v21 = vpop.xlane.xlu1 %1159  ;;  %v1146_v32 = vpop.xlane.xlu0 %1145 }
 0x2dc   :  { %3953 = vst.msk [vmem:[%s7673_s4 + $0x18] sm:$0xff] %vm2596_vm2, %v3888_v20  ;;  %3950 = vst.msk [vmem:[%s7673_s4] sm:$0xff] %vm2596_vm2, %v3885_v52  ;;  %v1161_v29 = vcvt.f32.s32 %v1160_v21  ;;  %v1147_v10 = vcvt.f32.s32 %v1146_v32  ;;  %vm1953_vm9 = vcmp.eq.s32.totalorder %v7973_v39, %v1122_v43  ;;  %vm1954_vm10 = vcmp.eq.s32.totalorder %v7973_v39, %v1136_v59 }
 0x2dd   :  { %2666 = vst.msk [vmem:[#allocation3 + $0x28] sm:$0xff] %vm2596_vm2, %v1136_v59  ;;  %2665 = vst.msk [vmem:[#allocation3 + $0x20] sm:$0xff] %vm2596_vm2, %v1122_v43  ;;  %4838 = vmatprep.mubr.msk.f32.mxu1 %vm1953_vm9, %v5100_v17  ;;  %v1205_v59 = vshll.u32 %v1204_v18, 16  ;;  %v1246_v43 = vcvt.f32.s32 %v6313_v51 }
 0x2de   :  { %v1164_v50 = vadd.s32 %v1163_v23, %v1161_v29  ;;  %v1150_v15 = vadd.s32 %v1149_v14, %v1147_v10  ;;  %4839 = vmatmul.mubr.msk.f32.gmra.mrb[4].mxu1 %vm1954_vm10, %v5100_v17  ;;  %v1232_v23 = vcvt.f32.s32 %v6315_v19  ;;  %v1274_v10 = vcvt.f32.s32 %v6323_v22 }
 0x2df   :  { %v3887_v48 = vld [vmem:[#allocation3 + $0x10] sm:$0xff]  ;;  %v1188_v7 = vpop.xlane.xlu1 %1187  ;;  %v1174_v40 = vpop.xlane.xlu0 %1173  ;;  %v1247_v32 = vshll.u32 %v1246_v43, 16 }
 0x2e0   :  { %3952 = vst.msk [vmem:[%s7673_s4 + $0x10] sm:$0xff] %vm2596_vm2, %v3887_v48  ;;  %2668 = vst.msk [vmem:[#allocation3 + $0x38] sm:$0xff] %vm2596_vm2, %v1164_v50  ;;  %v1189_v54 = vcvt.f32.s32 %v1188_v7  ;;  %v1175_v44 = vcvt.f32.s32 %v1174_v40  ;;  %vm1955_vm11 = vcmp.eq.s32.totalorder %v7973_v39, %v1150_v15  ;;  %vm1956_vm12 = vcmp.eq.s32.totalorder %v7973_v39, %v1164_v50 }
 0x2e1   :  { %2667 = vst.msk [vmem:[#allocation3 + $0x30] sm:$0xff] %vm2596_vm2, %v1150_v15  ;;  %4841 = vmatprep.mubr.msk.f32.mxu1 %vm1955_vm11, %v5100_v17  ;;  %v1233_v29 = vshll.u32 %v1232_v23, 16  ;;  %v1260_v50 = vcvt.f32.s32 %v6325_v30  ;;  %v1275_v7 = vshll.u32 %v1274_v10, 16 }
 0x2e2   :  { %v1192_v11 = vadd.s32 %v1191_v38, %v1189_v54  ;;  %v1178_v3 = vadd.s32 %v1177_v28, %v1175_v44  ;;  %4842 = vmatmul.mubr.msk.f32.gmra.mrb[6].mxu1 %vm1956_vm12, %v5100_v17  ;;  %v1302_v54 = vcvt.f32.s32 %v6333_v24  ;;  %v1288_v44 = vcvt.f32.s32 %v6335_v25 }
 0x2e3   :  { %v1216_v46 = vpop.xlane.xlu1 %1215  ;;  %v1202_v20 = vpop.xlane.xlu0 %1201  ;;  %v1261_v40 = vshll.u32 %v1260_v50, 16 }
 0x2e4   :  { %v3890_v14 = vld [vmem:[#allocation3 + $0x28] sm:$0xff]  ;;  %v3889_v8 = vld [vmem:[#allocation3 + $0x20] sm:$0xff]  ;;  %2670 = vst.msk [vmem:[#allocation3 + $0x48] sm:$0xff] %vm2596_vm2, %v1192_v11  ;;  %2669 = vst.msk [vmem:[#allocation3 + $0x40] sm:$0xff] %vm2596_vm2, %v1178_v3  ;;  %v1217_v51 = vcvt.f32.s32 %v1216_v46  ;;  %v1203_v19 = vcvt.f32.s32 %v1202_v20  ;;  %vm1957_vm13 = vcmp.eq.s32.totalorder %v7973_v39, %v1178_v3  ;;  %vm1958_vm14 = vcmp.eq.s32.totalorder %v7973_v39, %v1192_v11 }
 0x2e5   :  { %3955 = vst.msk [vmem:[%s7673_s4 + $0x28] sm:$0xff] %vm2596_vm2, %v3890_v14  ;;  %3954 = vst.msk [vmem:[%s7673_s4 + $0x20] sm:$0xff] %vm2596_vm2, %v3889_v8  ;;  %4844 = vmatprep.mubr.msk.f32.mxu1 %vm1957_vm13, %v5100_v17  ;;  %v1303_v14 = vshll.u32 %v1302_v54, 16  ;;  %v1289_v8 = vshll.u32 %v1288_v44, 16  ;;  %v1330_v46 = vcvt.f32.s32 %v6343_v26  ;;  %v1316_v20 = vcvt.f32.s32 %v6345_v27 }
 0x2e6   :  { %v1220_v52 = vadd.s32 %v1219_v47, %v1217_v51  ;;  %v1206_v21 = vadd.s32 %v1205_v59, %v1203_v19  ;;  %4845 = vmatmul.mubr.msk.f32.gmra.mrb[8].mxu1 %vm1958_vm14, %v5100_v17  ;;  %v1386_v54 = vcvt.f32.s32 %v6363_v5  ;;  %v1372_v44 = vcvt.f32.s32 %v6365_v31 }
 0x2e7   :  { %v3892_v15 = vld [vmem:[#allocation3 + $0x38] sm:$0xff]  ;;  %v1244_v28 = vpop.xlane.xlu1 %1243  ;;  %v1230_v63 = vpop.xlane.xlu0 %1229  ;;  %v1331_v10 = vshll.u32 %v1330_v46, 16  ;;  %v1317_v50 = vshll.u32 %v1316_v20, 16 }
 0x2e8   :  { %v3891_v38 = vld [vmem:[#allocation3 + $0x30] sm:$0xff]  ;;  %3957 = vst.msk [vmem:[%s7673_s4 + $0x38] sm:$0xff] %vm2596_vm2, %v3892_v15  ;;  %2672 = vst.msk [vmem:[#allocation3 + $0x58] sm:$0xff] %vm2596_vm2, %v1220_v52  ;;  %v1245_v22 = vcvt.f32.s32 %v1244_v28  ;;  %v1231_v30 = vcvt.f32.s32 %v1230_v63  ;;  %vm1959_vm15 = vcmp.eq.s32.totalorder %v7973_v39, %v1206_v21  ;;  %vm1960_vm1 = vcmp.eq.s32.totalorder %v7973_v39, %v1220_v52 }
 0x2e9   :  { %3956 = vst.msk [vmem:[%s7673_s4 + $0x30] sm:$0xff] %vm2596_vm2, %v3891_v38  ;;  %2671 = vst.msk [vmem:[#allocation3 + $0x50] sm:$0xff] %vm2596_vm2, %v1206_v21  ;;  %4847 = vmatprep.mubr.msk.f32.mxu1 %vm1959_vm15, %v5100_v17  ;;  %v1358_v15 = vcvt.f32.s32 %v6353_v6  ;;  %v1344_v38 = vcvt.f32.s32 %v6355_v34 }
 0x2ea   :  { %v1248_v18 = vadd.s32 %v1247_v32, %v1245_v22  ;;  %v1234_v48 = vadd.s32 %v1233_v29, %v1231_v30  ;;  %4848 = vmatmul.mubr.msk.f32.gmra.mrb[10].mxu1 %vm1960_vm1, %v5100_v17 }
 0x2eb   :  { %v3894_v11 = vld [vmem:[#allocation3 + $0x48] sm:$0xff]  ;;  %v3893_v3 = vld [vmem:[#allocation3 + $0x40] sm:$0xff]  ;;  %v1272_v47 = vpop.xlane.xlu1 %1271  ;;  %v1258_v59 = vpop.xlane.xlu0 %1257 }
 0x2ec   :  { %3959 = vst.msk [vmem:[%s7673_s4 + $0x48] sm:$0xff] %vm2596_vm2, %v3894_v11  ;;  %3958 = vst.msk [vmem:[%s7673_s4 + $0x40] sm:$0xff] %vm2596_vm2, %v3893_v3  ;;  %v1273_v24 = vcvt.f32.s32 %v1272_v47  ;;  %v1259_v25 = vcvt.f32.s32 %v1258_v59  ;;  %vm1961_vm3 = vcmp.eq.s32.totalorder %v7973_v39, %v1234_v48  ;;  %vm1962_vm4 = vcmp.eq.s32.totalorder %v7973_v39, %v1248_v18 }
 0x2ed   :  { %2674 = vst.msk [vmem:[#allocation3 + $0x68] sm:$0xff] %vm2596_vm2, %v1248_v18  ;;  %2673 = vst.msk [vmem:[#allocation3 + $0x60] sm:$0xff] %vm2596_vm2, %v1234_v48  ;;  %4850 = vmatprep.mubr.msk.f32.mxu1 %vm1961_vm3, %v5100_v17 }
 0x2ee   :  { %v1276_v43 = vadd.s32 %v1275_v7, %v1273_v24  ;;  %v1262_v23 = vadd.s32 %v1261_v40, %v1259_v25  ;;  %4851 = vmatmul.mubr.msk.f32.gmra.mrb[12].mxu1 %vm1962_vm4, %v5100_v17  ;;  %v1359_v7 = vshll.u32 %v1358_v15, 16  ;;  %v1345_v40 = vshll.u32 %v1344_v38, 16 }
 0x2ef   :  { %v3896_v51 = vld [vmem:[#allocation3 + $0x58] sm:$0xff]  ;;  %v1300_v52 = vpop.xlane.xlu1 %1299  ;;  %v1286_v21 = vpop.xlane.xlu0 %1285 }
 0x2f0   :  { %v3895_v19 = vld [vmem:[#allocation3 + $0x50] sm:$0xff]  ;;  %3961 = vst.msk [vmem:[%s7673_s4 + $0x58] sm:$0xff] %vm2596_vm2, %v3896_v51  ;;  %2676 = vst.msk [vmem:[#allocation3 + $0x78] sm:$0xff] %vm2596_vm2, %v1276_v43  ;;  %v1301_v26 = vcvt.f32.s32 %v1300_v52  ;;  %v1287_v27 = vcvt.f32.s32 %v1286_v21  ;;  %vm1963_vm5 = vcmp.eq.s32.totalorder %v7973_v39, %v1262_v23  ;;  %vm1964_vm6 = vcmp.eq.s32.totalorder %v7973_v39, %v1276_v43 }
 0x2f1   :  { %3960 = vst.msk [vmem:[%s7673_s4 + $0x50] sm:$0xff] %vm2596_vm2, %v3895_v19  ;;  %2675 = vst.msk [vmem:[#allocation3 + $0x70] sm:$0xff] %vm2596_vm2, %v1262_v23  ;;  %4853 = vmatprep.mubr.msk.f32.mxu1 %vm1963_vm5, %v5100_v17  ;;  %v1387_v43 = vshll.u32 %v1386_v54, 16  ;;  %v1373_v23 = vshll.u32 %v1372_v44, 16 }
 0x2f2   :  { %v1304_v32 = vadd.s32 %v1303_v14, %v1301_v26  ;;  %v1290_v29 = vadd.s32 %v1289_v8, %v1287_v27  ;;  %4854 = vmatmul.mubr.msk.f32.gmra.mrb[14].mxu1 %vm1964_vm6, %v5100_v17  ;;  %v1414_v14 = vcvt.f32.s32 %v6373_v62  ;;  %v1400_v8 = vcvt.f32.s32 %v6375_v41 }
 0x2f3   :  { %v1328_v22 = vpop.xlane.xlu1 %1327  ;;  %v1314_v30 = vpop.xlane.xlu0 %1313 }
 0x2f4   :  { %v3898_v28 = vld [vmem:[#allocation3 + $0x68] sm:$0xff]  ;;  %v3897_v63 = vld [vmem:[#allocation3 + $0x60] sm:$0xff]  ;;  %2678 = vst.msk [vmem:[#allocation3 + $0x88] sm:$0xff] %vm2596_vm2, %v1304_v32  ;;  %2677 = vst.msk [vmem:[#allocation3 + $0x80] sm:$0xff] %vm2596_vm2, %v1290_v29  ;;  %v1329_v6 = vcvt.f32.s32 %v1328_v22  ;;  %v1315_v34 = vcvt.f32.s32 %v1314_v30  ;;  %vm1965_vm7 = vcmp.eq.s32.totalorder %v7973_v39, %v1290_v29  ;;  %vm1966_vm8 = vcmp.eq.s32.totalorder %v7973_v39, %v1304_v32 }
 0x2f5   :  { %3963 = vst.msk [vmem:[%s7673_s4 + $0x68] sm:$0xff] %vm2596_vm2, %v3898_v28  ;;  %3962 = vst.msk [vmem:[%s7673_s4 + $0x60] sm:$0xff] %vm2596_vm2, %v3897_v63  ;;  %4856 = vmatprep.mubr.msk.f32.mxu1 %vm1965_vm7, %v5100_v17  ;;  %v1415_v26 = vshll.u32 %v1414_v14, 16  ;;  %v1401_v27 = vshll.u32 %v1400_v8, 16  ;;  %v1442_v32 = vcvt.f32.s32 %v6383_v35  ;;  %v7974_v29 = vld [vmem:[#allocation19_spill] sm:$0xff] }
 0x2f6   :  { %v1332_v18 = vadd.s32 %v1331_v10, %v1329_v6  ;;  %v1318_v48 = vadd.s32 %v1317_v50, %v1315_v34  ;;  %4857 = vmatmul.mubr.msk.f32.gmra.mrb[16].mxu1 %vm1966_vm8, %v5100_v17  ;;  %v1428_v10 = vcvt.f32.s32 %v7974_v29 }
 0x2f7   :  { %v3900_v11 = vld [vmem:[#allocation3 + $0x78] sm:$0xff]  ;;  %v1356_v47 = vpop.xlane.xlu1 %1355  ;;  %v1342_v59 = vpop.xlane.xlu0 %1341  ;;  %v1443_v6 = vshll.u32 %v1442_v32, 16 }
 0x2f8   :  { %v3899_v3 = vld [vmem:[#allocation3 + $0x70] sm:$0xff]  ;;  %3965 = vst.msk [vmem:[%s7673_s4 + $0x78] sm:$0xff] %vm2596_vm2, %v3900_v11  ;;  %2680 = vst.msk [vmem:[#allocation3 + $0x98] sm:$0xff] %vm2596_vm2, %v1332_v18  ;;  %v1357_v5 = vcvt.f32.s32 %v1356_v47  ;;  %v1343_v31 = vcvt.f32.s32 %v1342_v59  ;;  %vm1967_vm9 = vcmp.eq.s32.totalorder %v7973_v39, %v1318_v48  ;;  %vm1968_vm10 = vcmp.eq.s32.totalorder %v7973_v39, %v1332_v18 }
 0x2f9   :  { %3964 = vst.msk [vmem:[%s7673_s4 + $0x70] sm:$0xff] %vm2596_vm2, %v3899_v3  ;;  %2679 = vst.msk [vmem:[#allocation3 + $0x90] sm:$0xff] %vm2596_vm2, %v1318_v48  ;;  %4859 = vmatprep.mubr.msk.f32.mxu1 %vm1967_vm9, %v5100_v17  ;;  %v1429_v34 = vshll.u32 %v1428_v10, 16  ;;  %v1470_v18 = vcvt.f32.s32 %v6393_v37  ;;  %v1456_v48 = vcvt.f32.s32 %v6395_v49  ;;  %v1554_v10 = vcvt.f32.s32 %v6421_v1 }
 0x2fa   :  { %v1360_v24 = vadd.s32 %v1359_v7, %v1357_v5  ;;  %v1346_v25 = vadd.s32 %v1345_v40, %v1343_v31  ;;  %4860 = vmatmul.mubr.msk.f32.gmra.mrb[18].mxu1 %vm1968_vm10, %v5100_v17  ;;  %v1498_v5 = vcvt.f32.s32 %v6403_v36  ;;  %v1484_v31 = vcvt.f32.s32 %v6405_v53 }
 0x2fb   :  { %v3902_v46 = vld [vmem:[#allocation3 + $0x88] sm:$0xff]  ;;  %v3901_v20 = vld [vmem:[#allocation3 + $0x80] sm:$0xff]  ;;  %v1384_v51 = vpop.xlane.xlu1 %1383  ;;  %v1370_v19 = vpop.xlane.xlu0 %1369  ;;  %v1471_v47 = vshll.u32 %v1470_v18, 16  ;;  %v1457_v59 = vshll.u32 %v1456_v48, 16  ;;  %v1568_v18 = vcvt.f32.s32 %v6433_v4 }
 0x2fc   :  { %3967 = vst.msk [vmem:[%s7673_s4 + $0x88] sm:$0xff] %vm2596_vm2, %v3902_v46  ;;  %3966 = vst.msk [vmem:[%s7673_s4 + $0x80] sm:$0xff] %vm2596_vm2, %v3901_v20  ;;  %v1385_v62 = vcvt.f32.s32 %v1384_v51  ;;  %v1371_v41 = vcvt.f32.s32 %v1370_v19  ;;  %vm1969_vm11 = vcmp.eq.s32.totalorder %v7973_v39, %v1346_v25  ;;  %vm1970_vm12 = vcmp.eq.s32.totalorder %v7973_v39, %v1360_v24 }
 0x2fd   :  { %2682 = vst.msk [vmem:[#allocation3 + $0xa8] sm:$0xff] %vm2596_vm2, %v1360_v24  ;;  %2681 = vst.msk [vmem:[#allocation3 + $0xa0] sm:$0xff] %vm2596_vm2, %v1346_v25  ;;  %4862 = vmatprep.mubr.msk.f32.mxu1 %vm1969_vm11, %v5100_v17  ;;  %v1499_v46 = vshll.u32 %v1498_v5, 16  ;;  %v1485_v20 = vshll.u32 %v1484_v31, 16  ;;  %v1526_v51 = vcvt.f32.s32 %v6411_v61  ;;  %v1512_v19 = vcvt.f32.s32 %v6413_v16 }
 0x2fe   :  { %v1388_v52 = vadd.s32 %v1387_v43, %v1385_v62  ;;  %v1374_v21 = vadd.s32 %v1373_v23, %v1371_v41  ;;  %4863 = vmatmul.mubr.msk.f32.gmra.mrb[20].mxu1 %vm1970_vm12, %v5100_v17 }
 0x2ff   :  { %v3904_v50 = vld [vmem:[#allocation3 + $0x98] sm:$0xff]  ;;  %v1412_v38 = vpop.xlane.xlu1 %1411  ;;  %v1398_v28 = vpop.xlane.xlu0 %1397  ;;  %v1527_v32 = vshll.u32 %v1526_v51, 16  ;;  %v1513_v29 = vshll.u32 %v1512_v19, 16 }
 0x300   :  { %v3903_v15 = vld [vmem:[#allocation3 + $0x90] sm:$0xff]  ;;  %3969 = vst.msk [vmem:[%s7673_s4 + $0x98] sm:$0xff] %vm2596_vm2, %v3904_v50  ;;  %2684 = vst.msk [vmem:[#allocation3 + $0xb8] sm:$0xff] %vm2596_vm2, %v1388_v52  ;;  %v1413_v35 = vcvt.f32.s32 %v1412_v38  ;;  %v1399_v63 = vcvt.f32.s32 %v1398_v28  ;;  %vm1971_vm13 = vcmp.eq.s32.totalorder %v7973_v39, %v1374_v21  ;;  %vm1972_vm14 = vcmp.eq.s32.totalorder %v7973_v39, %v1388_v52 }
 0x301   :  { %3968 = vst.msk [vmem:[%s7673_s4 + $0x90] sm:$0xff] %vm2596_vm2, %v3903_v15  ;;  %2683 = vst.msk [vmem:[#allocation3 + $0xb0] sm:$0xff] %vm2596_vm2, %v1374_v21  ;;  %4865 = vmatprep.mubr.msk.f32.mxu1 %vm1971_vm13, %v5100_v17  ;;  %v1540_v50 = vcvt.f32.s32 %v6423_v0 }
 0x302   :  { %v1416_v22 = vadd.s32 %v1415_v26, %v1413_v35  ;;  %v1402_v30 = vadd.s32 %v1401_v27, %v1399_v63  ;;  %4866 = vmatmul.mubr.msk.f32.gmra.mrb[22].mxu1 %vm1972_vm14, %v5100_v17 }
 0x303   :  { %v1440_v54 = vpop.xlane.xlu1 %1439  ;;  %v1426_v44 = vpop.xlane.xlu0 %1425 }
 0x304   :  { %v3906_v7 = vld [vmem:[#allocation3 + $0xa8] sm:$0xff]  ;;  %v3905_v40 = vld [vmem:[#allocation3 + $0xa0] sm:$0xff]  ;;  %2686 = vst.msk [vmem:[#allocation3 + $0xc8] sm:$0xff] %vm2596_vm2, %v1416_v22  ;;  %2685 = vst.msk [vmem:[#allocation3 + $0xc0] sm:$0xff] %vm2596_vm2, %v1402_v30  ;;  %v1441_v37 = vcvt.f32.s32 %v1440_v54  ;;  %v1427_v49 = vcvt.f32.s32 %v1426_v44  ;;  %vm1973_vm15 = vcmp.eq.s32.totalorder %v7973_v39, %v1402_v30  ;;  %vm1974_vm1 = vcmp.eq.s32.totalorder %v7973_v39, %v1416_v22 }
 0x305   :  { %3971 = vst.msk [vmem:[%s7673_s4 + $0xa8] sm:$0xff] %vm2596_vm2, %v3906_v7  ;;  %3970 = vst.msk [vmem:[%s7673_s4 + $0xa0] sm:$0xff] %vm2596_vm2, %v3905_v40  ;;  %4868 = vmatprep.mubr.msk.f32.mxu1 %vm1973_vm15, %v5100_v17  ;;  %v1555_v30 = vshll.u32 %v1554_v10, 16 }
 0x306   :  { %v1444_v11 = vadd.s32 %v1443_v6, %v1441_v37  ;;  %v1430_v3 = vadd.s32 %v1429_v34, %v1427_v49  ;;  %4869 = vmatmul.mubr.msk.f32.gmra.mrb[24].mxu1 %vm1974_vm1, %v5100_v17  ;;  %v1541_v6 = vshll.u32 %v1540_v50, 16  ;;  %v1582_v34 = vcvt.f32.s32 %v6431_v45 }
 0x307   :  { %v3908_v24 = vld [vmem:[#allocation3 + $0xb8] sm:$0xff]  ;;  %v1468_v43 = vpop.xlane.xlu1 %1467  ;;  %v1454_v23 = vpop.xlane.xlu0 %1453 }
 0x308   :  { %v3907_v25 = vld [vmem:[#allocation3 + $0xb0] sm:$0xff]  ;;  %3973 = vst.msk [vmem:[%s7673_s4 + $0xb8] sm:$0xff] %vm2596_vm2, %v3908_v24  ;;  %2688 = vst.msk [vmem:[#allocation3 + $0xd8] sm:$0xff] %vm2596_vm2, %v1444_v11  ;;  %v1469_v36 = vcvt.f32.s32 %v1468_v43  ;;  %v1455_v53 = vcvt.f32.s32 %v1454_v23  ;;  %vm1975_vm3 = vcmp.eq.s32.totalorder %v7973_v39, %v1430_v3  ;;  %vm1976_vm4 = vcmp.eq.s32.totalorder %v7973_v39, %v1444_v11 }
 0x309   :  { %3972 = vst.msk [vmem:[%s7673_s4 + $0xb0] sm:$0xff] %vm2596_vm2, %v3907_v25  ;;  %2687 = vst.msk [vmem:[#allocation3 + $0xd0] sm:$0xff] %vm2596_vm2, %v1430_v3  ;;  %4871 = vmatprep.mubr.msk.f32.mxu1 %vm1975_vm3, %v5100_v17  ;;  %v1583_v49 = vshll.u32 %v1582_v34, 16  ;;  %v1569_v11 = vshll.u32 %v1568_v18, 16  ;;  %v1610_v3 = vcvt.f32.s32 %v6441_v9 }
 0x30a   :  { %v1472_v14 = vadd.s32 %v1471_v47, %v1469_v36  ;;  %v1458_v8 = vadd.s32 %v1457_v59, %v1455_v53  ;;  %4872 = vmatmul.mubr.msk.f32.gmra.mrb[26].mxu1 %vm1976_vm4, %v5100_v17  ;;  %v1596_v47 = vcvt.f32.s32 %v6443_v60  ;;  %v1638_v53 = vcvt.f32.s32 %v6451_v13 }
 0x30b   :  { %v3910_v62 = vld [vmem:[#allocation3 + $0xc8] sm:$0xff]  ;;  %v3909_v41 = vld [vmem:[#allocation3 + $0xc0] sm:$0xff]  ;;  %v1496_v52 = vpop.xlane.xlu1 %1495  ;;  %v1482_v21 = vpop.xlane.xlu0 %1481  ;;  %v1611_v23 = vshll.u32 %v1610_v3, 16 }
 0x30c   :  { %3975 = vst.msk [vmem:[%s7673_s4 + $0xc8] sm:$0xff] %vm2596_vm2, %v3910_v62  ;;  %3974 = vst.msk [vmem:[%s7673_s4 + $0xc0] sm:$0xff] %vm2596_vm2, %v3909_v41  ;;  %v1497_v61 = vcvt.f32.s32 %v1496_v52  ;;  %v1483_v16 = vcvt.f32.s32 %v1482_v21  ;;  %vm1977_vm5 = vcmp.eq.s32.totalorder %v7973_v39, %v1458_v8  ;;  %vm1978_vm6 = vcmp.eq.s32.totalorder %v7973_v39, %v1472_v14 }
 0x30d   :  { %2690 = vst.msk [vmem:[#allocation3 + $0xe8] sm:$0xff] %vm2596_vm2, %v1472_v14  ;;  %2689 = vst.msk [vmem:[#allocation3 + $0xe0] sm:$0xff] %vm2596_vm2, %v1458_v8  ;;  %4874 = vmatprep.mubr.msk.f32.mxu1 %vm1977_vm5, %v5100_v17  ;;  %v1597_v36 = vshll.u32 %v1596_v47, 16  ;;  %v1624_v14 = vcvt.f32.s32 %v6453_v12  ;;  %v1639_v41 = vshll.u32 %v1638_v53, 16  ;;  %v1666_v21 = vcvt.f32.s32 %v6461_v33 }
 0x30e   :  { %v1500_v26 = vadd.s32 %v1499_v46, %v1497_v61  ;;  %v1486_v27 = vadd.s32 %v1485_v20, %v1483_v16  ;;  %4875 = vmatmul.mubr.msk.f32.gmra.mrb[28].mxu1 %vm1978_vm6, %v5100_v17  ;;  %v7975_v61 = vld [vmem:[#allocation20_spill] sm:$0xff] }
 0x30f   :  { %v3912_v15 = vld [vmem:[#allocation3 + $0xd8] sm:$0xff]  ;;  %v1524_v28 = vpop.xlane.xlu1 %1523  ;;  %v1510_v35 = vpop.xlane.xlu0 %1509  ;;  %v1625_v52 = vshll.u32 %v1624_v14, 16  ;;  %v1652_v16 = vcvt.f32.s32 %v7975_v61 }
 0x310   :  { %v3911_v38 = vld [vmem:[#allocation3 + $0xd0] sm:$0xff]  ;;  %3977 = vst.msk [vmem:[%s7673_s4 + $0xd8] sm:$0xff] %vm2596_vm2, %v3912_v15  ;;  %2692 = vst.msk [vmem:[#allocation3 + $0xf8] sm:$0xff] %vm2596_vm2, %v1500_v26  ;;  %v1525_v1 = vcvt.f32.s32 %v1524_v28  ;;  %v1511_v0 = vcvt.f32.s32 %v1510_v35  ;;  %vm1979_vm7 = vcmp.eq.s32.totalorder %v7973_v39, %v1486_v27  ;;  %vm1980_vm8 = vcmp.eq.s32.totalorder %v7973_v39, %v1500_v26 }
 0x311   :  { %3976 = vst.msk [vmem:[%s7673_s4 + $0xd0] sm:$0xff] %vm2596_vm2, %v3911_v38  ;;  %2691 = vst.msk [vmem:[#allocation3 + $0xf0] sm:$0xff] %vm2596_vm2, %v1486_v27  ;;  %4877 = vmatprep.mubr.msk.f32.mxu1 %vm1979_vm7, %v5100_v17  ;;  %v1667_v38 = vshll.u32 %v1666_v21, 16  ;;  %v1653_v28 = vshll.u32 %v1652_v16, 16  ;;  %v7976_v35 = vld [vmem:[#allocation21_spill] sm:$0xff] }
 0x312   :  { %v1528_v63 = vadd.s32 %v1527_v32, %v1525_v1  ;;  %v1514_v22 = vadd.s32 %v1513_v29, %v1511_v0  ;;  %4878 = vmatmul.mubr.msk.f32.gmra.mrb[30].mxu1 %vm1980_vm8, %v5100_v17  ;;  %v1694_v1 = vcvt.f32.s32 %v7976_v35  ;;  %v7977_v0 = vld [vmem:[#allocation22_spill] sm:$0xff] }
 0x313   :  { %v1552_v40 = vpop.xlane.xlu1 %1551  ;;  %v1538_v54 = vpop.xlane.xlu0 %1537 }
 0x314   :  { %v3914_v48 = vld [vmem:[#allocation3 + $0xe8] sm:$0xff]  ;;  %v3913_v7 = vld [vmem:[#allocation3 + $0xe0] sm:$0xff]  ;;  %2694 = vst.msk [vmem:[#allocation3 + $0x108] sm:$0xff] %vm2596_vm2, %v1528_v63  ;;  %2693 = vst.msk [vmem:[#allocation3 + $0x100] sm:$0xff] %vm2596_vm2, %v1514_v22  ;;  %v1553_v45 = vcvt.f32.s32 %v1552_v40  ;;  %v1539_v4 = vcvt.f32.s32 %v1538_v54  ;;  %vm1981_vm9 = vcmp.eq.s32.totalorder %v7973_v39, %v1514_v22  ;;  %vm1982_vm10 = vcmp.eq.s32.totalorder %v7973_v39, %v1528_v63 }
 0x315   :  { %3979 = vst.msk [vmem:[%s7673_s4 + $0xe8] sm:$0xff] %vm2596_vm2, %v3914_v48  ;;  %3978 = vst.msk [vmem:[%s7673_s4 + $0xe0] sm:$0xff] %vm2596_vm2, %v3913_v7  ;;  %4880 = vmatprep.mubr.msk.f32.mxu1 %vm1981_vm9, %v5100_v17  ;;  %v1680_v63 = vcvt.f32.s32 %v7977_v0  ;;  %v1695_v54 = vshll.u32 %v1694_v1, 16 }
 0x316   :  { %v1556_v44 = vadd.s32 %v1555_v30, %v1553_v45  ;;  %v1542_v37 = vadd.s32 %v1541_v6, %v1539_v4  ;;  %4881 = vmatmul.mubr.msk.f32.gmra.mrb[32].mxu1 %vm1982_vm10, %v5100_v17  ;;  %v7978_v4 = vld [vmem:[#allocation23_spill] sm:$0xff] }
 0x317   :  { %v3916_v59 = vld [vmem:[#allocation3 + $0xf8] sm:$0xff]  ;;  %v1580_v31 = vpop.xlane.xlu1 %1579  ;;  %v1566_v24 = vpop.xlane.xlu0 %1565  ;;  %v1681_v45 = vshll.u32 %v1680_v63, 16 }
 0x318   :  { %v3915_v5 = vld [vmem:[#allocation3 + $0xf0] sm:$0xff]  ;;  %3981 = vst.msk [vmem:[%s7673_s4 + $0xf8] sm:$0xff] %vm2596_vm2, %v3916_v59  ;;  %2696 = vst.msk [vmem:[#allocation3 + $0x118] sm:$0xff] %vm2596_vm2, %v1556_v44  ;;  %v1581_v9 = vcvt.f32.s32 %v1580_v31  ;;  %v1567_v60 = vcvt.f32.s32 %v1566_v24  ;;  %vm1983_vm11 = vcmp.eq.s32.totalorder %v7973_v39, %v1542_v37  ;;  %vm1984_vm12 = vcmp.eq.s32.totalorder %v7973_v39, %v1556_v44 }
 0x319   :  { %3980 = vst.msk [vmem:[%s7673_s4 + $0xf0] sm:$0xff] %vm2596_vm2, %v3915_v5  ;;  %2695 = vst.msk [vmem:[#allocation3 + $0x110] sm:$0xff] %vm2596_vm2, %v1542_v37  ;;  %4883 = vmatprep.mubr.msk.f32.mxu1 %vm1983_vm11, %v5100_v17  ;;  %v1722_v44 = vcvt.f32.s32 %v7978_v4  ;;  %v7979_v37 = vld [vmem:[#allocation24_spill] sm:$0xff] }
 0x31a   :  { %v1584_v25 = vadd.s32 %v1583_v49, %v1581_v9  ;;  %v1570_v43 = vadd.s32 %v1569_v11, %v1567_v60  ;;  %4884 = vmatmul.mubr.msk.f32.gmra.mrb[34].mxu1 %vm1984_vm12, %v5100_v17  ;;  %v1708_v49 = vcvt.f32.s32 %v7979_v37 }
 0x31b   :  { %v3918_v8 = vld [vmem:[#allocation3 + $0x108] sm:$0xff]  ;;  %v3917_v46 = vld [vmem:[#allocation3 + $0x100] sm:$0xff]  ;;  %v1608_v20 = vpop.xlane.xlu1 %1607  ;;  %v1594_v51 = vpop.xlane.xlu0 %1593  ;;  %v1723_v60 = vshll.u32 %v1722_v44, 16 }
 0x31c   :  { %3983 = vst.msk [vmem:[%s7673_s4 + $0x108] sm:$0xff] %vm2596_vm2, %v3918_v8  ;;  %3982 = vst.msk [vmem:[%s7673_s4 + $0x100] sm:$0xff] %vm2596_vm2, %v3917_v46  ;;  %v1609_v13 = vcvt.f32.s32 %v1608_v20  ;;  %v1595_v12 = vcvt.f32.s32 %v1594_v51  ;;  %vm1985_vm13 = vcmp.eq.s32.totalorder %v7973_v39, %v1570_v43  ;;  %vm1986_vm14 = vcmp.eq.s32.totalorder %v7973_v39, %v1584_v25 }
 0x31d   :  { %2698 = vst.msk [vmem:[#allocation3 + $0x128] sm:$0xff] %vm2596_vm2, %v1584_v25  ;;  %2697 = vst.msk [vmem:[#allocation3 + $0x120] sm:$0xff] %vm2596_vm2, %v1570_v43  ;;  %4886 = vmatprep.mubr.msk.f32.mxu1 %vm1985_vm13, %v5100_v17  ;;  %v1709_v25 = vshll.u32 %v1708_v49, 16  ;;  %v1750_v43 = vcvt.f32.s32 %v6491_v58 }
 0x31e   :  { %v1612_v19 = vadd.s32 %v1611_v23, %v1609_v13  ;;  %v1598_v62 = vadd.s32 %v1597_v36, %v1595_v12  ;;  %4887 = vmatmul.mubr.msk.f32.gmra.mrb[36].mxu1 %vm1986_vm14, %v5100_v17  ;;  %v7980_v23 = vld [vmem:[#allocation25_spill] sm:$0xff] }
 0x31f   :  { %v3920_v26 = vld [vmem:[#allocation3 + $0x118] sm:$0xff]  ;;  %v1636_v32 = vpop.xlane.xlu1 %1635  ;;  %v1622_v29 = vpop.xlane.xlu0 %1621  ;;  %v1736_v36 = vcvt.f32.s32 %v7980_v23  ;;  %v1751_v12 = vshll.u32 %v1750_v43, 16 }
 0x320   :  { %v3919_v27 = vld [vmem:[#allocation3 + $0x110] sm:$0xff]  ;;  %3985 = vst.msk [vmem:[%s7673_s4 + $0x118] sm:$0xff] %vm2596_vm2, %v3920_v26  ;;  %2700 = vst.msk [vmem:[#allocation3 + $0x138] sm:$0xff] %vm2596_vm2, %v1612_v19  ;;  %v1637_v33 = vcvt.f32.s32 %v1636_v32  ;;  %v1623_v10 = vcvt.f32.s32 %v1622_v29  ;;  %vm1987_vm15 = vcmp.eq.s32.totalorder %v7973_v39, %v1598_v62  ;;  %vm1988_vm1 = vcmp.eq.s32.totalorder %v7973_v39, %v1612_v19 }
 0x321   :  { %3984 = vst.msk [vmem:[%s7673_s4 + $0x110] sm:$0xff] %vm2596_vm2, %v3919_v27  ;;  %2699 = vst.msk [vmem:[#allocation3 + $0x130] sm:$0xff] %vm2596_vm2, %v1598_v62  ;;  %4889 = vmatprep.mubr.msk.f32.mxu1 %vm1987_vm15, %v5100_v17  ;;  %v1737_v19 = vshll.u32 %v1736_v36, 16  ;;  %v1778_v62 = vcvt.f32.s32 %v6501_v2 }
 0x322   :  { %v1640_v50 = vadd.s32 %v1639_v41, %v1637_v33  ;;  %v1626_v15 = vadd.s32 %v1625_v52, %v1623_v10  ;;  %4890 = vmatmul.mubr.msk.f32.gmra.mrb[38].mxu1 %vm1988_vm1, %v5100_v17  ;;  %v7981_v41 = vld [vmem:[#allocation26_spill] sm:$0xff] }
 0x323   :  { %v1664_v6 = vpop.xlane.xlu1 %1663  ;;  %v1650_v34 = vpop.xlane.xlu0 %1649  ;;  %v1764_v52 = vcvt.f32.s32 %v7981_v41  ;;  %v1779_v33 = vshll.u32 %v1778_v62, 16 }
 0x324   :  { %v3922_v22 = vld [vmem:[#allocation3 + $0x128] sm:$0xff]  ;;  %v3921_v30 = vld [vmem:[#allocation3 + $0x120] sm:$0xff]  ;;  %2702 = vst.msk [vmem:[#allocation3 + $0x148] sm:$0xff] %vm2596_vm2, %v1640_v50  ;;  %2701 = vst.msk [vmem:[#allocation3 + $0x140] sm:$0xff] %vm2596_vm2, %v1626_v15  ;;  %v1665_v18 = vcvt.f32.s32 %v1664_v6  ;;  %v1651_v48 = vcvt.f32.s32 %v1650_v34  ;;  %vm1989_vm3 = vcmp.eq.s32.totalorder %v7973_v39, %v1626_v15  ;;  %vm1990_vm4 = vcmp.eq.s32.totalorder %v7973_v39, %v1640_v50 }
 0x325   :  { %3987 = vst.msk [vmem:[%s7673_s4 + $0x128] sm:$0xff] %vm2596_vm2, %v3922_v22  ;;  %3986 = vst.msk [vmem:[%s7673_s4 + $0x120] sm:$0xff] %vm2596_vm2, %v3921_v30  ;;  %4892 = vmatprep.mubr.msk.f32.mxu1 %vm1989_vm3, %v5100_v17  ;;  %v1765_v10 = vshll.u32 %v1764_v52, 16  ;;  %v1806_v50 = vcvt.f32.s32 %v6511_v57  ;;  %v7982_v15 = vld [vmem:[#allocation27_spill] sm:$0xff] }
 0x326   :  { %v1668_v7 = vadd.s32 %v1667_v38, %v1665_v18  ;;  %v1654_v40 = vadd.s32 %v1653_v28, %v1651_v48  ;;  %4893 = vmatmul.mubr.msk.f32.gmra.mrb[40].mxu1 %vm1990_vm4, %v5100_v17  ;;  %v1792_v38 = vcvt.f32.s32 %v7982_v15  ;;  %v1834_v18 = vcvt.f32.s32 %v6521_v42  ;;  %v7983_v48 = vld [vmem:[#allocation28_spill] sm:$0xff] }
 0x327   :  { %v3924_v11 = vld [vmem:[#allocation3 + $0x138] sm:$0xff]  ;;  %v1692_v47 = vpop.xlane.xlu1 %1691  ;;  %v1678_v59 = vpop.xlane.xlu0 %1677  ;;  %v1807_v6 = vshll.u32 %v1806_v50, 16 }
 0x328   :  { %v3923_v3 = vld [vmem:[#allocation3 + $0x130] sm:$0xff]  ;;  %3989 = vst.msk [vmem:[%s7673_s4 + $0x138] sm:$0xff] %vm2596_vm2, %v3924_v11  ;;  %2704 = vst.msk [vmem:[#allocation3 + $0x158] sm:$0xff] %vm2596_vm2, %v1668_v7  ;;  %v1693_v5 = vcvt.f32.s32 %v1692_v47  ;;  %v1679_v31 = vcvt.f32.s32 %v1678_v59  ;;  %vm1991_vm5 = vcmp.eq.s32.totalorder %v7973_v39, %v1654_v40  ;;  %vm1992_vm6 = vcmp.eq.s32.totalorder %v7973_v39, %v1668_v7 }
 0x329   :  { %3988 = vst.msk [vmem:[%s7673_s4 + $0x130] sm:$0xff] %vm2596_vm2, %v3923_v3  ;;  %2703 = vst.msk [vmem:[#allocation3 + $0x150] sm:$0xff] %vm2596_vm2, %v1654_v40  ;;  %4895 = vmatprep.mubr.msk.f32.mxu1 %vm1991_vm5, %v5100_v17  ;;  %v1793_v34 = vshll.u32 %v1792_v38, 16  ;;  %v1820_v7 = vcvt.f32.s32 %v7983_v48  ;;  %v1835_v11 = vshll.u32 %v1834_v18, 16  ;;  %v7984_v47 = vld [vmem:[#allocation29_spill] sm:$0xff] }
 0x32a   :  { %v1696_v24 = vadd.s32 %v1695_v54, %v1693_v5  ;;  %v1682_v9 = vadd.s32 %v1681_v45, %v1679_v31  ;;  %4896 = vmatmul.mubr.msk.f32.gmra.mrb[42].mxu1 %vm1992_vm6, %v5100_v17  ;;  %v1862_v59 = vcvt.f32.s32 %v7984_v47  ;;  %v7985_v5 = vld [vmem:[#allocation30_spill] sm:$0xff] }
 0x32b   :  { %v3926_v53 = vld [vmem:[#allocation3 + $0x148] sm:$0xff]  ;;  %v3925_v14 = vld [vmem:[#allocation3 + $0x140] sm:$0xff]  ;;  %v1720_v8 = vpop.xlane.xlu1 %1719  ;;  %v1706_v46 = vpop.xlane.xlu0 %1705  ;;  %v1821_v3 = vshll.u32 %v1820_v7, 16  ;;  %v1848_v31 = vcvt.f32.s32 %v7985_v5 }
 0x32c   :  { %3991 = vst.msk [vmem:[%s7673_s4 + $0x148] sm:$0xff] %vm2596_vm2, %v3926_v53  ;;  %3990 = vst.msk [vmem:[%s7673_s4 + $0x140] sm:$0xff] %vm2596_vm2, %v3925_v14  ;;  %v1721_v58 = vcvt.f32.s32 %v1720_v8  ;;  %v1707_v20 = vcvt.f32.s32 %v1706_v46  ;;  %vm1993_vm7 = vcmp.eq.s32.totalorder %v7973_v39, %v1682_v9  ;;  %vm1994_vm8 = vcmp.eq.s32.totalorder %v7973_v39, %v1696_v24 }
 0x32d   :  { %2706 = vst.msk [vmem:[#allocation3 + $0x168] sm:$0xff] %vm2596_vm2, %v1696_v24  ;;  %2705 = vst.msk [vmem:[#allocation3 + $0x160] sm:$0xff] %vm2596_vm2, %v1682_v9  ;;  %4898 = vmatprep.mubr.msk.f32.mxu1 %vm1993_vm7, %v5100_v17  ;;  %v1863_v14 = vshll.u32 %v1862_v59, 16  ;;  %v1849_v8 = vshll.u32 %v1848_v31, 16  ;;  %v1890_v46 = vcvt.f32.s32 %v6541_v55 }
 0x32e   :  { %v1724_v51 = vadd.s32 %v1723_v60, %v1721_v58  ;;  %v1710_v13 = vadd.s32 %v1709_v25, %v1707_v20  ;;  %4899 = vmatmul.mubr.msk.f32.gmra.mrb[44].mxu1 %vm1994_vm8, %v5100_v17  ;;  %v7986_v58 = vld [vmem:[#allocation31_spill] sm:$0xff] }
 0x32f   :  { %v3928_v21 = vld [vmem:[#allocation3 + $0x158] sm:$0xff]  ;;  %v1748_v16 = vpop.xlane.xlu1 %1747  ;;  %v1734_v26 = vpop.xlane.xlu0 %1733  ;;  %v1876_v20 = vcvt.f32.s32 %v7986_v58 }
 0x330   :  { %v3927_v61 = vld [vmem:[#allocation3 + $0x150] sm:$0xff]  ;;  %3993 = vst.msk [vmem:[%s7673_s4 + $0x158] sm:$0xff] %vm2596_vm2, %v3928_v21  ;;  %2708 = vst.msk [vmem:[#allocation3 + $0x178] sm:$0xff] %vm2596_vm2, %v1724_v51  ;;  %v1749_v2 = vcvt.f32.s32 %v1748_v16  ;;  %v1735_v27 = vcvt.f32.s32 %v1734_v26  ;;  %vm1995_vm9 = vcmp.eq.s32.totalorder %v7973_v39, %v1710_v13  ;;  %vm1996_vm10 = vcmp.eq.s32.totalorder %v7973_v39, %v1724_v51  ;;  %v7987_v16 = vld [vmem:[#allocation32_spill] sm:$0xff] }
 0x331   :  { %3992 = vst.msk [vmem:[%s7673_s4 + $0x150] sm:$0xff] %vm2596_vm2, %v3927_v61  ;;  %2707 = vst.msk [vmem:[#allocation3 + $0x170] sm:$0xff] %vm2596_vm2, %v1710_v13  ;;  %4901 = vmatprep.mubr.msk.f32.mxu1 %vm1995_vm9, %v5100_v17  ;;  %v1891_v21 = vshll.u32 %v1890_v46, 16  ;;  %v1877_v61 = vshll.u32 %v1876_v20, 16  ;;  %v1918_v26 = vcvt.f32.s32 %v7987_v16  ;;  %v5013_v46 = vld [vmem:[%s7669_s0] sm:$0xff] }
 0x332   :  { %v1752_v32 = vadd.s32 %v1751_v12, %v1749_v2  ;;  %v1738_v29 = vadd.s32 %v1737_v19, %v1735_v27  ;;  %4902 = vmatmul.mubr.msk.f32.gmra.mrb[46].mxu1 %vm1996_vm10, %v5100_v17  ;;  %v7988_v2 = vld [vmem:[#allocation33_spill] sm:$0xff] }
 0x333   :  { %v1776_v1 = vpop.xlane.xlu1 %1775  ;;  %v1762_v0 = vpop.xlane.xlu0 %1761  ;;  %v1904_v27 = vcvt.f32.s32 %v7988_v2 }
 0x334   :  { %v3930_v28 = vld [vmem:[#allocation3 + $0x168] sm:$0xff]  ;;  %v3929_v35 = vld [vmem:[#allocation3 + $0x160] sm:$0xff]  ;;  %2710 = vst.msk [vmem:[#allocation3 + $0x188] sm:$0xff] %vm2596_vm2, %v1752_v32  ;;  %2709 = vst.msk [vmem:[#allocation3 + $0x180] sm:$0xff] %vm2596_vm2, %v1738_v29  ;;  %v1777_v57 = vcvt.f32.s32 %v1776_v1  ;;  %v1763_v63 = vcvt.f32.s32 %v1762_v0  ;;  %vm1997_vm11 = vcmp.eq.s32.totalorder %v7973_v39, %v1738_v29  ;;  %vm1998_vm12 = vcmp.eq.s32.totalorder %v7973_v39, %v1752_v32 }
 0x335   :  { %3995 = vst.msk [vmem:[%s7673_s4 + $0x168] sm:$0xff] %vm2596_vm2, %v3930_v28  ;;  %3994 = vst.msk [vmem:[%s7673_s4 + $0x160] sm:$0xff] %vm2596_vm2, %v3929_v35  ;;  %4904 = vmatprep.mubr.msk.f32.mxu1 %vm1997_vm11, %v5100_v17  ;;  %v1919_v35 = vshll.u32 %v1918_v26, 16  ;;  %v1905_v1 = vshll.u32 %v1904_v27, 16  ;;  %v7989_v0 = vld [vmem:[#allocation34_spill] sm:$0xff] }
 0x336   :  { %v1780_v22 = vadd.s32 %v1779_v33, %v1777_v57  ;;  %v1766_v30 = vadd.s32 %v1765_v10, %v1763_v63  ;;  %4905 = vmatmul.mubr.msk.f32.gmra.mrb[48].mxu1 %vm1998_vm12, %v5100_v17  ;;  %v1946_v57 = vcvt.f32.s32 %v7989_v0  ;;  %v1932_v63 = vcvt.f32.s32 %v6563_v56 }
 0x337   :  { %v3932_v40 = vld [vmem:[#allocation3 + $0x178] sm:$0xff]  ;;  %v1804_v45 = vpop.xlane.xlu1 %1803  ;;  %v1790_v4 = vpop.xlane.xlu0 %1789 }
 0x338   :  { %v3931_v54 = vld [vmem:[#allocation3 + $0x170] sm:$0xff]  ;;  %3997 = vst.msk [vmem:[%s7673_s4 + $0x178] sm:$0xff] %vm2596_vm2, %v3932_v40  ;;  %2712 = vst.msk [vmem:[#allocation3 + $0x198] sm:$0xff] %vm2596_vm2, %v1780_v22  ;;  %v1805_v42 = vcvt.f32.s32 %v1804_v45  ;;  %v1791_v44 = vcvt.f32.s32 %v1790_v4  ;;  %vm1999_vm13 = vcmp.eq.s32.totalorder %v7973_v39, %v1766_v30  ;;  %vm2000_vm14 = vcmp.eq.s32.totalorder %v7973_v39, %v1780_v22 }
 0x339   :  { %3996 = vst.msk [vmem:[%s7673_s4 + $0x170] sm:$0xff] %vm2596_vm2, %v3931_v54  ;;  %2711 = vst.msk [vmem:[#allocation3 + $0x190] sm:$0xff] %vm2596_vm2, %v1766_v30  ;;  %4907 = vmatprep.mubr.msk.f32.mxu1 %vm1999_vm13, %v5100_v17  ;;  %v1947_v40 = vshll.u32 %v1946_v57, 16  ;;  %v1933_v54 = vshll.u32 %v1932_v63, 16 }
 0x33a   :  { %v1808_v37 = vadd.s32 %v1807_v6, %v1805_v42  ;;  %v1794_v49 = vadd.s32 %v1793_v34, %v1791_v44  ;;  %4908 = vmatmul.mubr.msk.f32.gmra.mrb[50].mxu1 %vm2000_vm14, %v5100_v17 }
 0x33b   :  { %v3934_v24 = vld [vmem:[#allocation3 + $0x188] sm:$0xff]  ;;  %v3933_v9 = vld [vmem:[#allocation3 + $0x180] sm:$0xff]  ;;  %v1832_v60 = vpop.xlane.xlu1 %1831  ;;  %v1818_v25 = vpop.xlane.xlu0 %1817 }
 0x33c   :  { %3999 = vst.msk [vmem:[%s7673_s4 + $0x188] sm:$0xff] %vm2596_vm2, %v3934_v24  ;;  %3998 = vst.msk [vmem:[%s7673_s4 + $0x180] sm:$0xff] %vm2596_vm2, %v3933_v9  ;;  %v1833_v43 = vcvt.f32.s32 %v1832_v60  ;;  %v1819_v23 = vcvt.f32.s32 %v1818_v25  ;;  %vm2001_vm15 = vcmp.eq.s32.totalorder %v7973_v39, %v1794_v49  ;;  %vm2002_vm1 = vcmp.eq.s32.totalorder %v7973_v39, %v1808_v37 }
 0x33d   :  { %2714 = vst.msk [vmem:[#allocation3 + $0x1a8] sm:$0xff] %vm2596_vm2, %v1808_v37  ;;  %2713 = vst.msk [vmem:[#allocation3 + $0x1a0] sm:$0xff] %vm2596_vm2, %v1794_v49  ;;  %4910 = vmatprep.mubr.msk.f32.mxu1 %vm2001_vm15, %v5100_v17 }
 0x33e   :  { %v1836_v36 = vadd.s32 %v1835_v11, %v1833_v43  ;;  %v1822_v53 = vadd.s32 %v1821_v3, %v1819_v23  ;;  %4911 = vmatmul.mubr.msk.f32.gmra.mrb[52].mxu1 %vm2002_vm1, %v5100_v17 }
 0x33f   :  { %v3936_v51 = vld [vmem:[#allocation3 + $0x198] sm:$0xff]  ;;  %v1860_v12 = vpop.xlane.xlu1 %1859  ;;  %v1846_v19 = vpop.xlane.xlu0 %1845 }
 0x340   :  { %v3935_v13 = vld [vmem:[#allocation3 + $0x190] sm:$0xff]  ;;  %4001 = vst.msk [vmem:[%s7673_s4 + $0x198] sm:$0xff] %vm2596_vm2, %v3936_v51  ;;  %2716 = vst.msk [vmem:[#allocation3 + $0x1b8] sm:$0xff] %vm2596_vm2, %v1836_v36  ;;  %v1861_v55 = vcvt.f32.s32 %v1860_v12  ;;  %v1847_v62 = vcvt.f32.s32 %v1846_v19  ;;  %vm2003_vm3 = vcmp.eq.s32.totalorder %v7973_v39, %v1822_v53  ;;  %vm2004_vm4 = vcmp.eq.s32.totalorder %v7973_v39, %v1836_v36  ;;  %v5012_v36 = vld [vmem:[%s7669_s0 + $0x8] sm:$0xff] }
 0x341   :  { %4000 = vst.msk [vmem:[%s7673_s4 + $0x190] sm:$0xff] %vm2596_vm2, %v3935_v13  ;;  %2715 = vst.msk [vmem:[#allocation3 + $0x1b0] sm:$0xff] %vm2596_vm2, %v1822_v53  ;;  %4913 = vmatprep.mubr.msk.f32.mxu1 %vm2003_vm3, %v5100_v17  ;;  %v5014_v19 = vld [vmem:[%s7669_s0 + $0x18] sm:$0xff] }
 0x342   :  { %v1864_v41 = vadd.s32 %v1863_v14, %v1861_v55  ;;  %v1850_v52 = vadd.s32 %v1849_v8, %v1847_v62  ;;  %4914 = vmatmul.mubr.msk.f32.gmra.mrb[54].mxu1 %vm2004_vm4, %v5100_v17 }
 0x343   :  { %v1888_v33 = vpop.xlane.xlu1 %1887  ;;  %v1874_v10 = vpop.xlane.xlu0 %1873 }
 0x344   :  { %v3938_v32 = vld [vmem:[#allocation3 + $0x1a8] sm:$0xff]  ;;  %v3937_v29 = vld [vmem:[#allocation3 + $0x1a0] sm:$0xff]  ;;  %2718 = vst.msk [vmem:[#allocation3 + $0x1c8] sm:$0xff] %vm2596_vm2, %v1864_v41  ;;  %2717 = vst.msk [vmem:[#allocation3 + $0x1c0] sm:$0xff] %vm2596_vm2, %v1850_v52  ;;  %v1889_v50 = vcvt.f32.s32 %v1888_v33  ;;  %v1875_v15 = vcvt.f32.s32 %v1874_v10  ;;  %vm2005_vm5 = vcmp.eq.s32.totalorder %v7973_v39, %v1850_v52  ;;  %vm2006_vm6 = vcmp.eq.s32.totalorder %v7973_v39, %v1864_v41 }
 0x345   :  { %4003 = vst.msk [vmem:[%s7673_s4 + $0x1a8] sm:$0xff] %vm2596_vm2, %v3938_v32  ;;  %4002 = vst.msk [vmem:[%s7673_s4 + $0x1a0] sm:$0xff] %vm2596_vm2, %v3937_v29  ;;  %4916 = vmatprep.mubr.msk.f32.mxu1 %vm2005_vm5, %v5100_v17  ;;  %v5016_v33 = vld [vmem:[%s7669_s0 + $0x28] sm:$0xff] }
 0x346   :  { %v1892_v38 = vadd.s32 %v1891_v21, %v1889_v50  ;;  %v1878_v28 = vadd.s32 %v1877_v61, %v1875_v15  ;;  %4917 = vmatmul.mubr.msk.f32.gmra.mrb[56].mxu1 %vm2006_vm6, %v5100_v17  ;;  %v5015_v61 = vld [vmem:[%s7669_s0 + $0x10] sm:$0xff] }
 0x347   :  { %v3940_v22 = vld [vmem:[#allocation3 + $0x1b8] sm:$0xff]  ;;  %v1916_v6 = vpop.xlane.xlu1 %1915  ;;  %v1902_v34 = vpop.xlane.xlu0 %1901 }
 0x348   :  { %v3939_v30 = vld [vmem:[#allocation3 + $0x1b0] sm:$0xff]  ;;  %4005 = vst.msk [vmem:[%s7673_s4 + $0x1b8] sm:$0xff] %vm2596_vm2, %v3940_v22  ;;  %2720 = vst.msk [vmem:[#allocation3 + $0x1d8] sm:$0xff] %vm2596_vm2, %v1892_v38  ;;  %v1917_v18 = vcvt.f32.s32 %v1916_v6  ;;  %v1903_v56 = vcvt.f32.s32 %v1902_v34  ;;  %vm2007_vm7 = vcmp.eq.s32.totalorder %v7973_v39, %v1878_v28  ;;  %vm2008_vm8 = vcmp.eq.s32.totalorder %v7973_v39, %v1892_v38  ;;  %v5018_v34 = vld [vmem:[%s7669_s0 + $0x38] sm:$0xff] }
 0x349   :  { %4004 = vst.msk [vmem:[%s7673_s4 + $0x1b0] sm:$0xff] %vm2596_vm2, %v3939_v30  ;;  %2719 = vst.msk [vmem:[#allocation3 + $0x1d0] sm:$0xff] %vm2596_vm2, %v1878_v28  ;;  %4919 = vmatprep.mubr.msk.f32.mxu1 %vm2007_vm7, %v5100_v17  ;;  %v5017_v28 = vld [vmem:[%s7669_s0 + $0x20] sm:$0xff] }
 0x34a   :  { %v1920_v48 = vadd.s32 %v1919_v35, %v1917_v18  ;;  %v1906_v7 = vadd.s32 %v1905_v1, %v1903_v56  ;;  %4920 = vmatmul.mubr.msk.f32.gmra.mrb[58].mxu1 %vm2008_vm8, %v5100_v17 }
 0x34b   :  { %v3942_v45 = vld [vmem:[#allocation3 + $0x1c8] sm:$0xff]  ;;  %v3941_v4 = vld [vmem:[#allocation3 + $0x1c0] sm:$0xff]  ;;  %v1944_v42 = vpop.xlane.xlu1 %1943  ;;  %v1930_v44 = vpop.xlane.xlu0 %1929 }
 0x34c   :  { %4007 = vst.msk [vmem:[%s7673_s4 + $0x1c8] sm:$0xff] %vm2596_vm2, %v3942_v45  ;;  %4006 = vst.msk [vmem:[%s7673_s4 + $0x1c0] sm:$0xff] %vm2596_vm2, %v3941_v4  ;;  %v1945_v37 = vcvt.f32.s32 %v1944_v42  ;;  %v1931_v49 = vcvt.f32.s32 %v1930_v44  ;;  %vm2009_vm9 = vcmp.eq.s32.totalorder %v7973_v39, %v1906_v7  ;;  %vm2010_vm10 = vcmp.eq.s32.totalorder %v7973_v39, %v1920_v48 }
 0x34d   :  { %2722 = vst.msk [vmem:[#allocation3 + $0x1e8] sm:$0xff] %vm2596_vm2, %v1920_v48  ;;  %2721 = vst.msk [vmem:[#allocation3 + $0x1e0] sm:$0xff] %vm2596_vm2, %v1906_v7  ;;  %4922 = vmatprep.mubr.msk.f32.mxu1 %vm2009_vm9, %v5100_v17 }
 0x34e   :  { %v1948_v11 = vadd.s32 %v1947_v40, %v1945_v37  ;;  %v1934_v3 = vadd.s32 %v1933_v54, %v1931_v49  ;;  %4923 = vmatmul.mubr.msk.f32.gmra.mrb[60].mxu1 %vm2010_vm10, %v5100_v17  ;;  %v5019_v40 = vld [vmem:[%s7669_s0 + $0x30] sm:$0xff] }
 0x34f   :  { %v3944_v47 = vld [vmem:[#allocation3 + $0x1d8] sm:$0xff] }
 0x350   :  { %v3943_v59 = vld [vmem:[#allocation3 + $0x1d0] sm:$0xff]  ;;  %4009 = vst.msk [vmem:[%s7673_s4 + $0x1d8] sm:$0xff] %vm2596_vm2, %v3944_v47  ;;  %2724 = vst.msk [vmem:[#allocation3 + $0x1f8] sm:$0xff] %vm2596_vm2, %v1948_v11  ;;  %vm2011_vm11 = vcmp.eq.s32.totalorder %v7973_v39, %v1934_v3  ;;  %vm2012_vm12 = vcmp.eq.s32.totalorder %v7973_v39, %v1948_v11 }
 0x351   :  { %4008 = vst.msk [vmem:[%s7673_s4 + $0x1d0] sm:$0xff] %vm2596_vm2, %v3943_v59  ;;  %2723 = vst.msk [vmem:[#allocation3 + $0x1f0] sm:$0xff] %vm2596_vm2, %v1934_v3  ;;  %4925 = vmatprep.mubr.msk.f32.mxu1 %vm2011_vm11, %v5100_v17  ;;  %v5020_v3 = vld [vmem:[%s7669_s0 + $0x48] sm:$0xff] }
 0x352   :  { %4926 = vmatmul.mubr.msk.f32.gmra.mrb[62].mxu1 %vm2012_vm12, %v5100_v17 }
 0x354   :  { %v3946_v5 = vld [vmem:[#allocation3 + $0x1e8] sm:$0xff]  ;;  %v3945_v31 = vld [vmem:[#allocation3 + $0x1e0] sm:$0xff] }
 0x355   :  { %4011 = vst.msk [vmem:[%s7673_s4 + $0x1e8] sm:$0xff] %vm2596_vm2, %v3946_v5  ;;  %4010 = vst.msk [vmem:[%s7673_s4 + $0x1e0] sm:$0xff] %vm2596_vm2, %v3945_v31 }
 0x357   :  { %v3948_v24 = vld [vmem:[#allocation3 + $0x1f8] sm:$0xff] }
 0x358   :  { %v3947_v9 = vld [vmem:[#allocation3 + $0x1f0] sm:$0xff]  ;;  %4013 = vst.msk [vmem:[%s7673_s4 + $0x1f8] sm:$0xff] %vm2596_vm2, %v3948_v24  ;;  %v5021_v24 = vld [vmem:[%s7669_s0 + $0x40] sm:$0xff] }
 0x359   :  { %4012 = vst.msk [vmem:[%s7673_s4 + $0x1f0] sm:$0xff] %vm2596_vm2, %v3947_v9  ;;  %vm4279_vm2 = vcmask 0  }
 0x3a9   :  { %v4834_v39 = vpop.f32.mrb[0].mxu1 }
 0x3aa   :  { %2726 = vst.msk [vmem:[#allocation4 + $0x8] sm:$0xff] %vm99_vm0, %v4834_v39  ;;  %v2207_v17 = vpop.f32.mrb[1].mxu1 }
 0x3ab   :  { %2725 = vst.msk [vmem:[#allocation4] sm:$0xff] %vm99_vm0, %v2207_v17 }
 0x3ad   :  { %v4837_v60 = vpop.f32.mrb[2].mxu1 }
 0x3ae   :  { %2728 = vst.msk [vmem:[#allocation4 + $0x18] sm:$0xff] %vm99_vm0, %v4837_v60  ;;  %v2217_v25 = vpop.f32.mrb[3].mxu1 }
 0x3af   :  { %2727 = vst.msk [vmem:[#allocation4 + $0x10] sm:$0xff] %vm99_vm0, %v2217_v25 }
 0x3b1   :  { %v3758_v43 = vld [vmem:[#allocation4 + $0x8] sm:$0xff]  ;;  %v4840_v23 = vpop.f32.mrb[4].mxu1 }
 0x3b2   :  { %3822 = vst.msk [vmem:[%s7672_s3 + $0x8] sm:$0xff] %vm99_vm0, %v3758_v43  ;;  %v4015_v53 = vsub.f32 %v3758_v43, %v5012_v36  ;;  %v3757_v14 = vld [vmem:[#allocation4] sm:$0xff]  ;;  %2730 = vst.msk [vmem:[#allocation4 + $0x28] sm:$0xff] %vm99_vm0, %v4840_v23  ;;  %v2227_v8 = vpop.f32.mrb[5].mxu1 }
 0x3b3   :  { %3821 = vst.msk [vmem:[%s7672_s3] sm:$0xff] %vm99_vm0, %v3757_v14  ;;  %v4014_v58 = vsub.f32 %v3757_v14, %v5013_v46  ;;  %2729 = vst.msk [vmem:[#allocation4 + $0x20] sm:$0xff] %vm99_vm0, %v2227_v8 }
 0x3b4   :  { %v4079_v20 = vmul.f32 %v4015_v53, %v4015_v53  ;;  %v5022_v53 = vld [vmem:[%s7669_s0 + $0x58] sm:$0xff] }
 0x3b5   :  { %v4078_v51 = vmul.f32 %v4014_v58, %v4014_v58  ;;  %v3760_v13 = vld [vmem:[#allocation4 + $0x18] sm:$0xff]  ;;  %v4843_v12 = vpop.f32.mrb[6].mxu1 }
 0x3b6   :  { %3824 = vst.msk [vmem:[%s7672_s3 + $0x18] sm:$0xff] %vm99_vm0, %v3760_v13  ;;  %v4017_v55 = vsub.f32 %v3760_v13, %v5014_v19  ;;  %v3759_v62 = vld [vmem:[#allocation4 + $0x10] sm:$0xff]  ;;  %2732 = vst.msk [vmem:[#allocation4 + $0x38] sm:$0xff] %vm99_vm0, %v4843_v12  ;;  %v2237_v41 = vpop.f32.mrb[7].mxu1  ;;  %v4143_v52 = vsel %vm99_vm0, %v4079_v20, 0.0 }
 0x3b7   :  { %v4142_v21 = vsel %vm99_vm0, %v4078_v51, 0.0  ;;  %3823 = vst.msk [vmem:[%s7672_s3 + $0x10] sm:$0xff] %vm99_vm0, %v3759_v62  ;;  %v4016_v16 = vsub.f32 %v3759_v62, %v5015_v61  ;;  %2731 = vst.msk [vmem:[#allocation4 + $0x30] sm:$0xff] %vm99_vm0, %v2237_v41  ;;  %v5023_v20 = vld [vmem:[%s7669_s0 + $0x50] sm:$0xff] }
 0x3b8   :  { %v4081_v26 = vmul.f32 %v4017_v55, %v4017_v55  ;;  %v4144_v29 = vadd.f32 %v4143_v52, %v4142_v21  ;;  %v5024_v21 = vld [vmem:[%s7669_s0 + $0x68] sm:$0xff] }
 0x3b9   :  { %v4080_v2 = vmul.f32 %v4016_v16, %v4016_v16  ;;  %v3762_v27 = vld [vmem:[#allocation4 + $0x28] sm:$0xff]  ;;  %v4846_v32 = vpop.f32.mrb[8].mxu1 }
 0x3ba   :  { %3826 = vst.msk [vmem:[%s7672_s3 + $0x28] sm:$0xff] %vm99_vm0, %v3762_v27  ;;  %v4019_v10 = vsub.f32 %v3762_v27, %v5016_v33  ;;  %v3761_v50 = vld [vmem:[#allocation4 + $0x20] sm:$0xff]  ;;  %2734 = vst.msk [vmem:[#allocation4 + $0x48] sm:$0xff] %vm99_vm0, %v4846_v32  ;;  %v2247_v15 = vpop.f32.mrb[9].mxu1  ;;  %v4147_v0 = vsel %vm99_vm0, %v4081_v26, 0.0 }
 0x3bb   :  { %v4145_v38 = vsel %vm99_vm0, %v4080_v2, 0.0  ;;  %3825 = vst.msk [vmem:[%s7672_s3 + $0x20] sm:$0xff] %vm99_vm0, %v3761_v50  ;;  %v4018_v35 = vsub.f32 %v3761_v50, %v5017_v28  ;;  %2733 = vst.msk [vmem:[#allocation4 + $0x40] sm:$0xff] %vm99_vm0, %v2247_v15  ;;  %v5025_v27 = vld [vmem:[%s7669_s0 + $0x60] sm:$0xff] }
 0x3bc   :  { %v4146_v1 = vadd.f32 %v4145_v38, %v4144_v29  ;;  %v4083_v57 = vmul.f32 %v4019_v10, %v4019_v10 }
 0x3bd   :  { %v4082_v63 = vmul.f32 %v4018_v35, %v4018_v35  ;;  %v3764_v22 = vld [vmem:[#allocation4 + $0x38] sm:$0xff]  ;;  %v4849_v30 = vpop.f32.mrb[10].mxu1 }
 0x3be   :  { %v4148_v6 = vadd.f32 %v4147_v0, %v4146_v1  ;;  %3828 = vst.msk [vmem:[%s7672_s3 + $0x38] sm:$0xff] %vm99_vm0, %v3764_v22  ;;  %v4021_v18 = vsub.f32 %v3764_v22, %v5018_v34  ;;  %v3763_v56 = vld [vmem:[#allocation4 + $0x30] sm:$0xff]  ;;  %2736 = vst.msk [vmem:[#allocation4 + $0x58] sm:$0xff] %vm99_vm0, %v4849_v30  ;;  %v2257_v48 = vpop.f32.mrb[11].mxu1  ;;  %v4151_v4 = vsel %vm99_vm0, %v4083_v57, 0.0  ;;  %v5026_v35 = vld [vmem:[%s7669_s0 + $0x78] sm:$0xff] }
 0x3bf   :  { %v4149_v7 = vsel %vm99_vm0, %v4082_v63, 0.0  ;;  %3827 = vst.msk [vmem:[%s7672_s3 + $0x30] sm:$0xff] %vm99_vm0, %v3763_v56  ;;  %v4020_v54 = vsub.f32 %v3763_v56, %v5019_v40  ;;  %2735 = vst.msk [vmem:[#allocation4 + $0x50] sm:$0xff] %vm99_vm0, %v2257_v48  ;;  %v5027_v22 = vld [vmem:[%s7669_s0 + $0x70] sm:$0xff] }
 0x3c0   :  { %v4150_v45 = vadd.f32 %v4149_v7, %v4148_v6  ;;  %v4085_v42 = vmul.f32 %v4021_v18, %v4021_v18 }
 0x3c1   :  { %v4084_v44 = vmul.f32 %v4020_v54, %v4020_v54  ;;  %v3766_v37 = vld [vmem:[#allocation4 + $0x48] sm:$0xff]  ;;  %v4852_v49 = vpop.f32.mrb[12].mxu1 }
 0x3c2   :  { %v4152_v11 = vadd.f32 %v4151_v4, %v4150_v45  ;;  %3830 = vst.msk [vmem:[%s7672_s3 + $0x48] sm:$0xff] %vm99_vm0, %v3766_v37  ;;  %v4023_v47 = vsub.f32 %v3766_v37, %v5020_v3  ;;  %v3765_v59 = vld [vmem:[#allocation4 + $0x40] sm:$0xff]  ;;  %2738 = vst.msk [vmem:[#allocation4 + $0x68] sm:$0xff] %vm99_vm0, %v4852_v49  ;;  %v2267_v5 = vpop.f32.mrb[13].mxu1  ;;  %v4155_v17 = vsel %vm99_vm0, %v4085_v42, 0.0  ;;  %v5028_v54 = vld [vmem:[%s7669_s0 + $0x88] sm:$0xff] }
 0x3c3   :  { %v4153_v31 = vsel %vm99_vm0, %v4084_v44, 0.0  ;;  %3829 = vst.msk [vmem:[%s7672_s3 + $0x40] sm:$0xff] %vm99_vm0, %v3765_v59  ;;  %v4022_v9 = vsub.f32 %v3765_v59, %v5021_v24  ;;  %2737 = vst.msk [vmem:[#allocation4 + $0x60] sm:$0xff] %vm99_vm0, %v2267_v5  ;;  %v5029_v37 = vld [vmem:[%s7669_s0 + $0x80] sm:$0xff] }
 0x3c4   :  { %v4154_v39 = vadd.f32 %v4153_v31, %v4152_v11  ;;  %v4087_v60 = vmul.f32 %v4023_v47, %v4023_v47 }
 0x3c5   :  { %v4086_v25 = vmul.f32 %v4022_v9, %v4022_v9  ;;  %v3768_v43 = vld [vmem:[#allocation4 + $0x58] sm:$0xff]  ;;  %v4855_v23 = vpop.f32.mrb[14].mxu1 }
 0x3c6   :  { %v4156_v36 = vadd.f32 %v4155_v17, %v4154_v39  ;;  %3832 = vst.msk [vmem:[%s7672_s3 + $0x58] sm:$0xff] %vm99_vm0, %v3768_v43  ;;  %v4025_v14 = vsub.f32 %v3768_v43, %v5022_v53  ;;  %v3767_v8 = vld [vmem:[#allocation4 + $0x50] sm:$0xff]  ;;  %2740 = vst.msk [vmem:[#allocation4 + $0x78] sm:$0xff] %vm99_vm0, %v4855_v23  ;;  %v2277_v46 = vpop.f32.mrb[15].mxu1  ;;  %v4159_v12 = vsel %vm99_vm0, %v4087_v60, 0.0  ;;  %v5030_v9 = vld [vmem:[%s7669_s0 + $0x98] sm:$0xff] }
 0x3c7   :  { %v4157_v58 = vsel %vm99_vm0, %v4086_v25, 0.0  ;;  %3831 = vst.msk [vmem:[%s7672_s3 + $0x50] sm:$0xff] %vm99_vm0, %v3767_v8  ;;  %v4024_v51 = vsub.f32 %v3767_v8, %v5023_v20  ;;  %2739 = vst.msk [vmem:[#allocation4 + $0x70] sm:$0xff] %vm99_vm0, %v2277_v46  ;;  %v5031_v43 = vld [vmem:[%s7669_s0 + $0x90] sm:$0xff] }
 0x3c8   :  { %v4158_v13 = vadd.f32 %v4157_v58, %v4156_v36  ;;  %v4089_v19 = vmul.f32 %v4025_v14, %v4025_v14 }
 0x3c9   :  { %v4088_v55 = vmul.f32 %v4024_v51, %v4024_v51  ;;  %v3770_v62 = vld [vmem:[#allocation4 + $0x68] sm:$0xff]  ;;  %v4858_v41 = vpop.f32.mrb[16].mxu1 }
 0x3ca   :  { %v4160_v52 = vadd.f32 %v4159_v12, %v4158_v13  ;;  %3834 = vst.msk [vmem:[%s7672_s3 + $0x68] sm:$0xff] %vm99_vm0, %v3770_v62  ;;  %v4027_v61 = vsub.f32 %v3770_v62, %v5024_v21  ;;  %v3769_v16 = vld [vmem:[#allocation4 + $0x60] sm:$0xff]  ;;  %2742 = vst.msk [vmem:[#allocation4 + $0x88] sm:$0xff] %vm99_vm0, %v4858_v41  ;;  %v2287_v26 = vpop.f32.mrb[17].mxu1  ;;  %v4163_v33 = vsel %vm99_vm0, %v4089_v19, 0.0  ;;  %v5032_v51 = vld [vmem:[%s7669_s0 + $0xa8] sm:$0xff] }
 0x3cb   :  { %v4161_v2 = vsel %vm99_vm0, %v4088_v55, 0.0  ;;  %3833 = vst.msk [vmem:[%s7672_s3 + $0x60] sm:$0xff] %vm99_vm0, %v3769_v16  ;;  %v4026_v32 = vsub.f32 %v3769_v16, %v5025_v27  ;;  %2741 = vst.msk [vmem:[#allocation4 + $0x80] sm:$0xff] %vm99_vm0, %v2287_v26  ;;  %v5033_v62 = vld [vmem:[%s7669_s0 + $0xa0] sm:$0xff] }
 0x3cc   :  { %v4162_v29 = vadd.f32 %v4161_v2, %v4160_v52  ;;  %v4091_v10 = vmul.f32 %v4027_v61, %v4027_v61 }
 0x3cd   :  { %v4090_v50 = vmul.f32 %v4026_v32, %v4026_v32  ;;  %v3772_v15 = vld [vmem:[#allocation4 + $0x78] sm:$0xff]  ;;  %v4861_v38 = vpop.f32.mrb[18].mxu1 }
 0x3ce   :  { %v4164_v28 = vadd.f32 %v4163_v33, %v4162_v29  ;;  %3836 = vst.msk [vmem:[%s7672_s3 + $0x78] sm:$0xff] %vm99_vm0, %v3772_v15  ;;  %v4029_v1 = vsub.f32 %v3772_v15, %v5026_v35  ;;  %v3771_v0 = vld [vmem:[#allocation4 + $0x70] sm:$0xff]  ;;  %2744 = vst.msk [vmem:[#allocation4 + $0x98] sm:$0xff] %vm99_vm0, %v4861_v38  ;;  %v2297_v57 = vpop.f32.mrb[19].mxu1  ;;  %v4167_v34 = vsel %vm99_vm0, %v4091_v10, 0.0  ;;  %v5034_v32 = vld [vmem:[%s7669_s0 + $0xb8] sm:$0xff] }
 0x3cf   :  { %v4165_v63 = vsel %vm99_vm0, %v4090_v50, 0.0  ;;  %3835 = vst.msk [vmem:[%s7672_s3 + $0x70] sm:$0xff] %vm99_vm0, %v3771_v0  ;;  %v4028_v30 = vsub.f32 %v3771_v0, %v5027_v22  ;;  %2743 = vst.msk [vmem:[#allocation4 + $0x90] sm:$0xff] %vm99_vm0, %v2297_v57  ;;  %v5035_v15 = vld [vmem:[%s7669_s0 + $0xb0] sm:$0xff] }
 0x3d0   :  { %v4166_v6 = vadd.f32 %v4165_v63, %v4164_v28  ;;  %v4093_v18 = vmul.f32 %v4029_v1, %v4029_v1 }
 0x3d1   :  { %v4092_v56 = vmul.f32 %v4028_v30, %v4028_v30  ;;  %v3774_v48 = vld [vmem:[#allocation4 + $0x88] sm:$0xff]  ;;  %v4864_v7 = vpop.f32.mrb[20].mxu1 }
 0x3d2   :  { %v4168_v40 = vadd.f32 %v4167_v34, %v4166_v6  ;;  %3838 = vst.msk [vmem:[%s7672_s3 + $0x88] sm:$0xff] %vm99_vm0, %v3774_v48  ;;  %v4031_v45 = vsub.f32 %v3774_v48, %v5028_v54  ;;  %v3773_v4 = vld [vmem:[#allocation4 + $0x80] sm:$0xff]  ;;  %2746 = vst.msk [vmem:[#allocation4 + $0xa8] sm:$0xff] %vm99_vm0, %v4864_v7  ;;  %v2307_v42 = vpop.f32.mrb[21].mxu1  ;;  %v4171_v3 = vsel %vm99_vm0, %v4093_v18, 0.0  ;;  %v5036_v30 = vld [vmem:[%s7669_s0 + $0xc8] sm:$0xff] }
 0x3d3   :  { %v4169_v44 = vsel %vm99_vm0, %v4092_v56, 0.0  ;;  %3837 = vst.msk [vmem:[%s7672_s3 + $0x80] sm:$0xff] %vm99_vm0, %v3773_v4  ;;  %v4030_v49 = vsub.f32 %v3773_v4, %v5029_v37  ;;  %2745 = vst.msk [vmem:[#allocation4 + $0xa0] sm:$0xff] %vm99_vm0, %v2307_v42  ;;  %v5037_v48 = vld [vmem:[%s7669_s0 + $0xc0] sm:$0xff] }
 0x3d4   :  { %v4170_v11 = vadd.f32 %v4169_v44, %v4168_v40  ;;  %v4095_v47 = vmul.f32 %v4031_v45, %v4031_v45 }
 0x3d5   :  { %v4094_v59 = vmul.f32 %v4030_v49, %v4030_v49  ;;  %v3776_v5 = vld [vmem:[#allocation4 + $0x98] sm:$0xff]  ;;  %v4867_v31 = vpop.f32.mrb[22].mxu1 }
 0x3d6   :  { %v4172_v24 = vadd.f32 %v4171_v3, %v4170_v11  ;;  %3840 = vst.msk [vmem:[%s7672_s3 + $0x98] sm:$0xff] %vm99_vm0, %v3776_v5  ;;  %v4033_v39 = vsub.f32 %v3776_v5, %v5030_v9  ;;  %v3775_v17 = vld [vmem:[#allocation4 + $0x90] sm:$0xff]  ;;  %2748 = vst.msk [vmem:[#allocation4 + $0xb8] sm:$0xff] %vm99_vm0, %v4867_v31  ;;  %v2317_v60 = vpop.f32.mrb[23].mxu1  ;;  %v4175_v53 = vsel %vm99_vm0, %v4095_v47, 0.0  ;;  %v5038_v49 = vld [vmem:[%s7669_s0 + $0xd8] sm:$0xff] }
 0x3d7   :  { %v4173_v25 = vsel %vm99_vm0, %v4094_v59, 0.0  ;;  %3839 = vst.msk [vmem:[%s7672_s3 + $0x90] sm:$0xff] %vm99_vm0, %v3775_v17  ;;  %v4032_v23 = vsub.f32 %v3775_v17, %v5031_v43  ;;  %2747 = vst.msk [vmem:[#allocation4 + $0xb0] sm:$0xff] %vm99_vm0, %v2317_v60  ;;  %v5039_v5 = vld [vmem:[%s7669_s0 + $0xd0] sm:$0xff] }
 0x3d8   :  { %v4174_v36 = vadd.f32 %v4173_v25, %v4172_v24  ;;  %v4097_v14 = vmul.f32 %v4033_v39, %v4033_v39 }
 0x3d9   :  { %v4096_v8 = vmul.f32 %v4032_v23, %v4032_v23  ;;  %v3778_v46 = vld [vmem:[#allocation4 + $0xa8] sm:$0xff]  ;;  %v4870_v58 = vpop.f32.mrb[24].mxu1 }
 0x3da   :  { %v4176_v20 = vadd.f32 %v4175_v53, %v4174_v36  ;;  %3842 = vst.msk [vmem:[%s7672_s3 + $0xa8] sm:$0xff] %vm99_vm0, %v3778_v46  ;;  %v4035_v13 = vsub.f32 %v3778_v46, %v5032_v51  ;;  %v3777_v12 = vld [vmem:[#allocation4 + $0xa0] sm:$0xff]  ;;  %2750 = vst.msk [vmem:[#allocation4 + $0xc8] sm:$0xff] %vm99_vm0, %v4870_v58  ;;  %v2327_v19 = vpop.f32.mrb[25].mxu1  ;;  %v4179_v21 = vsel %vm99_vm0, %v4097_v14, 0.0  ;;  %v5040_v23 = vld [vmem:[%s7669_s0 + $0xe8] sm:$0xff] }
 0x3db   :  { %v4177_v55 = vsel %vm99_vm0, %v4096_v8, 0.0  ;;  %3841 = vst.msk [vmem:[%s7672_s3 + $0xa0] sm:$0xff] %vm99_vm0, %v3777_v12  ;;  %v4034_v41 = vsub.f32 %v3777_v12, %v5033_v62  ;;  %2749 = vst.msk [vmem:[#allocation4 + $0xc0] sm:$0xff] %vm99_vm0, %v2327_v19  ;;  %v5041_v46 = vld [vmem:[%s7669_s0 + $0xe0] sm:$0xff] }
 0x3dc   :  { %v4178_v52 = vadd.f32 %v4177_v55, %v4176_v20  ;;  %v4099_v61 = vmul.f32 %v4035_v13, %v4035_v13 }
 0x3dd   :  { %v4098_v16 = vmul.f32 %v4034_v41, %v4034_v41  ;;  %v3780_v26 = vld [vmem:[#allocation4 + $0xb8] sm:$0xff]  ;;  %v4873_v2 = vpop.f32.mrb[26].mxu1 }
 0x3de   :  { %v4180_v27 = vadd.f32 %v4179_v21, %v4178_v52  ;;  %3844 = vst.msk [vmem:[%s7672_s3 + $0xb8] sm:$0xff] %vm99_vm0, %v3780_v26  ;;  %v4037_v29 = vsub.f32 %v3780_v26, %v5034_v32  ;;  %v3779_v33 = vld [vmem:[#allocation4 + $0xb0] sm:$0xff]  ;;  %2752 = vst.msk [vmem:[#allocation4 + $0xd8] sm:$0xff] %vm99_vm0, %v4873_v2  ;;  %v2337_v10 = vpop.f32.mrb[27].mxu1  ;;  %v4183_v35 = vsel %vm99_vm0, %v4099_v61, 0.0  ;;  %v5042_v41 = vld [vmem:[%s7669_s0 + $0xf8] sm:$0xff] }
 0x3df   :  { %v4181_v50 = vsel %vm99_vm0, %v4098_v16, 0.0  ;;  %3843 = vst.msk [vmem:[%s7672_s3 + $0xb0] sm:$0xff] %vm99_vm0, %v3779_v33  ;;  %v4036_v38 = vsub.f32 %v3779_v33, %v5035_v15  ;;  %2751 = vst.msk [vmem:[#allocation4 + $0xd0] sm:$0xff] %vm99_vm0, %v2337_v10  ;;  %v5043_v26 = vld [vmem:[%s7669_s0 + $0xf0] sm:$0xff] }
 0x3e0   :  { %v4182_v28 = vadd.f32 %v4181_v50, %v4180_v27  ;;  %v4101_v1 = vmul.f32 %v4037_v29, %v4037_v29 }
 0x3e1   :  { %v4100_v0 = vmul.f32 %v4036_v38, %v4036_v38  ;;  %v3782_v57 = vld [vmem:[#allocation4 + $0xc8] sm:$0xff]  ;;  %v4876_v63 = vpop.f32.mrb[28].mxu1 }
 0x3e2   :  { %v4184_v22 = vadd.f32 %v4183_v35, %v4182_v28  ;;  %3846 = vst.msk [vmem:[%s7672_s3 + $0xc8] sm:$0xff] %vm99_vm0, %v3782_v57  ;;  %v4039_v6 = vsub.f32 %v3782_v57, %v5036_v30  ;;  %v3781_v34 = vld [vmem:[#allocation4 + $0xc0] sm:$0xff]  ;;  %2754 = vst.msk [vmem:[#allocation4 + $0xe8] sm:$0xff] %vm99_vm0, %v4876_v63  ;;  %v2347_v18 = vpop.f32.mrb[29].mxu1  ;;  %v4187_v54 = vsel %vm99_vm0, %v4101_v1, 0.0  ;;  %v5044_v38 = vld [vmem:[%s7669_s0 + $0x108] sm:$0xff] }
 0x3e3   :  { %v4185_v56 = vsel %vm99_vm0, %v4100_v0, 0.0  ;;  %3845 = vst.msk [vmem:[%s7672_s3 + $0xc0] sm:$0xff] %vm99_vm0, %v3781_v34  ;;  %v4038_v7 = vsub.f32 %v3781_v34, %v5037_v48  ;;  %2753 = vst.msk [vmem:[#allocation4 + $0xe0] sm:$0xff] %vm99_vm0, %v2347_v18  ;;  %v5045_v57 = vld [vmem:[%s7669_s0 + $0x100] sm:$0xff] }
 0x3e4   :  { %v4186_v40 = vadd.f32 %v4185_v56, %v4184_v22  ;;  %v4103_v45 = vmul.f32 %v4039_v6, %v4039_v6 }
 0x3e5   :  { %v4102_v4 = vmul.f32 %v4038_v7, %v4038_v7  ;;  %v3784_v42 = vld [vmem:[#allocation4 + $0xd8] sm:$0xff]  ;;  %v4879_v44 = vpop.f32.mrb[30].mxu1 }
 0x3e6   :  { %v4188_v37 = vadd.f32 %v4187_v54, %v4186_v40  ;;  %3848 = vst.msk [vmem:[%s7672_s3 + $0xd8] sm:$0xff] %vm99_vm0, %v3784_v42  ;;  %v4041_v11 = vsub.f32 %v3784_v42, %v5038_v49  ;;  %v3783_v3 = vld [vmem:[#allocation4 + $0xd0] sm:$0xff]  ;;  %2756 = vst.msk [vmem:[#allocation4 + $0xf8] sm:$0xff] %vm99_vm0, %v4879_v44  ;;  %v2357_v47 = vpop.f32.mrb[31].mxu1  ;;  %v4191_v9 = vsel %vm99_vm0, %v4103_v45, 0.0  ;;  %v5046_v7 = vld [vmem:[%s7669_s0 + $0x118] sm:$0xff] }
 0x3e7   :  { %v4189_v59 = vsel %vm99_vm0, %v4102_v4, 0.0  ;;  %3847 = vst.msk [vmem:[%s7672_s3 + $0xd0] sm:$0xff] %vm99_vm0, %v3783_v3  ;;  %v4040_v31 = vsub.f32 %v3783_v3, %v5039_v5  ;;  %2755 = vst.msk [vmem:[#allocation4 + $0xf0] sm:$0xff] %vm99_vm0, %v2357_v47  ;;  %v5047_v42 = vld [vmem:[%s7669_s0 + $0x110] sm:$0xff] }
 0x3e8   :  { %v4190_v24 = vadd.f32 %v4189_v59, %v4188_v37  ;;  %v4105_v39 = vmul.f32 %v4041_v11, %v4041_v11 }
 0x3e9   :  { %v4104_v17 = vmul.f32 %v4040_v31, %v4040_v31  ;;  %v3786_v60 = vld [vmem:[#allocation4 + $0xe8] sm:$0xff]  ;;  %v4882_v25 = vpop.f32.mrb[32].mxu1 }
 0x3ea   :  { %v4192_v43 = vadd.f32 %v4191_v9, %v4190_v24  ;;  %3850 = vst.msk [vmem:[%s7672_s3 + $0xe8] sm:$0xff] %vm99_vm0, %v3786_v60  ;;  %v4043_v36 = vsub.f32 %v3786_v60, %v5040_v23  ;;  %v3785_v53 = vld [vmem:[#allocation4 + $0xe0] sm:$0xff]  ;;  %2758 = vst.msk [vmem:[#allocation4 + $0x108] sm:$0xff] %vm99_vm0, %v4882_v25  ;;  %v2367_v14 = vpop.f32.mrb[33].mxu1  ;;  %v4195_v51 = vsel %vm99_vm0, %v4105_v39, 0.0  ;;  %v5048_v31 = vld [vmem:[%s7669_s0 + $0x128] sm:$0xff] }
 0x3eb   :  { %v4193_v8 = vsel %vm99_vm0, %v4104_v17, 0.0  ;;  %3849 = vst.msk [vmem:[%s7672_s3 + $0xe0] sm:$0xff] %vm99_vm0, %v3785_v53  ;;  %v4042_v58 = vsub.f32 %v3785_v53, %v5041_v46  ;;  %2757 = vst.msk [vmem:[#allocation4 + $0x100] sm:$0xff] %vm99_vm0, %v2367_v14  ;;  %v5049_v60 = vld [vmem:[%s7669_s0 + $0x120] sm:$0xff] }
 0x3ec   :  { %v4194_v20 = vadd.f32 %v4193_v8, %v4192_v43  ;;  %v4107_v13 = vmul.f32 %v4043_v36, %v4043_v36 }
 0x3ed   :  { %v4106_v12 = vmul.f32 %v4042_v58, %v4042_v58  ;;  %v3788_v19 = vld [vmem:[#allocation4 + $0xf8] sm:$0xff]  ;;  %v4885_v55 = vpop.f32.mrb[34].mxu1 }
 0x3ee   :  { %v4196_v62 = vadd.f32 %v4195_v51, %v4194_v20  ;;  %3852 = vst.msk [vmem:[%s7672_s3 + $0xf8] sm:$0xff] %vm99_vm0, %v3788_v19  ;;  %v4045_v52 = vsub.f32 %v3788_v19, %v5042_v41  ;;  %v3787_v21 = vld [vmem:[#allocation4 + $0xf0] sm:$0xff]  ;;  %2760 = vst.msk [vmem:[#allocation4 + $0x118] sm:$0xff] %vm99_vm0, %v4885_v55  ;;  %v2377_v61 = vpop.f32.mrb[35].mxu1  ;;  %v4199_v32 = vsel %vm99_vm0, %v4107_v13, 0.0  ;;  %v5050_v58 = vld [vmem:[%s7669_s0 + $0x138] sm:$0xff] }
 0x3ef   :  { %v4197_v16 = vsel %vm99_vm0, %v4106_v12, 0.0  ;;  %3851 = vst.msk [vmem:[%s7672_s3 + $0xf0] sm:$0xff] %vm99_vm0, %v3787_v21  ;;  %v4044_v2 = vsub.f32 %v3787_v21, %v5043_v26  ;;  %2759 = vst.msk [vmem:[#allocation4 + $0x110] sm:$0xff] %vm99_vm0, %v2377_v61  ;;  %v5051_v19 = vld [vmem:[%s7669_s0 + $0x130] sm:$0xff] }
 0x3f0   :  { %v4198_v27 = vadd.f32 %v4197_v16, %v4196_v62  ;;  %v4109_v29 = vmul.f32 %v4045_v52, %v4045_v52 }
 0x3f1   :  { %v4108_v33 = vmul.f32 %v4044_v2, %v4044_v2  ;;  %v3790_v10 = vld [vmem:[#allocation4 + $0x108] sm:$0xff]  ;;  %v4888_v50 = vpop.f32.mrb[36].mxu1 }
 0x3f2   :  { %v4200_v15 = vadd.f32 %v4199_v32, %v4198_v27  ;;  %3854 = vst.msk [vmem:[%s7672_s3 + $0x108] sm:$0xff] %vm99_vm0, %v3790_v10  ;;  %v4047_v28 = vsub.f32 %v3790_v10, %v5044_v38  ;;  %v3789_v35 = vld [vmem:[#allocation4 + $0x100] sm:$0xff]  ;;  %2762 = vst.msk [vmem:[#allocation4 + $0x128] sm:$0xff] %vm99_vm0, %v4888_v50  ;;  %v2387_v1 = vpop.f32.mrb[37].mxu1  ;;  %v4203_v30 = vsel %vm99_vm0, %v4109_v29, 0.0  ;;  %v5052_v2 = vld [vmem:[%s7669_s0 + $0x148] sm:$0xff] }
 0x3f3   :  { %v4201_v0 = vsel %vm99_vm0, %v4108_v33, 0.0  ;;  %3853 = vst.msk [vmem:[%s7672_s3 + $0x100] sm:$0xff] %vm99_vm0, %v3789_v35  ;;  %v4046_v63 = vsub.f32 %v3789_v35, %v5045_v57  ;;  %2761 = vst.msk [vmem:[#allocation4 + $0x120] sm:$0xff] %vm99_vm0, %v2387_v1  ;;  %v5053_v10 = vld [vmem:[%s7669_s0 + $0x140] sm:$0xff] }
 0x3f4   :  { %v4202_v22 = vadd.f32 %v4201_v0, %v4200_v15  ;;  %v4111_v6 = vmul.f32 %v4047_v28, %v4047_v28 }
 0x3f5   :  { %v4110_v34 = vmul.f32 %v4046_v63, %v4046_v63  ;;  %v3792_v18 = vld [vmem:[#allocation4 + $0x118] sm:$0xff]  ;;  %v4891_v56 = vpop.f32.mrb[38].mxu1 }
 0x3f6   :  { %v4204_v48 = vadd.f32 %v4203_v30, %v4202_v22  ;;  %3856 = vst.msk [vmem:[%s7672_s3 + $0x118] sm:$0xff] %vm99_vm0, %v3792_v18  ;;  %v4049_v40 = vsub.f32 %v3792_v18, %v5046_v7  ;;  %v3791_v54 = vld [vmem:[#allocation4 + $0x110] sm:$0xff]  ;;  %2764 = vst.msk [vmem:[#allocation4 + $0x138] sm:$0xff] %vm99_vm0, %v4891_v56  ;;  %v2397_v45 = vpop.f32.mrb[39].mxu1  ;;  %v4207_v49 = vsel %vm99_vm0, %v4111_v6, 0.0  ;;  %v5054_v63 = vld [vmem:[%s7669_s0 + $0x158] sm:$0xff] }
 0x3f7   :  { %v4205_v4 = vsel %vm99_vm0, %v4110_v34, 0.0  ;;  %3855 = vst.msk [vmem:[%s7672_s3 + $0x110] sm:$0xff] %vm99_vm0, %v3791_v54  ;;  %v4048_v44 = vsub.f32 %v3791_v54, %v5047_v42  ;;  %2763 = vst.msk [vmem:[#allocation4 + $0x130] sm:$0xff] %vm99_vm0, %v2397_v45  ;;  %v5055_v18 = vld [vmem:[%s7669_s0 + $0x150] sm:$0xff] }
 0x3f8   :  { %v4206_v37 = vadd.f32 %v4205_v4, %v4204_v48  ;;  %v4113_v11 = vmul.f32 %v4049_v40, %v4049_v40 }
 0x3f9   :  { %v4112_v3 = vmul.f32 %v4048_v44, %v4048_v44  ;;  %v3794_v47 = vld [vmem:[#allocation4 + $0x128] sm:$0xff]  ;;  %v4894_v59 = vpop.f32.mrb[40].mxu1 }
 0x3fa   :  { %v4208_v5 = vadd.f32 %v4207_v49, %v4206_v37  ;;  %3858 = vst.msk [vmem:[%s7672_s3 + $0x128] sm:$0xff] %vm99_vm0, %v3794_v47  ;;  %v4051_v24 = vsub.f32 %v3794_v47, %v5048_v31  ;;  %v3793_v9 = vld [vmem:[#allocation4 + $0x120] sm:$0xff]  ;;  %2766 = vst.msk [vmem:[#allocation4 + $0x148] sm:$0xff] %vm99_vm0, %v4894_v59  ;;  %v2407_v39 = vpop.f32.mrb[41].mxu1  ;;  %v4211_v23 = vsel %vm99_vm0, %v4113_v11, 0.0  ;;  %v5056_v44 = vld [vmem:[%s7669_s0 + $0x168] sm:$0xff] }
 0x3fb   :  { %v4209_v17 = vsel %vm99_vm0, %v4112_v3, 0.0  ;;  %3857 = vst.msk [vmem:[%s7672_s3 + $0x120] sm:$0xff] %vm99_vm0, %v3793_v9  ;;  %v4050_v25 = vsub.f32 %v3793_v9, %v5049_v60  ;;  %2765 = vst.msk [vmem:[#allocation4 + $0x140] sm:$0xff] %vm99_vm0, %v2407_v39  ;;  %v5057_v47 = vld [vmem:[%s7669_s0 + $0x160] sm:$0xff] }
 0x3fc   :  { %v4210_v43 = vadd.f32 %v4209_v17, %v4208_v5  ;;  %v4115_v36 = vmul.f32 %v4051_v24, %v4051_v24 }
 0x3fd   :  { %v4114_v53 = vmul.f32 %v4050_v25, %v4050_v25  ;;  %v3796_v14 = vld [vmem:[#allocation4 + $0x138] sm:$0xff]  ;;  %v4897_v8 = vpop.f32.mrb[42].mxu1 }
 0x3fe   :  { %v4212_v46 = vadd.f32 %v4211_v23, %v4210_v43  ;;  %3860 = vst.msk [vmem:[%s7672_s3 + $0x138] sm:$0xff] %vm99_vm0, %v3796_v14  ;;  %v4053_v20 = vsub.f32 %v3796_v14, %v5050_v58  ;;  %v3795_v51 = vld [vmem:[#allocation4 + $0x130] sm:$0xff]  ;;  %2768 = vst.msk [vmem:[#allocation4 + $0x158] sm:$0xff] %vm99_vm0, %v4897_v8  ;;  %v2417_v13 = vpop.f32.mrb[43].mxu1  ;;  %v4215_v41 = vsel %vm99_vm0, %v4115_v36, 0.0  ;;  %v5058_v25 = vld [vmem:[%s7669_s0 + $0x178] sm:$0xff] }
 0x3ff   :  { %v4213_v12 = vsel %vm99_vm0, %v4114_v53, 0.0  ;;  %3859 = vst.msk [vmem:[%s7672_s3 + $0x130] sm:$0xff] %vm99_vm0, %v3795_v51  ;;  %v4052_v55 = vsub.f32 %v3795_v51, %v5051_v19  ;;  %2767 = vst.msk [vmem:[#allocation4 + $0x150] sm:$0xff] %vm99_vm0, %v2417_v13  ;;  %v5059_v14 = vld [vmem:[%s7669_s0 + $0x170] sm:$0xff] }
 0x400   :  { %v4214_v62 = vadd.f32 %v4213_v12, %v4212_v46  ;;  %v4117_v52 = vmul.f32 %v4053_v20, %v4053_v20 }
 0x401   :  { %v4116_v21 = vmul.f32 %v4052_v55, %v4052_v55  ;;  %v3798_v61 = vld [vmem:[#allocation4 + $0x148] sm:$0xff]  ;;  %v4900_v16 = vpop.f32.mrb[44].mxu1 }
 0x402   :  { %v4216_v26 = vadd.f32 %v4215_v41, %v4214_v62  ;;  %3862 = vst.msk [vmem:[%s7672_s3 + $0x148] sm:$0xff] %vm99_vm0, %v3798_v61  ;;  %v4055_v27 = vsub.f32 %v3798_v61, %v5052_v2  ;;  %v3797_v32 = vld [vmem:[#allocation4 + $0x140] sm:$0xff]  ;;  %2770 = vst.msk [vmem:[#allocation4 + $0x168] sm:$0xff] %vm99_vm0, %v4900_v16  ;;  %v2427_v29 = vpop.f32.mrb[45].mxu1  ;;  %v4219_v38 = vsel %vm99_vm0, %v4117_v52, 0.0  ;;  %v5060_v55 = vld [vmem:[%s7669_s0 + $0x188] sm:$0xff] }
 0x403   :  { %v4217_v33 = vsel %vm99_vm0, %v4116_v21, 0.0  ;;  %3861 = vst.msk [vmem:[%s7672_s3 + $0x140] sm:$0xff] %vm99_vm0, %v3797_v32  ;;  %v4054_v50 = vsub.f32 %v3797_v32, %v5053_v10  ;;  %2769 = vst.msk [vmem:[#allocation4 + $0x160] sm:$0xff] %vm99_vm0, %v2427_v29  ;;  %v5061_v61 = vld [vmem:[%s7669_s0 + $0x180] sm:$0xff] }
 0x404   :  { %v4218_v15 = vadd.f32 %v4217_v33, %v4216_v26  ;;  %v4119_v28 = vmul.f32 %v4055_v27, %v4055_v27 }
 0x405   :  { %v4118_v35 = vmul.f32 %v4054_v50, %v4054_v50  ;;  %v3800_v1 = vld [vmem:[#allocation4 + $0x158] sm:$0xff]  ;;  %v4903_v0 = vpop.f32.mrb[46].mxu1 }
 0x406   :  { %v4220_v57 = vadd.f32 %v4219_v38, %v4218_v15  ;;  %3864 = vst.msk [vmem:[%s7672_s3 + $0x158] sm:$0xff] %vm99_vm0, %v3800_v1  ;;  %v4057_v22 = vsub.f32 %v3800_v1, %v5054_v63  ;;  %v3799_v30 = vld [vmem:[#allocation4 + $0x150] sm:$0xff]  ;;  %2772 = vst.msk [vmem:[#allocation4 + $0x178] sm:$0xff] %vm99_vm0, %v4903_v0  ;;  %v2437_v6 = vpop.f32.mrb[47].mxu1  ;;  %v4223_v7 = vsel %vm99_vm0, %v4119_v28, 0.0  ;;  %v5062_v15 = vld [vmem:[%s7669_s0 + $0x198] sm:$0xff] }
 0x407   :  { %v4221_v34 = vsel %vm99_vm0, %v4118_v35, 0.0  ;;  %3863 = vst.msk [vmem:[%s7672_s3 + $0x150] sm:$0xff] %vm99_vm0, %v3799_v30  ;;  %v4056_v56 = vsub.f32 %v3799_v30, %v5055_v18  ;;  %2771 = vst.msk [vmem:[#allocation4 + $0x170] sm:$0xff] %vm99_vm0, %v2437_v6  ;;  %v5063_v35 = vld [vmem:[%s7669_s0 + $0x190] sm:$0xff] }
 0x408   :  { %v4222_v48 = vadd.f32 %v4221_v34, %v4220_v57  ;;  %v4121_v40 = vmul.f32 %v4057_v22, %v4057_v22 }
 0x409   :  { %v4120_v54 = vmul.f32 %v4056_v56, %v4056_v56  ;;  %v3802_v45 = vld [vmem:[#allocation4 + $0x168] sm:$0xff]  ;;  %v4906_v4 = vpop.f32.mrb[48].mxu1 }
 0x40a   :  { %v4224_v42 = vadd.f32 %v4223_v7, %v4222_v48  ;;  %3866 = vst.msk [vmem:[%s7672_s3 + $0x168] sm:$0xff] %vm99_vm0, %v3802_v45  ;;  %v4059_v37 = vsub.f32 %v3802_v45, %v5056_v44  ;;  %v3801_v49 = vld [vmem:[#allocation4 + $0x160] sm:$0xff]  ;;  %2774 = vst.msk [vmem:[#allocation4 + $0x188] sm:$0xff] %vm99_vm0, %v4906_v4  ;;  %v2447_v11 = vpop.f32.mrb[49].mxu1  ;;  %v4227_v31 = vsel %vm99_vm0, %v4121_v40, 0.0  ;;  %v5064_v48 = vld [vmem:[%s7669_s0 + $0x1a8] sm:$0xff] }
 0x40b   :  { %v4225_v3 = vsel %vm99_vm0, %v4120_v54, 0.0  ;;  %3865 = vst.msk [vmem:[%s7672_s3 + $0x160] sm:$0xff] %vm99_vm0, %v3801_v49  ;;  %v4058_v59 = vsub.f32 %v3801_v49, %v5057_v47  ;;  %2773 = vst.msk [vmem:[#allocation4 + $0x180] sm:$0xff] %vm99_vm0, %v2447_v11  ;;  %v5065_v54 = vld [vmem:[%s7669_s0 + $0x1a0] sm:$0xff] }
 0x40c   :  { %v4226_v5 = vadd.f32 %v4225_v3, %v4224_v42  ;;  %v4123_v24 = vmul.f32 %v4059_v37, %v4059_v37 }
 0x40d   :  { %v4122_v9 = vmul.f32 %v4058_v59, %v4058_v59  ;;  %v3804_v39 = vld [vmem:[#allocation4 + $0x178] sm:$0xff]  ;;  %v4909_v17 = vpop.f32.mrb[50].mxu1 }
 0x40e   :  { %v4228_v60 = vadd.f32 %v4227_v31, %v4226_v5  ;;  %3868 = vst.msk [vmem:[%s7672_s3 + $0x178] sm:$0xff] %vm99_vm0, %v3804_v39  ;;  %v4061_v43 = vsub.f32 %v3804_v39, %v5058_v25  ;;  %v3803_v23 = vld [vmem:[#allocation4 + $0x170] sm:$0xff]  ;;  %2776 = vst.msk [vmem:[#allocation4 + $0x198] sm:$0xff] %vm99_vm0, %v4909_v17  ;;  %v2457_v36 = vpop.f32.mrb[51].mxu1  ;;  %v4231_v58 = vsel %vm99_vm0, %v4123_v24, 0.0  ;;  %v5066_v5 = vld [vmem:[%s7669_s0 + $0x1b8] sm:$0xff] }
 0x40f   :  { %v4229_v53 = vsel %vm99_vm0, %v4122_v9, 0.0  ;;  %3867 = vst.msk [vmem:[%s7672_s3 + $0x170] sm:$0xff] %vm99_vm0, %v3803_v23  ;;  %v4060_v8 = vsub.f32 %v3803_v23, %v5059_v14  ;;  %2775 = vst.msk [vmem:[#allocation4 + $0x190] sm:$0xff] %vm99_vm0, %v2457_v36  ;;  %v5067_v9 = vld [vmem:[%s7669_s0 + $0x1b0] sm:$0xff] }
 0x410   :  { %v4230_v46 = vadd.f32 %v4229_v53, %v4228_v60  ;;  %v4125_v20 = vmul.f32 %v4061_v43, %v4061_v43 }
 0x411   :  { %v4124_v51 = vmul.f32 %v4060_v8, %v4060_v8  ;;  %v3806_v13 = vld [vmem:[#allocation4 + $0x188] sm:$0xff]  ;;  %v4912_v12 = vpop.f32.mrb[52].mxu1 }
 0x412   :  { %v4232_v19 = vadd.f32 %v4231_v58, %v4230_v46  ;;  %3870 = vst.msk [vmem:[%s7672_s3 + $0x188] sm:$0xff] %vm99_vm0, %v3806_v13  ;;  %v4063_v62 = vsub.f32 %v3806_v13, %v5060_v55  ;;  %v3805_v41 = vld [vmem:[#allocation4 + $0x180] sm:$0xff]  ;;  %2778 = vst.msk [vmem:[#allocation4 + $0x1a8] sm:$0xff] %vm99_vm0, %v4912_v12  ;;  %v2467_v52 = vpop.f32.mrb[53].mxu1  ;;  %v4235_v2 = vsel %vm99_vm0, %v4125_v20, 0.0  ;;  %v5068_v46 = vld [vmem:[%s7669_s0 + $0x1c8] sm:$0xff] }
 0x413   :  { %v4233_v21 = vsel %vm99_vm0, %v4124_v51, 0.0  ;;  %3869 = vst.msk [vmem:[%s7672_s3 + $0x180] sm:$0xff] %vm99_vm0, %v3805_v41  ;;  %v4062_v16 = vsub.f32 %v3805_v41, %v5061_v61  ;;  %2777 = vst.msk [vmem:[#allocation4 + $0x1a0] sm:$0xff] %vm99_vm0, %v2467_v52  ;;  %v5069_v51 = vld [vmem:[%s7669_s0 + $0x1c0] sm:$0xff] }
 0x414   :  { %v4234_v26 = vadd.f32 %v4233_v21, %v4232_v19  ;;  %v4127_v27 = vmul.f32 %v4063_v62, %v4063_v62 }
 0x415   :  { %v4126_v32 = vmul.f32 %v4062_v16, %v4062_v16  ;;  %v4915_v29 = vpop.f32.mrb[54].mxu1  ;;  %v3808_v33 = vld [vmem:[#allocation4 + $0x198] sm:$0xff] }
 0x416   :  { %v3807_v10 = vld [vmem:[#allocation4 + $0x190] sm:$0xff]  ;;  %2780 = vst.msk [vmem:[#allocation4 + $0x1b8] sm:$0xff] %vm99_vm0, %v4915_v29  ;;  %v2477_v50 = vpop.f32.mrb[55].mxu1  ;;  %3872 = vst.msk [vmem:[%s7672_s3 + $0x198] sm:$0xff] %vm99_vm0, %v3808_v33  ;;  %v4065_v38 = vsub.f32 %v3808_v33, %v5062_v15  ;;  %v4236_v28 = vadd.f32 %v4235_v2, %v4234_v26  ;;  %v4239_v34 = vsel %vm99_vm0, %v4127_v27, 0.0  ;;  %v5070_v26 = vld [vmem:[%s7669_s0 + $0x1d8] sm:$0xff] }
 0x417   :  { %3871 = vst.msk [vmem:[%s7672_s3 + $0x190] sm:$0xff] %vm99_vm0, %v3807_v10  ;;  %2779 = vst.msk [vmem:[#allocation4 + $0x1b0] sm:$0xff] %vm99_vm0, %v2477_v50  ;;  %v4064_v1 = vsub.f32 %v3807_v10, %v5063_v35  ;;  %v4237_v0 = vsel %vm99_vm0, %v4126_v32, 0.0  ;;  %v5071_v32 = vld [vmem:[%s7669_s0 + $0x1d0] sm:$0xff] }
 0x418   :  { %v4238_v57 = vadd.f32 %v4237_v0, %v4236_v28  ;;  %v4129_v6 = vmul.f32 %v4065_v38, %v4065_v38 }
 0x419   :  { %v4918_v63 = vpop.f32.mrb[56].mxu1  ;;  %v3810_v22 = vld [vmem:[#allocation4 + $0x1a8] sm:$0xff]  ;;  %v4128_v30 = vmul.f32 %v4064_v1, %v4064_v1 }
 0x41a   :  { %2782 = vst.msk [vmem:[#allocation4 + $0x1c8] sm:$0xff] %vm99_vm0, %v4918_v63  ;;  %v2487_v18 = vpop.f32.mrb[57].mxu1  ;;  %v3809_v56 = vld [vmem:[#allocation4 + $0x1a0] sm:$0xff]  ;;  %3874 = vst.msk [vmem:[%s7672_s3 + $0x1a8] sm:$0xff] %vm99_vm0, %v3810_v22  ;;  %v4067_v7 = vsub.f32 %v3810_v22, %v5064_v48  ;;  %v4240_v40 = vadd.f32 %v4239_v34, %v4238_v57  ;;  %v4243_v3 = vsel %vm99_vm0, %v4129_v6, 0.0  ;;  %v5072_v1 = vld [vmem:[%s7669_s0 + $0x1e8] sm:$0xff] }
 0x41b   :  { %2781 = vst.msk [vmem:[#allocation4 + $0x1c0] sm:$0xff] %vm99_vm0, %v2487_v18  ;;  %3873 = vst.msk [vmem:[%s7672_s3 + $0x1a0] sm:$0xff] %vm99_vm0, %v3809_v56  ;;  %v4066_v45 = vsub.f32 %v3809_v56, %v5065_v54  ;;  %v4241_v4 = vsel %vm99_vm0, %v4128_v30, 0.0  ;;  %v5073_v63 = vld [vmem:[%s7669_s0 + $0x1e0] sm:$0xff] }
 0x41c   :  { %v4242_v42 = vadd.f32 %v4241_v4, %v4240_v40  ;;  %v4131_v11 = vmul.f32 %v4067_v7, %v4067_v7  ;;  %v5074_v40 = vld [vmem:[%s7669_s0 + $0x1f8] sm:$0xff]  ;;  %v5075_v4 = vld [vmem:[%s7669_s0 + $0x1f0] sm:$0xff]  ;;  %s5101_s0 = smov [#allocation5]  }
 0x41d   :  { %v4921_v44 = vpop.f32.mrb[58].mxu1  ;;  %v3812_v37 = vld [vmem:[#allocation4 + $0x1b8] sm:$0xff]  ;;  %v4130_v49 = vmul.f32 %v4066_v45, %v4066_v45 }
 0x41e   :  { %2784 = vst.msk [vmem:[#allocation4 + $0x1d8] sm:$0xff] %vm99_vm0, %v4921_v44  ;;  %v2497_v47 = vpop.f32.mrb[59].mxu1  ;;  %v3811_v59 = vld [vmem:[#allocation4 + $0x1b0] sm:$0xff]  ;;  %3876 = vst.msk [vmem:[%s7672_s3 + $0x1b8] sm:$0xff] %vm99_vm0, %v3812_v37  ;;  %v4069_v31 = vsub.f32 %v3812_v37, %v5066_v5  ;;  %v4244_v24 = vadd.f32 %v4243_v3, %v4242_v42  ;;  %v4247_v53 = vsel %vm99_vm0, %v4131_v11, 0.0 }
 0x41f   :  { %2783 = vst.msk [vmem:[#allocation4 + $0x1d0] sm:$0xff] %vm99_vm0, %v2497_v47  ;;  %3875 = vst.msk [vmem:[%s7672_s3 + $0x1b0] sm:$0xff] %vm99_vm0, %v3811_v59  ;;  %v4068_v39 = vsub.f32 %v3811_v59, %v5067_v9  ;;  %v4245_v17 = vsel %vm99_vm0, %v4130_v49, 0.0 }
 0x420   :  { %v4246_v60 = vadd.f32 %v4245_v17, %v4244_v24  ;;  %v4133_v36 = vmul.f32 %v4069_v31, %v4069_v31 }
 0x421   :  { %v4924_v25 = vpop.f32.mrb[60].mxu1  ;;  %v3814_v43 = vld [vmem:[#allocation4 + $0x1c8] sm:$0xff]  ;;  %v4132_v23 = vmul.f32 %v4068_v39, %v4068_v39 }
 0x422   :  { %2786 = vst.msk [vmem:[#allocation4 + $0x1e8] sm:$0xff] %vm99_vm0, %v4924_v25  ;;  %v2507_v14 = vpop.f32.mrb[61].mxu1  ;;  %v3813_v8 = vld [vmem:[#allocation4 + $0x1c0] sm:$0xff]  ;;  %3878 = vst.msk [vmem:[%s7672_s3 + $0x1c8] sm:$0xff] %vm99_vm0, %v3814_v43  ;;  %v4071_v58 = vsub.f32 %v3814_v43, %v5068_v46  ;;  %v4248_v20 = vadd.f32 %v4247_v53, %v4246_v60  ;;  %v4251_v21 = vsel %vm99_vm0, %v4133_v36, 0.0 }
 0x423   :  { %2785 = vst.msk [vmem:[#allocation4 + $0x1e0] sm:$0xff] %vm99_vm0, %v2507_v14  ;;  %3877 = vst.msk [vmem:[%s7672_s3 + $0x1c0] sm:$0xff] %vm99_vm0, %v3813_v8  ;;  %v4070_v13 = vsub.f32 %v3813_v8, %v5069_v51  ;;  %v4249_v12 = vsel %vm99_vm0, %v4132_v23, 0.0 }
 0x424   :  { %v4250_v19 = vadd.f32 %v4249_v12, %v4248_v20  ;;  %v4135_v52 = vmul.f32 %v4071_v58, %v4071_v58 }
 0x425   :  { %v4927_v55 = vpop.f32.mrb[62].mxu1  ;;  %v3816_v62 = vld [vmem:[#allocation4 + $0x1d8] sm:$0xff]  ;;  %v4134_v41 = vmul.f32 %v4070_v13, %v4070_v13 }
 0x426   :  { %2788 = vst.msk [vmem:[#allocation4 + $0x1f8] sm:$0xff] %vm99_vm0, %v4927_v55  ;;  %v2517_v61 = vpop.f32.mrb[63].mxu1  ;;  %v3815_v16 = vld [vmem:[#allocation4 + $0x1d0] sm:$0xff]  ;;  %3880 = vst.msk [vmem:[%s7672_s3 + $0x1d8] sm:$0xff] %vm99_vm0, %v3816_v62  ;;  %v4073_v2 = vsub.f32 %v3816_v62, %v5070_v26  ;;  %v4252_v27 = vadd.f32 %v4251_v21, %v4250_v19  ;;  %v4255_v28 = vsel %vm99_vm0, %v4135_v52, 0.0 }
 0x427   :  { %2787 = vst.msk [vmem:[#allocation4 + $0x1f0] sm:$0xff] %vm99_vm0, %v2517_v61  ;;  %3879 = vst.msk [vmem:[%s7672_s3 + $0x1d0] sm:$0xff] %vm99_vm0, %v3815_v16  ;;  %v4072_v29 = vsub.f32 %v3815_v16, %v5071_v32  ;;  %v4253_v33 = vsel %vm99_vm0, %v4134_v41, 0.0 }
 0x428   :  { %v4254_v10 = vadd.f32 %v4253_v33, %v4252_v27  ;;  %v4137_v38 = vmul.f32 %v4073_v2, %v4073_v2 }
 0x429   :  { %v3818_v50 = vld [vmem:[#allocation4 + $0x1e8] sm:$0xff]  ;;  %v4136_v15 = vmul.f32 %v4072_v29, %v4072_v29 }
 0x42a   :  { %v3817_v35 = vld [vmem:[#allocation4 + $0x1e0] sm:$0xff]  ;;  %3882 = vst.msk [vmem:[%s7672_s3 + $0x1e8] sm:$0xff] %vm99_vm0, %v3818_v50  ;;  %v4075_v0 = vsub.f32 %v3818_v50, %v5072_v1  ;;  %v4256_v57 = vadd.f32 %v4255_v28, %v4254_v10  ;;  %v4259_v48 = vsel %vm99_vm0, %v4137_v38, 0.0 }
 0x42b   :  { %3881 = vst.msk [vmem:[%s7672_s3 + $0x1e0] sm:$0xff] %vm99_vm0, %v3817_v35  ;;  %v4074_v22 = vsub.f32 %v3817_v35, %v5073_v63  ;;  %v4257_v30 = vsel %vm99_vm0, %v4136_v15, 0.0 }
 0x42c   :  { %v4258_v6 = vadd.f32 %v4257_v30, %v4256_v57  ;;  %v4139_v56 = vmul.f32 %v4075_v0, %v4075_v0 }
 0x42d   :  { %v3820_v34 = vld [vmem:[#allocation4 + $0x1f8] sm:$0xff]  ;;  %v4138_v18 = vmul.f32 %v4074_v22, %v4074_v22 }
 0x42e   :  { %v3819_v7 = vld [vmem:[#allocation4 + $0x1f0] sm:$0xff]  ;;  %3884 = vst.msk [vmem:[%s7672_s3 + $0x1f8] sm:$0xff] %vm99_vm0, %v3820_v34  ;;  %v4077_v54 = vsub.f32 %v3820_v34, %v5074_v40  ;;  %v4260_v45 = vadd.f32 %v4259_v48, %v4258_v6  ;;  %v4263_v3 = vsel %vm99_vm0, %v4139_v56, 0.0 }
 0x42f   :  { %v4076_v42 = vsub.f32 %v3819_v7, %v5075_v4  ;;  %v4261_v44 = vsel %vm99_vm0, %v4138_v18, 0.0  ;;  %3883 = vst.msk [vmem:[%s7672_s3 + $0x1f0] sm:$0xff] %vm99_vm0, %v3819_v7  ;;  %s4291_s3 = sshll.u32 %s5101_s0, 4  ;;  %s4292_s3 = int_to_ptr.vmem [resolvable:$true] %s4291_s3 }
 0x430   :  { %v4262_v37 = vadd.f32 %v4261_v44, %v4260_v45  ;;  %v4141_v11 = vmul.f32 %v4077_v54, %v4077_v54  ;;  %s5076_s22 = scalar_lea.vmem %s4292_s3, 16  ;;  %s5080_s23 = scalar_lea.vmem %s4292_s3, 32 }
 0x431   :  { %v4140_v49 = vmul.f32 %v4076_v42, %v4076_v42  ;;  %p5077_p0 = scmp.ne.s32.totalorder %s4292_s3, %s5076_s22  ;;  %p5081_p1 = scmp.lt.s32.totalorder %s4292_s3, %s4292_s3 }
 0x432   :  { %v4264_v47 = vadd.f32 %v4263_v3, %v4262_v37  ;;  %v4267_v31 = vsel %vm99_vm0, %v4141_v11, 0.0  ;;  %p5082_p2 = scmp.lt.s32.totalorder %s5080_s23, %s5076_s22 }
 0x433   :  { %v4265_v59 = vsel %vm99_vm0, %v4140_v49, 0.0 }
 0x434   :  { %v4266_v5 = vadd.f32 %v4265_v59, %v4264_v47  ;;  %p5083_p3 = por %p5082_p2, %p5081_p1 }
 0x436   :  { %v4268_v24 = vadd.f32 %v4267_v31, %v4266_v5  ;;  %p5084_p4 = pnand %p5083_p3, %p5077_p0 }
 0x438   :  { %4269 = vadd.xlane.f32.xlu0 %v4268_v24 }
 0x4c5   :  { %v4270_v9 = vpop.xlane.xlu0 %4269 }
 0x4c6   :  { %v4271_v39 = vrot.slane %v4270_v9, 4 }
 0x4c8   :  { %v4272_v17 = vadd.f32 %v4271_v39, %v4270_v9 }
 0x4ca   :  { %v4273_v60 = vrot.slane %v4272_v17, 2 }
 0x4cc   :  { %v4274_v25 = vadd.f32 %v4273_v60, %v4272_v17 }
 0x4ce   :  { %v4275_v43 = vrot.slane %v4274_v25, 1 }
 0x4d0   :  { %v4276_v23 = vadd.f32 %v4275_v43, %v4274_v25 }
 0x4d2   :  { %5008 = vpush %v4276_v23 }
 0x503   :  { %s5009_s21 = spop %5008 }
 0x504   :  { %v4278_v36 = vstv %s5009_s21 }
 0x505   :  { %4280 = vst.msk [vmem:[#allocation5] sm:$0x1] %vm4279_vm2, %v4278_v36 }
 0x506   :  { %5087 = shalt.err (!%p5084_p4)
}
 0x507   :  { %s5088_s25 = scalar_lea.hbm %s7674_s5, 16 }
 0x508   :  { %p5089_p5 = scmp.ne.s32.totalorder %s7674_s5, %s5088_s25  ;;  %p5092_p6 = scmp.lt.u32.totalorder %s5088_s25, %s7674_s5 }
 0x50a   :  { %p5094_p7 = pnand %p5092_p6, %p5089_p5 }
 0x50c   :  { %5097 = shalt.err (!%p5094_p7)
}
 0x50d   :  { %4294 = dma.vmem_to_hbm [thread:$0]  %s4292_s3, 16, %s7674_s5, [#allocation6]  }
 0x50e   :  { %5098 = dma.done.wait [#allocation6], 16  }
 0x50f   :  { %5099 = vsyncadd [#allocation6], 4294967280 }
 0x510   :  { %4302 = vsyncpa [#allocation6], 1 }

</bundles_post_ra>
